<compile_context>
chip_gen: v6e
topology: v6e:2x2x1
jax: 0.10.0
libtpu: 0.0.40
codegen_flags: <defaults>
</compile_context>

<pallas_src>
import numpy as np
import jax
import jax.numpy as jnp
from jax.experimental import pallas as pl
from jax.experimental.pallas import tpu as pltpu


# ---------------------------------------------------------------------------
# Fused Pallas kernel
# ---------------------------------------------------------------------------
def _encoder_kernel(sent_ref, charp_ref, wemb_ref, cemb_ref,
                    convw_ref, convb_ref, bgate_ref, blin_ref,
                    wih_hbm, whh_hbm, wlin_hbm,
                    o_ref,
                    zc_ref, feat_ref, hseq_ref,
                    wih_vmem, whh_vmem, wlin_vmem, dma_sem):
    f32 = jnp.float32
    bf16 = jnp.bfloat16

    S = sent_ref.shape[0]            # sequence length (= LSTM time steps)
    SP = charp_ref.shape[0]          # S * (char_len + 2)  (zero-padded char rows)
    P = SP // S                      # char_len + 2
    L = P - 2                        # char_len
    N = SP - 2                       # valid conv rows in the flat padded layout
    NW = wemb_ref.shape[0]           # padded word vocab
    NC = cemb_ref.shape[0]           # padded char vocab
    C = cemb_ref.shape[1]            # char_dim
    Dw = wemb_ref.shape[1]           # word_dim
    GB = whh_vmem.shape[0]           # padded per-gate lane block: [fwd | bwd | 0s]
    T = S

    # ---- kick off the big-weight DMAs; they overlap with the embedding /
    #      conv / pooling phase and are waited right before first use --------
    cp_ih = pltpu.make_async_copy(wih_hbm, wih_vmem, dma_sem.at[0])
    cp_hh = pltpu.make_async_copy(whh_hbm, whh_vmem, dma_sem.at[1])
    cp_lin = pltpu.make_async_copy(wlin_hbm, wlin_vmem, dma_sem.at[2])
    cp_ih.start()
    cp_hh.start()
    cp_lin.start()

    # ---- word embedding lookup as a one-hot matmul (gather stays in-kernel) --
    wcol = jax.lax.broadcasted_iota(jnp.int32, (S, NW), 1)
    word_e = jnp.dot((wcol == sent_ref[...]).astype(f32),
                     wemb_ref[...].astype(f32),
                     preferred_element_type=f32)                     # (S, Dw)

    # ---- char embedding lookup; result lands in the tap-0 lanes of zc_ref ----
    # pad rows carry id == -1 -> all-zero one-hot row -> zero embedding row.
    ccol = jax.lax.broadcasted_iota(jnp.int32, (SP, NC), 1)
    zc_ref[:, 0:C] = jnp.dot((ccol == charp_ref[...]).astype(f32),
                             cemb_ref[...].astype(f32),
                             preferred_element_type=f32)             # (SP, C)

    # ---- assemble the 3-tap conv operand: row r gets [z[r] | z[r+1] | z[r+2]] --
    zc_ref[pl.ds(0, N), C:2 * C] = zc_ref[pl.ds(1, N), 0:C]
    zc_ref[pl.ds(0, N), 2 * C:3 * C] = zc_ref[pl.ds(2, N), 0:C]

    # ---- Conv1d(k=3, pad=1) + ReLU as ONE matmul over the stacked taps ----
    u = jnp.dot(zc_ref[pl.ds(0, N), :].astype(bf16), convw_ref[...],
                preferred_element_type=f32)
    u = jnp.maximum(u + convb_ref[...], 0.0)                         # (N, C)
    # rows r = s*P + t (t in [0,L)) are valid; trailing rows per word are
    # garbage and are masked out by the pooling matrix below.

    # ---- mean over char positions via an in-kernel pooling matrix ----
    srow = jax.lax.broadcasted_iota(jnp.int32, (S, N), 0)
    rcol = jax.lax.broadcasted_iota(jnp.int32, (S, N), 1)
    pool = ((rcol >= srow * P) & (rcol < srow * P + L)).astype(f32) * (1.0 / L)
    char_feat = jnp.dot(pool, u, preferred_element_type=f32)         # (S, C)

    # ---- fused BiLSTM input projection: ONE (S, Dw+C) x (Dw+C, 8*GB) push ----
    feat_ref[:, 0:Dw] = word_e
    feat_ref[:, Dw:Dw + C] = char_feat
    feat = feat_ref[...].astype(bf16)
    cp_ih.wait()                                   # wih must be resident now
    xg = jnp.dot(feat, wih_vmem[...], preferred_element_type=f32)    # (S, 8*GB)
    xgf = xg[:, 0:4 * GB] + bgate_ref[...]         # fwd x-contrib (+ all biases)
    xgb = xg[:, 4 * GB:8 * GB]                     # bwd x-contrib (no bias)

    # ---- interleaved fwd/bwd recurrence, fully unrolled ----
    # Gate lane layout per 4*GB row: [ i | f | o | g ], each gate block GB wide
    # with fwd lanes at offset 0 and bwd lanes at offset H.
    cp_hh.wait()
    whh = whh_vmem[...]                            # (GB, 4*GB) bf16, loaded once
    h_t = jnp.zeros((1, GB), f32)
    c_t = jnp.zeros((1, GB), f32)
    for s in range(T):                             # T small & static -> unrolled
        gates = (xgf[s:s + 1, :] + xgb[T - 1 - s:T - s, :]
                 + jnp.dot(h_t.astype(bf16), whh, preferred_element_type=f32))
        sig = jax.nn.sigmoid(gates[:, 0:3 * GB])   # one EUP pass for i, f, o
        g_g = jnp.tanh(gates[:, 3 * GB:4 * GB])
        c_t = sig[:, GB:2 * GB] * c_t + sig[:, 0:GB] * g_g
        h_t = sig[:, 2 * GB:3 * GB] * jnp.tanh(c_t)
        hseq_ref[pl.ds(s, 1), 0:GB] = h_t              # fwd lanes valid @ time s
        hseq_ref[pl.ds(T - 1 - s, 1), GB:2 * GB] = h_t  # bwd lanes valid @ T-1-s

    # ---- final Linear over [h_fwd | h_bwd] (dropout == identity in eval) ----
    # wlin only has nonzero rows where the corresponding lanes are time-correct,
    # so the "wrong-time" lanes stored in hseq never contribute.
    cp_lin.wait()
    o_ref[...] = (jnp.dot(hseq_ref[...].astype(bf16), wlin_vmem[...],
                          preferred_element_type=f32) + blin_ref[...])


# ---------------------------------------------------------------------------
# One-time parameter preparation (hoisted out of the forward path)
# ---------------------------------------------------------------------------
def prepare_params(params):
    bf16 = jnp.bfloat16
    H = params['w_hh_f'].shape[1]
    GB = ((2 * H + 127) // 128) * 128            # one 128-aligned block per gate
    num_tag = params['lin_w'].shape[0]
    OUT = ((num_tag + 127) // 128) * 128         # lane-dense output width
    word_dim = params['word_emb'].shape[1]
    char_dim = params['char_emb'].shape[1]
    in_dim = word_dim + char_dim
    GATE_PERM = (0, 1, 3, 2)                     # kernel [i,f,o,g] from torch [i,f,g,o]

    def npf(x):
        return np.asarray(x, np.float32)

    def pack_ih(w_ih, off):                      # (4H, in_dim) -> (in_dim, 4*GB)
        wt = npf(w_ih).T
        out = np.zeros((in_dim, 4 * GB), np.float32)
        for k, kt in enumerate(GATE_PERM):
            out[:, k * GB + off:k * GB + off + H] = wt[:, kt * H:(kt + 1) * H]
        return out

    def pack_hh(w_hh, off):                      # (4H, H) -> (GB, 4*GB)
        out = np.zeros((GB, 4 * GB), np.float32)
        for k, kt in enumerate(GATE_PERM):
            out[off:off + H, k * GB + off:k * GB + off + H] = \
                npf(w_hh)[kt * H:(kt + 1) * H, :].T
        return out

    def pack_b(b, off):                          # (4H,) -> (1, 4*GB)
        out = np.zeros((1, 4 * GB), np.float32)
        for k, kt in enumerate(GATE_PERM):
            out[0, k * GB + off:k * GB + off + H] = npf(b)[kt * H:(kt + 1) * H]
        return out

    # Fused input projection: columns [0,4GB) = fwd gates, [4GB,8GB) = bwd gates.
    wih_all = np.concatenate([pack_ih(params['w_ih_f'], 0),
                              pack_ih(params['w_ih_b'], H)], axis=1)   # (in_dim, 8GB)
    whh_all = pack_hh(params['w_hh_f'], 0) + pack_hh(params['w_hh_b'], H)
    bgate = (pack_b(npf(params['b_ih_f']) + npf(params['b_hh_f']), 0)
             + pack_b(npf(params['b_ih_b']) + npf(params['b_hh_b']), H))

    # Fused final linear over hcat = [h_seq | h_seq_reversed] lanes.
    lin_w = npf(params['lin_w'])                 # (num_tag, 2H)
    wlin_all = np.zeros((2 * GB, OUT), np.float32)
    wlin_all[0:H, :num_tag] = lin_w[:, :H].T                 # fwd lanes of first half
    wlin_all[GB + H:GB + 2 * H, :num_tag] = lin_w[:, H:].T   # bwd lanes of second half
    blin = np.zeros((1, OUT), np.float32)
    blin[0, :num_tag] = npf(params['lin_b'])

    # Row-pad embedding tables to 128 so one-hot widths / K dims are tile aligned.
    NW = ((params['word_emb'].shape[0] + 127) // 128) * 128
    NC = ((params['char_emb'].shape[0] + 127) // 128) * 128
    wemb = np.zeros((NW, word_dim), np.float32)
    wemb[:params['word_emb'].shape[0]] = npf(params['word_emb'])
    cemb = np.zeros((NC, char_dim), np.float32)
    cemb[:params['char_emb'].shape[0]] = npf(params['char_emb'])

    # Stacked conv taps: rows [0,C)=k0, [C,2C)=k1, [2C,3C)=k2, each (in_C, out_C).
    conv_w = npf(params['conv_w'])               # (out_C, in_C, 3)
    conv_taps = np.concatenate([conv_w[:, :, k].T for k in range(3)], axis=0)

    return {
        'word_emb': jnp.asarray(wemb, bf16),
        'char_emb': jnp.asarray(cemb, bf16),
        'conv_taps': jnp.asarray(conv_taps, bf16),
        'conv_b': jnp.asarray(npf(params['conv_b']).reshape(1, char_dim)),
        'bgate': jnp.asarray(bgate),
        'blin': jnp.asarray(blin),
        'wih_all': jnp.asarray(wih_all, bf16),
        'whh_all': jnp.asarray(whh_all, bf16),
        'wlin_all': jnp.asarray(wlin_all, bf16),
    }


# ---------------------------------------------------------------------------
# Forward wrapper (single pallas_call; minimal integer-only glue)
# ---------------------------------------------------------------------------
def encoder_lstm_forward(prep, chars, sent, num_tag):
    """chars: (1, S, L) int ids;  sent: (1, S) int ids.  Returns (S, num_tag)."""
    S, L = chars.shape[1], chars.shape[2]
    P = L + 2
    C = prep['char_emb'].shape[1]
    Dw = prep['word_emb'].shape[1]
    GB = prep['whh_all'].shape[0]
    OUT = prep['blin'].shape[1]

    sent_ids = sent.reshape(S, 1).astype(jnp.int32)
    char_ids = jnp.pad(chars[0].astype(jnp.int32), ((0, 0), (1, 1)),
                       constant_values=-1).reshape(S * P, 1)

    vmem = pl.BlockSpec(memory_space=pltpu.MemorySpace.VMEM)
    hbm = pl.BlockSpec(memory_space=pl.ANY)     # late-used weights: manual DMA

    out = pl.pallas_call(
        _encoder_kernel,
        out_shape=jax.ShapeDtypeStruct((S, OUT), jnp.float32),
        in_specs=[vmem] * 8 + [hbm] * 3,
        out_specs=vmem,
        scratch_shapes=[
            pltpu.VMEM((S * P, 3 * C), jnp.float32),          # char emb + conv taps
            pltpu.VMEM((S, Dw + C), jnp.float32),             # fused feature block
            pltpu.VMEM((S, 2 * GB), jnp.float32),             # [h_fwd | h_bwd] seq
            pltpu.VMEM(prep['wih_all'].shape, jnp.bfloat16),  # DMA landing buffers
            pltpu.VMEM(prep['whh_all'].shape, jnp.bfloat16),
            pltpu.VMEM(prep['wlin_all'].shape, jnp.bfloat16),
            pltpu.SemaphoreType.DMA((3,)),
        ],
    )(sent_ids, char_ids, prep['word_emb'], prep['char_emb'],
      prep['conv_taps'], prep['conv_b'], prep['bgate'], prep['blin'],
      prep['wih_all'], prep['whh_all'], prep['wlin_all'])

    return out[:, :num_tag]


# ---------------------------------------------------------------------------
# Pure-JAX reference (for correctness check)
# ---------------------------------------------------------------------------
def ref_forward(params, chars, sent):
    word_e = params['word_emb'][sent[0]]
    char_e = params['char_emb'][chars[0]]               # (S, L, Dc)
    x_ncl = jnp.transpose(char_e, (0, 2, 1))            # torch NCL
    y = jax.lax.conv_general_dilated(
        x_ncl, params['conv_w'], window_strides=(1,), padding=((1, 1),),
        dimension_numbers=('NCH', 'OIH', 'NCH'))
    y = jnp.maximum(y + params['conv_b'][None, :, None], 0.0)
    char_feat = jnp.mean(y, axis=2)
    x = jnp.concatenate([word_e, char_feat], axis=1)

    H = params['w_hh_f'].shape[1]

    def run_dir(x_seq, w_ih, w_hh, b_ih, b_hh):
        def step(carry, xt):
            h, c = carry
            gates = xt @ w_ih.T + h @ w_hh.T + b_ih + b_hh
            i = jax.nn.sigmoid(gates[0:H])
            f = jax.nn.sigmoid(gates[H:2 * H])
            g = jnp.tanh(gates[2 * H:3 * H])
            o = jax.nn.sigmoid(gates[3 * H:4 * H])
            c = f * c + i * g
            h = o * jnp.tanh(c)
            return (h, c), h
        init = (jnp.zeros((H,), jnp.float32), jnp.zeros((H,), jnp.float32))
        _, hs = jax.lax.scan(step, init, x_seq)
        return hs

    h_f = run_dir(x, params['w_ih_f'], params['w_hh_f'],
                  params['b_ih_f'], params['b_hh_f'])
    h_b = run_dir(x[::-1], params['w_ih_b'], params['w_hh_b'],
                  params['b_ih_b'], params['b_hh_b'])[::-1]
    y = jnp.concatenate([h_f, h_b], axis=1)
    return y @ params['lin_w'].T + params['lin_b']


# ---------------------------------------------------------------------------
if __name__ == "__main__":
    num_words, word_dim = 100, 32
    num_chars, char_dim = 40, 16
    num_tag, lstm_emb = 8, 32
    seq_len, char_len = 8, 12
    in_dim = word_dim + char_dim

    ks = jax.random.split(jax.random.PRNGKey(0), 16)
    s = 0.1
    params = {
        'word_emb': s * jax.random.normal(ks[0], (num_words, word_dim), jnp.float32),
        'char_emb': s * jax.random.normal(ks[1], (num_chars, char_dim), jnp.float32),
        'conv_w':   s * jax.random.normal(ks[2], (char_dim, char_dim, 3), jnp.float32),
        'conv_b':   s * jax.random.normal(ks[3], (char_dim,), jnp.float32),
        'w_ih_f':   s * jax.random.normal(ks[4], (4 * lstm_emb, in_dim), jnp.float32),
        'w_hh_f':   s * jax.random.normal(ks[5], (4 * lstm_emb, lstm_emb), jnp.float32),
        'b_ih_f':   s * jax.random.normal(ks[6], (4 * lstm_emb,), jnp.float32),
        'b_hh_f':   s * jax.random.normal(ks[7], (4 * lstm_emb,), jnp.float32),
        'w_ih_b':   s * jax.random.normal(ks[8], (4 * lstm_emb, in_dim), jnp.float32),
        'w_hh_b':   s * jax.random.normal(ks[9], (4 * lstm_emb, lstm_emb), jnp.float32),
        'b_ih_b':   s * jax.random.normal(ks[10], (4 * lstm_emb,), jnp.float32),
        'b_hh_b':   s * jax.random.normal(ks[11], (4 * lstm_emb,), jnp.float32),
        'lin_w':    s * jax.random.normal(ks[12], (num_tag, 2 * lstm_emb), jnp.float32),
        'lin_b':    s * jax.random.normal(ks[13], (num_tag,), jnp.float32),
    }
    chars = jax.random.randint(ks[14], (1, seq_len, char_len), 0, num_chars, jnp.int32)
    sent = jax.random.randint(ks[15], (1, seq_len), 0, num_words, jnp.int32)

    prep = jax.tree_util.tree_map(jax.block_until_ready, prepare_params(params))
    fwd = jax.jit(lambda p, ch, st: encoder_lstm_forward(p, ch, st, num_tag))

    out = jax.block_until_ready(fwd(prep, chars, sent))
    ref = jax.block_until_ready(ref_forward(params, chars, sent))

    assert out.shape == (seq_len, num_tag), out.shape
    np.testing.assert_allclose(np.asarray(out, dtype=np.float32),
                               np.asarray(ref, dtype=np.float32),
                               rtol=5e-2, atol=5e-3)
    print("KERNEL_OK")
</pallas_src>

<mosaic_0001>
module attributes {stable_mosaic.version = 11 : i64} {
  func.func @_encoder_kernel(%arg0: memref<8x1xi32, #tpu.memory_space<vmem>>, %arg1: memref<112x1xi32, #tpu.memory_space<vmem>>, %arg2: memref<128x32xbf16, #tpu.memory_space<vmem>>, %arg3: memref<128x16xbf16, #tpu.memory_space<vmem>>, %arg4: memref<48x16xbf16, #tpu.memory_space<vmem>>, %arg5: memref<1x16xf32, #tpu.memory_space<vmem>>, %arg6: memref<1x512xf32, #tpu.memory_space<vmem>>, %arg7: memref<1x128xf32, #tpu.memory_space<vmem>>, %arg8: memref<48x1024xbf16, #tpu.memory_space<any>>, %arg9: memref<128x512xbf16, #tpu.memory_space<any>>, %arg10: memref<256x128xbf16, #tpu.memory_space<any>>, %arg11: memref<8x128xf32, #tpu.memory_space<vmem>>, %arg12: memref<112x48xf32, #tpu.memory_space<vmem>>, %arg13: memref<8x48xf32, #tpu.memory_space<vmem>>, %arg14: memref<8x256xf32, #tpu.memory_space<vmem>>, %arg15: memref<48x1024xbf16, #tpu.memory_space<vmem>>, %arg16: memref<128x512xbf16, #tpu.memory_space<vmem>>, %arg17: memref<256x128xbf16, #tpu.memory_space<vmem>>, %arg18: memref<3x!tpu.dma_semaphore, #tpu.memory_space<semaphore_mem>>) attributes {dimension_semantics = [], scalar_prefetch = 0 : i64, scratch_operands = 7 : i64, tpu.core_type = #tpu.core_type<tc>} {
    %c0_i32 = arith.constant 0 : i32
    %0 = tpu.memref_slice %arg18[%c0_i32] : memref<3x!tpu.dma_semaphore, #tpu.memory_space<semaphore_mem>> -> memref<1x!tpu.dma_semaphore, #tpu.memory_space<semaphore_mem>>
    %1 = tpu.memref_squeeze %0 : memref<1x!tpu.dma_semaphore, #tpu.memory_space<semaphore_mem>> -> memref<!tpu.dma_semaphore, #tpu.memory_space<semaphore_mem>>
    tpu.enqueue_dma source(%arg8 : memref<48x1024xbf16, #tpu.memory_space<any>>) target(%arg15 : memref<48x1024xbf16, #tpu.memory_space<vmem>>) target_semaphore(%1 : memref<!tpu.dma_semaphore, #tpu.memory_space<semaphore_mem>>)
    %c1_i32 = arith.constant 1 : i32
    %2 = tpu.memref_slice %arg18[%c1_i32] : memref<3x!tpu.dma_semaphore, #tpu.memory_space<semaphore_mem>> -> memref<1x!tpu.dma_semaphore, #tpu.memory_space<semaphore_mem>>
    %3 = tpu.memref_squeeze %2 : memref<1x!tpu.dma_semaphore, #tpu.memory_space<semaphore_mem>> -> memref<!tpu.dma_semaphore, #tpu.memory_space<semaphore_mem>>
    tpu.enqueue_dma source(%arg9 : memref<128x512xbf16, #tpu.memory_space<any>>) target(%arg16 : memref<128x512xbf16, #tpu.memory_space<vmem>>) target_semaphore(%3 : memref<!tpu.dma_semaphore, #tpu.memory_space<semaphore_mem>>)
    %c2_i32 = arith.constant 2 : i32
    %4 = tpu.memref_slice %arg18[%c2_i32] : memref<3x!tpu.dma_semaphore, #tpu.memory_space<semaphore_mem>> -> memref<1x!tpu.dma_semaphore, #tpu.memory_space<semaphore_mem>>
    %5 = tpu.memref_squeeze %4 : memref<1x!tpu.dma_semaphore, #tpu.memory_space<semaphore_mem>> -> memref<!tpu.dma_semaphore, #tpu.memory_space<semaphore_mem>>
    tpu.enqueue_dma source(%arg10 : memref<256x128xbf16, #tpu.memory_space<any>>) target(%arg17 : memref<256x128xbf16, #tpu.memory_space<vmem>>) target_semaphore(%5 : memref<!tpu.dma_semaphore, #tpu.memory_space<semaphore_mem>>)
    %6 = tpu.iota {dimensions = array<i32: 1>} : vector<8x128xi32>
    %c0 = arith.constant 0 : index
    %c0_0 = arith.constant 0 : index
    %7 = vector.load %arg0[%c0, %c0_0] : memref<8x1xi32, #tpu.memory_space<vmem>>, vector<8x1xi32>
    %8 = vector.broadcast %7 : vector<8x1xi32> to vector<8x128xi32>
    %9 = arith.cmpi eq, %6, %8 : vector<8x128xi32>
    %10 = arith.extui %9 : vector<8x128xi1> to vector<8x128xi32>
    %11 = arith.sitofp %10 : vector<8x128xi32> to vector<8x128xf32>
    %c0_1 = arith.constant 0 : index
    %c0_2 = arith.constant 0 : index
    %12 = vector.load %arg2[%c0_1, %c0_2] : memref<128x32xbf16, #tpu.memory_space<vmem>>, vector<128x32xbf16>
    %13 = arith.extf %12 : vector<128x32xbf16> to vector<128x32xf32>
    %cst = arith.constant dense<0.000000e+00> : vector<8x32xf32>
    %14 = tpu.matmul %11, %13, %cst {dimension_numbers = #tpu.dot_dimension_numbers<[1], [0], [0], [1], [0, 0, 1, 1], [], []>} : vector<8x128xf32>, vector<128x32xf32>, vector<8x32xf32> -> vector<8x32xf32>
    %15 = tpu.iota {dimensions = array<i32: 1>} : vector<112x128xi32>
    %c0_3 = arith.constant 0 : index
    %c0_4 = arith.constant 0 : index
    %16 = vector.load %arg1[%c0_3, %c0_4] : memref<112x1xi32, #tpu.memory_space<vmem>>, vector<112x1xi32>
    %17 = vector.broadcast %16 : vector<112x1xi32> to vector<112x128xi32>
    %18 = arith.cmpi eq, %15, %17 : vector<112x128xi32>
    %19 = arith.extui %18 : vector<112x128xi1> to vector<112x128xi32>
    %20 = arith.sitofp %19 : vector<112x128xi32> to vector<112x128xf32>
    %c0_5 = arith.constant 0 : index
    %c0_6 = arith.constant 0 : index
    %21 = vector.load %arg3[%c0_5, %c0_6] : memref<128x16xbf16, #tpu.memory_space<vmem>>, vector<128x16xbf16>
    %22 = arith.extf %21 : vector<128x16xbf16> to vector<128x16xf32>
    %cst_7 = arith.constant dense<0.000000e+00> : vector<112x16xf32>
    %23 = tpu.matmul %20, %22, %cst_7 {dimension_numbers = #tpu.dot_dimension_numbers<[1], [0], [0], [1], [0, 0, 1, 1], [], []>} : vector<112x128xf32>, vector<128x16xf32>, vector<112x16xf32> -> vector<112x16xf32>
    %c0_8 = arith.constant 0 : index
    %c0_9 = arith.constant 0 : index
    %24 = vector.load %arg12[%c0_8, %c0_9] : memref<112x48xf32, #tpu.memory_space<vmem>>, vector<112x16xf32>
    tpu.vector_store %arg12[%c0_8, %c0_9], %23 {strides = array<i32>} : memref<112x48xf32, #tpu.memory_space<vmem>>, vector<112x16xf32>,
    %c1 = arith.constant 1 : index
    %c0_10 = arith.constant 0 : index
    %25 = vector.load %arg12[%c1, %c0_10] : memref<112x48xf32, #tpu.memory_space<vmem>>, vector<110x16xf32>
    %c0_11 = arith.constant 0 : index
    %c16 = arith.constant 16 : index
    %26 = vector.load %arg12[%c0_11, %c16] : memref<112x48xf32, #tpu.memory_space<vmem>>, vector<110x16xf32>
    tpu.vector_store %arg12[%c0_11, %c16], %25 {strides = array<i32>} : memref<112x48xf32, #tpu.memory_space<vmem>>, vector<110x16xf32>,
    %c2 = arith.constant 2 : index
    %c0_12 = arith.constant 0 : index
    %27 = vector.load %arg12[%c2, %c0_12] : memref<112x48xf32, #tpu.memory_space<vmem>>, vector<110x16xf32>
    %c0_13 = arith.constant 0 : index
    %c32 = arith.constant 32 : index
    %28 = vector.load %arg12[%c0_13, %c32] : memref<112x48xf32, #tpu.memory_space<vmem>>, vector<110x16xf32>
    tpu.vector_store %arg12[%c0_13, %c32], %27 {strides = array<i32>} : memref<112x48xf32, #tpu.memory_space<vmem>>, vector<110x16xf32>,
    %c0_14 = arith.constant 0 : index
    %c0_15 = arith.constant 0 : index
    %29 = vector.load %arg12[%c0_14, %c0_15] : memref<112x48xf32, #tpu.memory_space<vmem>>, vector<110x48xf32>
    %30 = arith.truncf %29 : vector<110x48xf32> to vector<110x48xbf16>
    %c0_16 = arith.constant 0 : index
    %c0_17 = arith.constant 0 : index
    %31 = vector.load %arg4[%c0_16, %c0_17] : memref<48x16xbf16, #tpu.memory_space<vmem>>, vector<48x16xbf16>
    %cst_18 = arith.constant dense<0.000000e+00> : vector<110x16xf32>
    %32 = tpu.matmul %30, %31, %cst_18 {dimension_numbers = #tpu.dot_dimension_numbers<[1], [0], [0], [1], [0, 0, 1, 1], [], []>} : vector<110x48xbf16>, vector<48x16xbf16>, vector<110x16xf32> -> vector<110x16xf32>
    %c0_19 = arith.constant 0 : index
    %c0_20 = arith.constant 0 : index
    %33 = vector.load %arg5[%c0_19, %c0_20] : memref<1x16xf32, #tpu.memory_space<vmem>>, vector<1x16xf32>
    %34 = vector.broadcast %33 : vector<1x16xf32> to vector<110x16xf32>
    %35 = arith.addf %32, %34 : vector<110x16xf32>
    %cst_21 = arith.constant 0.000000e+00 : f32
    %36 = vector.broadcast %cst_21 : f32 to vector<110x16xf32>
    %37 = arith.maximumf %35, %36 : vector<110x16xf32>
    %38 = tpu.iota {dimensions = array<i32: 0>} : vector<8x110xi32>
    %39 = tpu.iota {dimensions = array<i32: 1>} : vector<8x110xi32>
    %c14_i32 = arith.constant 14 : i32
    %40 = vector.broadcast %c14_i32 : i32 to vector<8x110xi32>
    %41 = arith.muli %38, %40 : vector<8x110xi32>
    %42 = arith.cmpi sge, %39, %41 : vector<8x110xi32>
    %c14_i32_22 = arith.constant 14 : i32
    %43 = vector.broadcast %c14_i32_22 : i32 to vector<8x110xi32>
    %44 = arith.muli %38, %43 : vector<8x110xi32>
    %c12_i32 = arith.constant 12 : i32
    %45 = vector.broadcast %c12_i32 : i32 to vector<8x110xi32>
    %46 = arith.addi %44, %45 : vector<8x110xi32>
    %47 = arith.cmpi slt, %39, %46 : vector<8x110xi32>
    %48 = arith.andi %42, %47 : vector<8x110xi1>
    %49 = arith.extui %48 : vector<8x110xi1> to vector<8x110xi32>
    %50 = arith.sitofp %49 : vector<8x110xi32> to vector<8x110xf32>
    %cst_23 = arith.constant 0.0833333358 : f32
    %51 = vector.broadcast %cst_23 : f32 to vector<8x110xf32>
    %52 = arith.mulf %50, %51 : vector<8x110xf32>
    %cst_24 = arith.constant dense<0.000000e+00> : vector<8x16xf32>
    %53 = tpu.matmul %52, %37, %cst_24 {dimension_numbers = #tpu.dot_dimension_numbers<[1], [0], [0], [1], [0, 0, 1, 1], [], []>} : vector<8x110xf32>, vector<110x16xf32>, vector<8x16xf32> -> vector<8x16xf32>
    %c0_25 = arith.constant 0 : index
    %c0_26 = arith.constant 0 : index
    %54 = vector.load %arg13[%c0_25, %c0_26] : memref<8x48xf32, #tpu.memory_space<vmem>>, vector<8x32xf32>
    tpu.vector_store %arg13[%c0_25, %c0_26], %14 {strides = array<i32>} : memref<8x48xf32, #tpu.memory_space<vmem>>, vector<8x32xf32>,
    %c0_27 = arith.constant 0 : index
    %c32_28 = arith.constant 32 : index
    %55 = vector.load %arg13[%c0_27, %c32_28] : memref<8x48xf32, #tpu.memory_space<vmem>>, vector<8x16xf32>
    tpu.vector_store %arg13[%c0_27, %c32_28], %53 {strides = array<i32>} : memref<8x48xf32, #tpu.memory_space<vmem>>, vector<8x16xf32>,
    %c0_29 = arith.constant 0 : index
    %c0_30 = arith.constant 0 : index
    %56 = vector.load %arg13[%c0_29, %c0_30] : memref<8x48xf32, #tpu.memory_space<vmem>>, vector<8x48xf32>
    %57 = arith.truncf %56 : vector<8x48xf32> to vector<8x48xbf16>
    %c0_i32_31 = arith.constant 0 : i32
    %58 = tpu.memref_slice %arg18[%c0_i32_31] : memref<3x!tpu.dma_semaphore, #tpu.memory_space<semaphore_mem>> -> memref<1x!tpu.dma_semaphore, #tpu.memory_space<semaphore_mem>>
    %59 = tpu.memref_squeeze %58 : memref<1x!tpu.dma_semaphore, #tpu.memory_space<semaphore_mem>> -> memref<!tpu.dma_semaphore, #tpu.memory_space<semaphore_mem>>
    tpu.wait_dma2 semaphore(%59 : memref<!tpu.dma_semaphore, #tpu.memory_space<semaphore_mem>>) src(%arg8 : memref<48x1024xbf16, #tpu.memory_space<any>>) dst(%arg15 : memref<48x1024xbf16, #tpu.memory_space<vmem>>)
    %c0_32 = arith.constant 0 : index
    %c0_33 = arith.constant 0 : index
    %60 = vector.load %arg15[%c0_32, %c0_33] : memref<48x1024xbf16, #tpu.memory_space<vmem>>, vector<48x1024xbf16>
    %cst_34 = arith.constant dense<0.000000e+00> : vector<8x1024xf32>
    %61 = tpu.matmul %57, %60, %cst_34 {dimension_numbers = #tpu.dot_dimension_numbers<[1], [0], [0], [1], [0, 0, 1, 1], [], []>} : vector<8x48xbf16>, vector<48x1024xbf16>, vector<8x1024xf32> -> vector<8x1024xf32>
    %62 = vector.extract_strided_slice %61 {offsets = [0, 0], sizes = [8, 512], strides = [1, 1]} : vector<8x1024xf32> to vector<8x512xf32>
    %c0_35 = arith.constant 0 : index
    %c0_36 = arith.constant 0 : index
    %63 = vector.load %arg6[%c0_35, %c0_36] : memref<1x512xf32, #tpu.memory_space<vmem>>, vector<1x512xf32>
    %64 = vector.broadcast %63 : vector<1x512xf32> to vector<8x512xf32>
    %65 = arith.addf %62, %64 : vector<8x512xf32>
    %66 = vector.extract_strided_slice %61 {offsets = [0, 512], sizes = [8, 512], strides = [1, 1]} : vector<8x1024xf32> to vector<8x512xf32>
    %c1_i32_37 = arith.constant 1 : i32
    %67 = tpu.memref_slice %arg18[%c1_i32_37] : memref<3x!tpu.dma_semaphore, #tpu.memory_space<semaphore_mem>> -> memref<1x!tpu.dma_semaphore, #tpu.memory_space<semaphore_mem>>
    %68 = tpu.memref_squeeze %67 : memref<1x!tpu.dma_semaphore, #tpu.memory_space<semaphore_mem>> -> memref<!tpu.dma_semaphore, #tpu.memory_space<semaphore_mem>>
    tpu.wait_dma2 semaphore(%68 : memref<!tpu.dma_semaphore, #tpu.memory_space<semaphore_mem>>) src(%arg9 : memref<128x512xbf16, #tpu.memory_space<any>>) dst(%arg16 : memref<128x512xbf16, #tpu.memory_space<vmem>>)
    %c0_38 = arith.constant 0 : index
    %c0_39 = arith.constant 0 : index
    %69 = vector.load %arg16[%c0_38, %c0_39] : memref<128x512xbf16, #tpu.memory_space<vmem>>, vector<128x512xbf16>
    %cst_40 = arith.constant 0.000000e+00 : f32
    %70 = vector.broadcast %cst_40 : f32 to vector<1x128xf32>
    %cst_41 = arith.constant 0.000000e+00 : f32
    %71 = vector.broadcast %cst_41 : f32 to vector<1x128xf32>
    %72 = vector.extract_strided_slice %65 {offsets = [0, 0], sizes = [1, 512], strides = [1, 1]} : vector<8x512xf32> to vector<1x512xf32>
    %73 = vector.extract_strided_slice %66 {offsets = [7, 0], sizes = [1, 512], strides = [1, 1]} : vector<8x512xf32> to vector<1x512xf32>
    %74 = arith.addf %72, %73 : vector<1x512xf32>
    %75 = arith.truncf %70 : vector<1x128xf32> to vector<1x128xbf16>
    %cst_42 = arith.constant dense<0.000000e+00> : vector<1x512xf32>
    %76 = tpu.matmul %75, %69, %cst_42 {dimension_numbers = #tpu.dot_dimension_numbers<[1], [0], [0], [1], [0, 0, 1, 1], [], []>} : vector<1x128xbf16>, vector<128x512xbf16>, vector<1x512xf32> -> vector<1x512xf32>
    %77 = arith.addf %74, %76 : vector<1x512xf32>
    %78 = vector.extract_strided_slice %77 {offsets = [0, 0], sizes = [1, 384], strides = [1, 1]} : vector<1x512xf32> to vector<1x384xf32>
    %79 = arith.negf %78 : vector<1x384xf32>
    %80 = math.exp %79 : vector<1x384xf32>
    %cst_43 = arith.constant 1.000000e+00 : f32
    %81 = vector.broadcast %cst_43 : f32 to vector<1x384xf32>
    %82 = arith.addf %81, %80 : vector<1x384xf32>
    %83 = arith.divf %81, %82 : vector<1x384xf32>
    %84 = vector.extract_strided_slice %77 {offsets = [0, 384], sizes = [1, 128], strides = [1, 1]} : vector<1x512xf32> to vector<1x128xf32>
    %85 = math.tanh %84 : vector<1x128xf32>
    %86 = vector.extract_strided_slice %83 {offsets = [0, 128], sizes = [1, 128], strides = [1, 1]} : vector<1x384xf32> to vector<1x128xf32>
    %87 = arith.mulf %86, %71 : vector<1x128xf32>
    %88 = vector.extract_strided_slice %83 {offsets = [0, 0], sizes = [1, 128], strides = [1, 1]} : vector<1x384xf32> to vector<1x128xf32>
    %89 = arith.mulf %88, %85 : vector<1x128xf32>
    %90 = arith.addf %87, %89 : vector<1x128xf32>
    %91 = vector.extract_strided_slice %83 {offsets = [0, 256], sizes = [1, 128], strides = [1, 1]} : vector<1x384xf32> to vector<1x128xf32>
    %92 = math.tanh %90 : vector<1x128xf32>
    %93 = arith.mulf %91, %92 : vector<1x128xf32>
    %c0_44 = arith.constant 0 : index
    %c0_45 = arith.constant 0 : index
    %94 = vector.load %arg14[%c0_44, %c0_45] : memref<8x256xf32, #tpu.memory_space<vmem>>, vector<1x128xf32>
    tpu.vector_store %arg14[%c0_44, %c0_45], %93 {strides = array<i32>} : memref<8x256xf32, #tpu.memory_space<vmem>>, vector<1x128xf32>,
    %c7 = arith.constant 7 : index
    %c128 = arith.constant 128 : index
    %95 = vector.load %arg14[%c7, %c128] : memref<8x256xf32, #tpu.memory_space<vmem>>, vector<1x128xf32>
    tpu.vector_store %arg14[%c7, %c128], %93 {strides = array<i32>} : memref<8x256xf32, #tpu.memory_space<vmem>>, vector<1x128xf32>,
    %96 = vector.extract_strided_slice %65 {offsets = [1, 0], sizes = [1, 512], strides = [1, 1]} : vector<8x512xf32> to vector<1x512xf32>
    %97 = vector.extract_strided_slice %66 {offsets = [6, 0], sizes = [1, 512], strides = [1, 1]} : vector<8x512xf32> to vector<1x512xf32>
    %98 = arith.addf %96, %97 : vector<1x512xf32>
    %99 = arith.truncf %93 : vector<1x128xf32> to vector<1x128xbf16>
    %cst_46 = arith.constant dense<0.000000e+00> : vector<1x512xf32>
    %100 = tpu.matmul %99, %69, %cst_46 {dimension_numbers = #tpu.dot_dimension_numbers<[1], [0], [0], [1], [0, 0, 1, 1], [], []>} : vector<1x128xbf16>, vector<128x512xbf16>, vector<1x512xf32> -> vector<1x512xf32>
    %101 = arith.addf %98, %100 : vector<1x512xf32>
    %102 = vector.extract_strided_slice %101 {offsets = [0, 0], sizes = [1, 384], strides = [1, 1]} : vector<1x512xf32> to vector<1x384xf32>
    %103 = arith.negf %102 : vector<1x384xf32>
    %104 = math.exp %103 : vector<1x384xf32>
    %cst_47 = arith.constant 1.000000e+00 : f32
    %105 = vector.broadcast %cst_47 : f32 to vector<1x384xf32>
    %106 = arith.addf %105, %104 : vector<1x384xf32>
    %107 = arith.divf %105, %106 : vector<1x384xf32>
    %108 = vector.extract_strided_slice %101 {offsets = [0, 384], sizes = [1, 128], strides = [1, 1]} : vector<1x512xf32> to vector<1x128xf32>
    %109 = math.tanh %108 : vector<1x128xf32>
    %110 = vector.extract_strided_slice %107 {offsets = [0, 128], sizes = [1, 128], strides = [1, 1]} : vector<1x384xf32> to vector<1x128xf32>
    %111 = arith.mulf %110, %90 : vector<1x128xf32>
    %112 = vector.extract_strided_slice %107 {offsets = [0, 0], sizes = [1, 128], strides = [1, 1]} : vector<1x384xf32> to vector<1x128xf32>
    %113 = arith.mulf %112, %109 : vector<1x128xf32>
    %114 = arith.addf %111, %113 : vector<1x128xf32>
    %115 = vector.extract_strided_slice %107 {offsets = [0, 256], sizes = [1, 128], strides = [1, 1]} : vector<1x384xf32> to vector<1x128xf32>
    %116 = math.tanh %114 : vector<1x128xf32>
    %117 = arith.mulf %115, %116 : vector<1x128xf32>
    %c1_48 = arith.constant 1 : index
    %c0_49 = arith.constant 0 : index
    %118 = vector.load %arg14[%c1_48, %c0_49] : memref<8x256xf32, #tpu.memory_space<vmem>>, vector<1x128xf32>
    tpu.vector_store %arg14[%c1_48, %c0_49], %117 {strides = array<i32>} : memref<8x256xf32, #tpu.memory_space<vmem>>, vector<1x128xf32>,
    %c6 = arith.constant 6 : index
    %c128_50 = arith.constant 128 : index
    %119 = vector.load %arg14[%c6, %c128_50] : memref<8x256xf32, #tpu.memory_space<vmem>>, vector<1x128xf32>
    tpu.vector_store %arg14[%c6, %c128_50], %117 {strides = array<i32>} : memref<8x256xf32, #tpu.memory_space<vmem>>, vector<1x128xf32>,
    %120 = vector.extract_strided_slice %65 {offsets = [2, 0], sizes = [1, 512], strides = [1, 1]} : vector<8x512xf32> to vector<1x512xf32>
    %121 = vector.extract_strided_slice %66 {offsets = [5, 0], sizes = [1, 512], strides = [1, 1]} : vector<8x512xf32> to vector<1x512xf32>
    %122 = arith.addf %120, %121 : vector<1x512xf32>
    %123 = arith.truncf %117 : vector<1x128xf32> to vector<1x128xbf16>
    %cst_51 = arith.constant dense<0.000000e+00> : vector<1x512xf32>
    %124 = tpu.matmul %123, %69, %cst_51 {dimension_numbers = #tpu.dot_dimension_numbers<[1], [0], [0], [1], [0, 0, 1, 1], [], []>} : vector<1x128xbf16>, vector<128x512xbf16>, vector<1x512xf32> -> vector<1x512xf32>
    %125 = arith.addf %122, %124 : vector<1x512xf32>
    %126 = vector.extract_strided_slice %125 {offsets = [0, 0], sizes = [1, 384], strides = [1, 1]} : vector<1x512xf32> to vector<1x384xf32>
    %127 = arith.negf %126 : vector<1x384xf32>
    %128 = math.exp %127 : vector<1x384xf32>
    %cst_52 = arith.constant 1.000000e+00 : f32
    %129 = vector.broadcast %cst_52 : f32 to vector<1x384xf32>
    %130 = arith.addf %129, %128 : vector<1x384xf32>
    %131 = arith.divf %129, %130 : vector<1x384xf32>
    %132 = vector.extract_strided_slice %125 {offsets = [0, 384], sizes = [1, 128], strides = [1, 1]} : vector<1x512xf32> to vector<1x128xf32>
    %133 = math.tanh %132 : vector<1x128xf32>
    %134 = vector.extract_strided_slice %131 {offsets = [0, 128], sizes = [1, 128], strides = [1, 1]} : vector<1x384xf32> to vector<1x128xf32>
    %135 = arith.mulf %134, %114 : vector<1x128xf32>
    %136 = vector.extract_strided_slice %131 {offsets = [0, 0], sizes = [1, 128], strides = [1, 1]} : vector<1x384xf32> to vector<1x128xf32>
    %137 = arith.mulf %136, %133 : vector<1x128xf32>
    %138 = arith.addf %135, %137 : vector<1x128xf32>
    %139 = vector.extract_strided_slice %131 {offsets = [0, 256], sizes = [1, 128], strides = [1, 1]} : vector<1x384xf32> to vector<1x128xf32>
    %140 = math.tanh %138 : vector<1x128xf32>
    %141 = arith.mulf %139, %140 : vector<1x128xf32>
    %c2_53 = arith.constant 2 : index
    %c0_54 = arith.constant 0 : index
    %142 = vector.load %arg14[%c2_53, %c0_54] : memref<8x256xf32, #tpu.memory_space<vmem>>, vector<1x128xf32>
    tpu.vector_store %arg14[%c2_53, %c0_54], %141 {strides = array<i32>} : memref<8x256xf32, #tpu.memory_space<vmem>>, vector<1x128xf32>,
    %c5 = arith.constant 5 : index
    %c128_55 = arith.constant 128 : index
    %143 = vector.load %arg14[%c5, %c128_55] : memref<8x256xf32, #tpu.memory_space<vmem>>, vector<1x128xf32>
    tpu.vector_store %arg14[%c5, %c128_55], %141 {strides = array<i32>} : memref<8x256xf32, #tpu.memory_space<vmem>>, vector<1x128xf32>,
    %144 = vector.extract_strided_slice %65 {offsets = [3, 0], sizes = [1, 512], strides = [1, 1]} : vector<8x512xf32> to vector<1x512xf32>
    %145 = vector.extract_strided_slice %66 {offsets = [4, 0], sizes = [1, 512], strides = [1, 1]} : vector<8x512xf32> to vector<1x512xf32>
    %146 = arith.addf %144, %145 : vector<1x512xf32>
    %147 = arith.truncf %141 : vector<1x128xf32> to vector<1x128xbf16>
    %cst_56 = arith.constant dense<0.000000e+00> : vector<1x512xf32>
    %148 = tpu.matmul %147, %69, %cst_56 {dimension_numbers = #tpu.dot_dimension_numbers<[1], [0], [0], [1], [0, 0, 1, 1], [], []>} : vector<1x128xbf16>, vector<128x512xbf16>, vector<1x512xf32> -> vector<1x512xf32>
    %149 = arith.addf %146, %148 : vector<1x512xf32>
    %150 = vector.extract_strided_slice %149 {offsets = [0, 0], sizes = [1, 384], strides = [1, 1]} : vector<1x512xf32> to vector<1x384xf32>
    %151 = arith.negf %150 : vector<1x384xf32>
    %152 = math.exp %151 : vector<1x384xf32>
    %cst_57 = arith.constant 1.000000e+00 : f32
    %153 = vector.broadcast %cst_57 : f32 to vector<1x384xf32>
    %154 = arith.addf %153, %152 : vector<1x384xf32>
    %155 = arith.divf %153, %154 : vector<1x384xf32>
    %156 = vector.extract_strided_slice %149 {offsets = [0, 384], sizes = [1, 128], strides = [1, 1]} : vector<1x512xf32> to vector<1x128xf32>
    %157 = math.tanh %156 : vector<1x128xf32>
    %158 = vector.extract_strided_slice %155 {offsets = [0, 128], sizes = [1, 128], strides = [1, 1]} : vector<1x384xf32> to vector<1x128xf32>
    %159 = arith.mulf %158, %138 : vector<1x128xf32>
    %160 = vector.extract_strided_slice %155 {offsets = [0, 0], sizes = [1, 128], strides = [1, 1]} : vector<1x384xf32> to vector<1x128xf32>
    %161 = arith.mulf %160, %157 : vector<1x128xf32>
    %162 = arith.addf %159, %161 : vector<1x128xf32>
    %163 = vector.extract_strided_slice %155 {offsets = [0, 256], sizes = [1, 128], strides = [1, 1]} : vector<1x384xf32> to vector<1x128xf32>
    %164 = math.tanh %162 : vector<1x128xf32>
    %165 = arith.mulf %163, %164 : vector<1x128xf32>
    %c3 = arith.constant 3 : index
    %c0_58 = arith.constant 0 : index
    %166 = vector.load %arg14[%c3, %c0_58] : memref<8x256xf32, #tpu.memory_space<vmem>>, vector<1x128xf32>
    tpu.vector_store %arg14[%c3, %c0_58], %165 {strides = array<i32>} : memref<8x256xf32, #tpu.memory_space<vmem>>, vector<1x128xf32>,
    %c4 = arith.constant 4 : index
    %c128_59 = arith.constant 128 : index
    %167 = vector.load %arg14[%c4, %c128_59] : memref<8x256xf32, #tpu.memory_space<vmem>>, vector<1x128xf32>
    tpu.vector_store %arg14[%c4, %c128_59], %165 {strides = array<i32>} : memref<8x256xf32, #tpu.memory_space<vmem>>, vector<1x128xf32>,
    %168 = vector.extract_strided_slice %65 {offsets = [4, 0], sizes = [1, 512], strides = [1, 1]} : vector<8x512xf32> to vector<1x512xf32>
    %169 = vector.extract_strided_slice %66 {offsets = [3, 0], sizes = [1, 512], strides = [1, 1]} : vector<8x512xf32> to vector<1x512xf32>
    %170 = arith.addf %168, %169 : vector<1x512xf32>
    %171 = arith.truncf %165 : vector<1x128xf32> to vector<1x128xbf16>
    %cst_60 = arith.constant dense<0.000000e+00> : vector<1x512xf32>
    %172 = tpu.matmul %171, %69, %cst_60 {dimension_numbers = #tpu.dot_dimension_numbers<[1], [0], [0], [1], [0, 0, 1, 1], [], []>} : vector<1x128xbf16>, vector<128x512xbf16>, vector<1x512xf32> -> vector<1x512xf32>
    %173 = arith.addf %170, %172 : vector<1x512xf32>
    %174 = vector.extract_strided_slice %173 {offsets = [0, 0], sizes = [1, 384], strides = [1, 1]} : vector<1x512xf32> to vector<1x384xf32>
    %175 = arith.negf %174 : vector<1x384xf32>
    %176 = math.exp %175 : vector<1x384xf32>
    %cst_61 = arith.constant 1.000000e+00 : f32
    %177 = vector.broadcast %cst_61 : f32 to vector<1x384xf32>
    %178 = arith.addf %177, %176 : vector<1x384xf32>
    %179 = arith.divf %177, %178 : vector<1x384xf32>
    %180 = vector.extract_strided_slice %173 {offsets = [0, 384], sizes = [1, 128], strides = [1, 1]} : vector<1x512xf32> to vector<1x128xf32>
    %181 = math.tanh %180 : vector<1x128xf32>
    %182 = vector.extract_strided_slice %179 {offsets = [0, 128], sizes = [1, 128], strides = [1, 1]} : vector<1x384xf32> to vector<1x128xf32>
    %183 = arith.mulf %182, %162 : vector<1x128xf32>
    %184 = vector.extract_strided_slice %179 {offsets = [0, 0], sizes = [1, 128], strides = [1, 1]} : vector<1x384xf32> to vector<1x128xf32>
    %185 = arith.mulf %184, %181 : vector<1x128xf32>
    %186 = arith.addf %183, %185 : vector<1x128xf32>
    %187 = vector.extract_strided_slice %179 {offsets = [0, 256], sizes = [1, 128], strides = [1, 1]} : vector<1x384xf32> to vector<1x128xf32>
    %188 = math.tanh %186 : vector<1x128xf32>
    %189 = arith.mulf %187, %188 : vector<1x128xf32>
    %c4_62 = arith.constant 4 : index
    %c0_63 = arith.constant 0 : index
    %190 = vector.load %arg14[%c4_62, %c0_63] : memref<8x256xf32, #tpu.memory_space<vmem>>, vector<1x128xf32>
    tpu.vector_store %arg14[%c4_62, %c0_63], %189 {strides = array<i32>} : memref<8x256xf32, #tpu.memory_space<vmem>>, vector<1x128xf32>,
    %c3_64 = arith.constant 3 : index
    %c128_65 = arith.constant 128 : index
    %191 = vector.load %arg14[%c3_64, %c128_65] : memref<8x256xf32, #tpu.memory_space<vmem>>, vector<1x128xf32>
    tpu.vector_store %arg14[%c3_64, %c128_65], %189 {strides = array<i32>} : memref<8x256xf32, #tpu.memory_space<vmem>>, vector<1x128xf32>,
    %192 = vector.extract_strided_slice %65 {offsets = [5, 0], sizes = [1, 512], strides = [1, 1]} : vector<8x512xf32> to vector<1x512xf32>
    %193 = vector.extract_strided_slice %66 {offsets = [2, 0], sizes = [1, 512], strides = [1, 1]} : vector<8x512xf32> to vector<1x512xf32>
    %194 = arith.addf %192, %193 : vector<1x512xf32>
    %195 = arith.truncf %189 : vector<1x128xf32> to vector<1x128xbf16>
    %cst_66 = arith.constant dense<0.000000e+00> : vector<1x512xf32>
    %196 = tpu.matmul %195, %69, %cst_66 {dimension_numbers = #tpu.dot_dimension_numbers<[1], [0], [0], [1], [0, 0, 1, 1], [], []>} : vector<1x128xbf16>, vector<128x512xbf16>, vector<1x512xf32> -> vector<1x512xf32>
    %197 = arith.addf %194, %196 : vector<1x512xf32>
    %198 = vector.extract_strided_slice %197 {offsets = [0, 0], sizes = [1, 384], strides = [1, 1]} : vector<1x512xf32> to vector<1x384xf32>
    %199 = arith.negf %198 : vector<1x384xf32>
    %200 = math.exp %199 : vector<1x384xf32>
    %cst_67 = arith.constant 1.000000e+00 : f32
    %201 = vector.broadcast %cst_67 : f32 to vector<1x384xf32>
    %202 = arith.addf %201, %200 : vector<1x384xf32>
    %203 = arith.divf %201, %202 : vector<1x384xf32>
    %204 = vector.extract_strided_slice %197 {offsets = [0, 384], sizes = [1, 128], strides = [1, 1]} : vector<1x512xf32> to vector<1x128xf32>
    %205 = math.tanh %204 : vector<1x128xf32>
    %206 = vector.extract_strided_slice %203 {offsets = [0, 128], sizes = [1, 128], strides = [1, 1]} : vector<1x384xf32> to vector<1x128xf32>
    %207 = arith.mulf %206, %186 : vector<1x128xf32>
    %208 = vector.extract_strided_slice %203 {offsets = [0, 0], sizes = [1, 128], strides = [1, 1]} : vector<1x384xf32> to vector<1x128xf32>
    %209 = arith.mulf %208, %205 : vector<1x128xf32>
    %210 = arith.addf %207, %209 : vector<1x128xf32>
    %211 = vector.extract_strided_slice %203 {offsets = [0, 256], sizes = [1, 128], strides = [1, 1]} : vector<1x384xf32> to vector<1x128xf32>
    %212 = math.tanh %210 : vector<1x128xf32>
    %213 = arith.mulf %211, %212 : vector<1x128xf32>
    %c5_68 = arith.constant 5 : index
    %c0_69 = arith.constant 0 : index
    %214 = vector.load %arg14[%c5_68, %c0_69] : memref<8x256xf32, #tpu.memory_space<vmem>>, vector<1x128xf32>
    tpu.vector_store %arg14[%c5_68, %c0_69], %213 {strides = array<i32>} : memref<8x256xf32, #tpu.memory_space<vmem>>, vector<1x128xf32>,
    %c2_70 = arith.constant 2 : index
    %c128_71 = arith.constant 128 : index
    %215 = vector.load %arg14[%c2_70, %c128_71] : memref<8x256xf32, #tpu.memory_space<vmem>>, vector<1x128xf32>
    tpu.vector_store %arg14[%c2_70, %c128_71], %213 {strides = array<i32>} : memref<8x256xf32, #tpu.memory_space<vmem>>, vector<1x128xf32>,
    %216 = vector.extract_strided_slice %65 {offsets = [6, 0], sizes = [1, 512], strides = [1, 1]} : vector<8x512xf32> to vector<1x512xf32>
    %217 = vector.extract_strided_slice %66 {offsets = [1, 0], sizes = [1, 512], strides = [1, 1]} : vector<8x512xf32> to vector<1x512xf32>
    %218 = arith.addf %216, %217 : vector<1x512xf32>
    %219 = arith.truncf %213 : vector<1x128xf32> to vector<1x128xbf16>
    %cst_72 = arith.constant dense<0.000000e+00> : vector<1x512xf32>
    %220 = tpu.matmul %219, %69, %cst_72 {dimension_numbers = #tpu.dot_dimension_numbers<[1], [0], [0], [1], [0, 0, 1, 1], [], []>} : vector<1x128xbf16>, vector<128x512xbf16>, vector<1x512xf32> -> vector<1x512xf32>
    %221 = arith.addf %218, %220 : vector<1x512xf32>
    %222 = vector.extract_strided_slice %221 {offsets = [0, 0], sizes = [1, 384], strides = [1, 1]} : vector<1x512xf32> to vector<1x384xf32>
    %223 = arith.negf %222 : vector<1x384xf32>
    %224 = math.exp %223 : vector<1x384xf32>
    %cst_73 = arith.constant 1.000000e+00 : f32
    %225 = vector.broadcast %cst_73 : f32 to vector<1x384xf32>
    %226 = arith.addf %225, %224 : vector<1x384xf32>
    %227 = arith.divf %225, %226 : vector<1x384xf32>
    %228 = vector.extract_strided_slice %221 {offsets = [0, 384], sizes = [1, 128], strides = [1, 1]} : vector<1x512xf32> to vector<1x128xf32>
    %229 = math.tanh %228 : vector<1x128xf32>
    %230 = vector.extract_strided_slice %227 {offsets = [0, 128], sizes = [1, 128], strides = [1, 1]} : vector<1x384xf32> to vector<1x128xf32>
    %231 = arith.mulf %230, %210 : vector<1x128xf32>
    %232 = vector.extract_strided_slice %227 {offsets = [0, 0], sizes = [1, 128], strides = [1, 1]} : vector<1x384xf32> to vector<1x128xf32>
    %233 = arith.mulf %232, %229 : vector<1x128xf32>
    %234 = arith.addf %231, %233 : vector<1x128xf32>
    %235 = vector.extract_strided_slice %227 {offsets = [0, 256], sizes = [1, 128], strides = [1, 1]} : vector<1x384xf32> to vector<1x128xf32>
    %236 = math.tanh %234 : vector<1x128xf32>
    %237 = arith.mulf %235, %236 : vector<1x128xf32>
    %c6_74 = arith.constant 6 : index
    %c0_75 = arith.constant 0 : index
    %238 = vector.load %arg14[%c6_74, %c0_75] : memref<8x256xf32, #tpu.memory_space<vmem>>, vector<1x128xf32>
    tpu.vector_store %arg14[%c6_74, %c0_75], %237 {strides = array<i32>} : memref<8x256xf32, #tpu.memory_space<vmem>>, vector<1x128xf32>,
    %c1_76 = arith.constant 1 : index
    %c128_77 = arith.constant 128 : index
    %239 = vector.load %arg14[%c1_76, %c128_77] : memref<8x256xf32, #tpu.memory_space<vmem>>, vector<1x128xf32>
    tpu.vector_store %arg14[%c1_76, %c128_77], %237 {strides = array<i32>} : memref<8x256xf32, #tpu.memory_space<vmem>>, vector<1x128xf32>,
    %240 = vector.extract_strided_slice %65 {offsets = [7, 0], sizes = [1, 512], strides = [1, 1]} : vector<8x512xf32> to vector<1x512xf32>
    %241 = vector.extract_strided_slice %66 {offsets = [0, 0], sizes = [1, 512], strides = [1, 1]} : vector<8x512xf32> to vector<1x512xf32>
    %242 = arith.addf %240, %241 : vector<1x512xf32>
    %243 = arith.truncf %237 : vector<1x128xf32> to vector<1x128xbf16>
    %cst_78 = arith.constant dense<0.000000e+00> : vector<1x512xf32>
    %244 = tpu.matmul %243, %69, %cst_78 {dimension_numbers = #tpu.dot_dimension_numbers<[1], [0], [0], [1], [0, 0, 1, 1], [], []>} : vector<1x128xbf16>, vector<128x512xbf16>, vector<1x512xf32> -> vector<1x512xf32>
    %245 = arith.addf %242, %244 : vector<1x512xf32>
    %246 = vector.extract_strided_slice %245 {offsets = [0, 0], sizes = [1, 384], strides = [1, 1]} : vector<1x512xf32> to vector<1x384xf32>
    %247 = arith.negf %246 : vector<1x384xf32>
    %248 = math.exp %247 : vector<1x384xf32>
    %cst_79 = arith.constant 1.000000e+00 : f32
    %249 = vector.broadcast %cst_79 : f32 to vector<1x384xf32>
    %250 = arith.addf %249, %248 : vector<1x384xf32>
    %251 = arith.divf %249, %250 : vector<1x384xf32>
    %252 = vector.extract_strided_slice %245 {offsets = [0, 384], sizes = [1, 128], strides = [1, 1]} : vector<1x512xf32> to vector<1x128xf32>
    %253 = math.tanh %252 : vector<1x128xf32>
    %254 = vector.extract_strided_slice %251 {offsets = [0, 128], sizes = [1, 128], strides = [1, 1]} : vector<1x384xf32> to vector<1x128xf32>
    %255 = arith.mulf %254, %234 : vector<1x128xf32>
    %256 = vector.extract_strided_slice %251 {offsets = [0, 0], sizes = [1, 128], strides = [1, 1]} : vector<1x384xf32> to vector<1x128xf32>
    %257 = arith.mulf %256, %253 : vector<1x128xf32>
    %258 = arith.addf %255, %257 : vector<1x128xf32>
    %259 = vector.extract_strided_slice %251 {offsets = [0, 256], sizes = [1, 128], strides = [1, 1]} : vector<1x384xf32> to vector<1x128xf32>
    %260 = math.tanh %258 : vector<1x128xf32>
    %261 = arith.mulf %259, %260 : vector<1x128xf32>
    %c7_80 = arith.constant 7 : index
    %c0_81 = arith.constant 0 : index
    %262 = vector.load %arg14[%c7_80, %c0_81] : memref<8x256xf32, #tpu.memory_space<vmem>>, vector<1x128xf32>
    tpu.vector_store %arg14[%c7_80, %c0_81], %261 {strides = array<i32>} : memref<8x256xf32, #tpu.memory_space<vmem>>, vector<1x128xf32>,
    %c0_82 = arith.constant 0 : index
    %c128_83 = arith.constant 128 : index
    %263 = vector.load %arg14[%c0_82, %c128_83] : memref<8x256xf32, #tpu.memory_space<vmem>>, vector<1x128xf32>
    tpu.vector_store %arg14[%c0_82, %c128_83], %261 {strides = array<i32>} : memref<8x256xf32, #tpu.memory_space<vmem>>, vector<1x128xf32>,
    %c2_i32_84 = arith.constant 2 : i32
    %264 = tpu.memref_slice %arg18[%c2_i32_84] : memref<3x!tpu.dma_semaphore, #tpu.memory_space<semaphore_mem>> -> memref<1x!tpu.dma_semaphore, #tpu.memory_space<semaphore_mem>>
    %265 = tpu.memref_squeeze %264 : memref<1x!tpu.dma_semaphore, #tpu.memory_space<semaphore_mem>> -> memref<!tpu.dma_semaphore, #tpu.memory_space<semaphore_mem>>
    tpu.wait_dma2 semaphore(%265 : memref<!tpu.dma_semaphore, #tpu.memory_space<semaphore_mem>>) src(%arg10 : memref<256x128xbf16, #tpu.memory_space<any>>) dst(%arg17 : memref<256x128xbf16, #tpu.memory_space<vmem>>)
    %c0_85 = arith.constant 0 : index
    %c0_86 = arith.constant 0 : index
    %266 = vector.load %arg14[%c0_85, %c0_86] : memref<8x256xf32, #tpu.memory_space<vmem>>, vector<8x256xf32>
    %267 = arith.truncf %266 : vector<8x256xf32> to vector<8x256xbf16>
    %c0_87 = arith.constant 0 : index
    %c0_88 = arith.constant 0 : index
    %268 = vector.load %arg17[%c0_87, %c0_88] : memref<256x128xbf16, #tpu.memory_space<vmem>>, vector<256x128xbf16>
    %cst_89 = arith.constant dense<0.000000e+00> : vector<8x128xf32>
    %269 = tpu.matmul %267, %268, %cst_89 {dimension_numbers = #tpu.dot_dimension_numbers<[1], [0], [0], [1], [0, 0, 1, 1], [], []>} : vector<8x256xbf16>, vector<256x128xbf16>, vector<8x128xf32> -> vector<8x128xf32>
    %c0_90 = arith.constant 0 : index
    %c0_91 = arith.constant 0 : index
    %270 = vector.load %arg7[%c0_90, %c0_91] : memref<1x128xf32, #tpu.memory_space<vmem>>, vector<1x128xf32>
    %271 = vector.broadcast %270 : vector<1x128xf32> to vector<8x128xf32>
    %272 = arith.addf %269, %271 : vector<8x128xf32>
    %c0_92 = arith.constant 0 : index
    %c0_93 = arith.constant 0 : index
    %273 = vector.load %arg11[%c0_92, %c0_93] : memref<8x128xf32, #tpu.memory_space<vmem>>, vector<8x128xf32>
    tpu.vector_store %arg11[%c0_92, %c0_93], %272 {strides = array<i32>} : memref<8x128xf32, #tpu.memory_space<vmem>>, vector<8x128xf32>,
    return
  }
}

</mosaic_0001>

<bundles_post_ra>
// kernel: _lambda_.1
= control target key start
LH: loop header
LB: loop body
LE: loop exit
PB: predicated region body
PF: predicated region fallthrough
CT: control target
= control target key end

     0   :  { %16 = vsyncpa [#allocation10], 0  ;;  %s3566_s21 = smov [#allocation5]   ;;  %s4650_s0 = inlined_call_operand.vmem [shape: s32[8,1], index: 0, kind: input, shape index: {}]   ;;  %s4651_s1 = inlined_call_operand.vmem [shape: s32[112,1], index: 1, kind: input, shape index: {}]   ;;  %s4652_s2 = inlined_call_operand.vmem [shape: bf16[128,32], index: 2, kind: input, shape index: {}]   ;;  %s4653_s3 = inlined_call_operand.vmem [shape: bf16[128,16], index: 3, kind: input, shape index: {}]   ;;  %s4654_s4 = inlined_call_operand.vmem [shape: bf16[48,16], index: 4, kind: input, shape index: {}]   ;;  %s4655_s5 = inlined_call_operand.vmem [shape: f32[1,16], index: 5, kind: input, shape index: {}]   ;;  %s4656_s6 = inlined_call_operand.vmem [shape: f32[1,512], index: 6, kind: input, shape index: {}]   ;;  %s4657_s7 = inlined_call_operand.vmem [shape: f32[1,128], index: 7, kind: input, shape index: {}]   ;;  %s4658_s8 = inlined_call_operand.hbm [shape: bf16[48,1024], index: 8, kind: input, shape index: {}]   ;;  %s4659_s9 = inlined_call_operand.vmem [shape: bf16[128,512], index: 9, kind: input, shape index: {}]   ;;  %s4660_s10 = inlined_call_operand.hbm [shape: bf16[256,128], index: 10, kind: input, shape index: {}]   ;;  %s4661_s11 = inlined_call_operand.hbm [shape: f32[8,128], index: 11, kind: output, shape index: {}]  }
   0x1   :  { %v3638_v0 = vld [vmem:[%s4659_s9] sm:$0xff]  ;;  %v3643_v1 = vld [vmem:[%s4659_s9 + $0x8] sm:$0xff]  ;;  %s41_s22 = sshll.u32 %s3566_s21, 4  ;;  %v3648_v2 = vld [vmem:[%s4659_s9 + $0x10] sm:$0xff]  ;;  %s42_s22 = int_to_ptr.vmem [resolvable:$true] %s41_s22 }
   0x2   :  { %v3653_v3 = vld [vmem:[%s4659_s9 + $0x18] sm:$0xff]  ;;  %v3658_v4 = vld [vmem:[%s4659_s9 + $0x20] sm:$0xff]  ;;  %v3663_v5 = vld [vmem:[%s4659_s9 + $0x28] sm:$0xff]  ;;  %s3506_s16 = scalar_lea.vmem %s42_s22, 3072  ;;  %p3511_p1 = scmp.lt.s32.totalorder %s42_s22, %s42_s22 }
   0x3   :  { %v3668_v6 = vld [vmem:[%s4659_s9 + $0x30] sm:$0xff]  ;;  %v3673_v7 = vld [vmem:[%s4659_s9 + $0x38] sm:$0xff]  ;;  %p3507_p0 = scmp.ne.s32.totalorder %s42_s22, %s3506_s16  ;;  %p3512_p2 = scmp.lt.s32.totalorder %s3506_s16, %s3506_s16 }
   0x5   :  { %p3513_p3 = por %p3512_p2, %p3511_p1 }
   0x7   :  { %p3514_p4 = pnand %p3513_p3, %p3507_p0 }
   0x9   :  { %3517 = shalt.err (!%p3514_p4)  }
   0xa   :  { %44 = dma.hbm_to_vmem [thread:$0]  %s4658_s8, 3072, %s42_s22, [#allocation8]  ;;  %v3681_v8 = vld [vmem:[%s4659_s9 + $0x40] sm:$0xff]  ;;  %v3686_v9 = vld [vmem:[%s4659_s9 + $0x48] sm:$0xff]  ;;  %v3691_v10 = vld [vmem:[%s4659_s9 + $0x50] sm:$0xff]  ;;  %v4662_v34 = vmov 0  }
   0xb   :  { %v3696_v11 = vld [vmem:[%s4659_s9 + $0x58] sm:$0xff]  ;;  %v3701_v12 = vld [vmem:[%s4659_s9 + $0x60] sm:$0xff]  ;;  %v3706_v13 = vld [vmem:[%s4659_s9 + $0x68] sm:$0xff]  ;;  %3350 = vset.pattern.permute.xlu1 %v4662_v34  ;;  %3349 = vset.pattern.permute.xlu0 %v4662_v34 }
   0xc   :  { %v3711_v14 = vld [vmem:[%s4659_s9 + $0x70] sm:$0xff]  ;;  %v3716_v15 = vld [vmem:[%s4659_s9 + $0x78] sm:$0xff]  ;;  %v3721_v16 = vld [vmem:[%s4659_s9 + $0x80] sm:$0xff] }
   0xd   :  { %v3726_v17 = vld [vmem:[%s4659_s9 + $0x88] sm:$0xff]  ;;  %v3731_v18 = vld [vmem:[%s4659_s9 + $0x90] sm:$0xff]  ;;  %v3736_v19 = vld [vmem:[%s4659_s9 + $0x98] sm:$0xff] }
   0xe   :  { %v3741_v20 = vld [vmem:[%s4659_s9 + $0xa0] sm:$0xff]  ;;  %v3746_v21 = vld [vmem:[%s4659_s9 + $0xa8] sm:$0xff]  ;;  %v3751_v22 = vld [vmem:[%s4659_s9 + $0xb0] sm:$0xff] }
   0xf   :  { %v3756_v23 = vld [vmem:[%s4659_s9 + $0xb8] sm:$0xff]  ;;  %v3761_v24 = vld [vmem:[%s4659_s9 + $0xc0] sm:$0xff]  ;;  %v3766_v25 = vld [vmem:[%s4659_s9 + $0xc8] sm:$0xff] }
  0x10   :  { %v3771_v26 = vld [vmem:[%s4659_s9 + $0xd0] sm:$0xff]  ;;  %v3776_v27 = vld [vmem:[%s4659_s9 + $0xd8] sm:$0xff]  ;;  %v3781_v28 = vld [vmem:[%s4659_s9 + $0xe0] sm:$0xff] }
  0x11   :  { %v3786_v29 = vld [vmem:[%s4659_s9 + $0xe8] sm:$0xff]  ;;  %v3791_v30 = vld [vmem:[%s4659_s9 + $0xf0] sm:$0xff]  ;;  %v3796_v31 = vld [vmem:[%s4659_s9 + $0xf8] sm:$0xff] }
  0x12   :  { %v276_v32 = vld [vmem:[%s4651_s1 + $0x10] sm:$0xff]  ;;  %v274_v33 = vld [vmem:[%s4651_s1] sm:$0xff]  ;;  %v277_v35 = vld [vmem:[%s4651_s1 + $0x18] sm:$0xff] }
  0x13   :  { %295 = vperm.xlu1 %3350, %v276_v32   ;;  %289 = vperm.xlu0 %3349, %v274_v33   ;;  %v275_v36 = vld [vmem:[%s4651_s1 + $0x8] sm:$0xff]  ;;  %v3092_v37 = vld [vmem:[%s4653_s3 + $0x38] sm:$0xff]   ;;  %v3091_v40 = vld [vmem:[%s4653_s3 + $0x30] sm:$0xff]  }
  0x14   :  { %v3077_v38 = vunpack.c.l.bf16 %v3092_v37  ;;  %v3078_v39 = vunpack.c.h.bf16 %v3092_v37  ;;  %v279_v41 = vld [vmem:[%s4651_s1 + $0x28] sm:$0xff]  ;;  %v278_v42 = vld [vmem:[%s4651_s1 + $0x20] sm:$0xff]  ;;  %v3074_v43 = vunpack.c.h.bf16 %v3091_v40 }
  0x16   :  { %3222 = vmatprep.subr.mxu1 %v3078_v39 }
  0x17   :  { %298 = vperm.xlu1 %3350, %v277_v35   ;;  %292 = vperm.xlu0 %3349, %v275_v36  }
  0x18   :  { %3223 = vmatpush3.msra.mxu1 %v3078_v39 }
  0x19   :  { %3224 = vmatprep.subr.mxu1 %v3077_v38 }
  0x1a   :  { %150 = vsyncadd [#allocation8 + $0x1], 4096  ;;  %v3090_v44 = vld [vmem:[%s4653_s3 + $0x28] sm:$0xff]   ;;  %v281_v45 = vld [vmem:[%s4651_s1 + $0x38] sm:$0xff]  ;;  %3225 = vmatpush3.msra.mxu1 %v3077_v38  ;;  %v3073_v47 = vunpack.c.l.bf16 %v3091_v40  ;;  %v163_v40 = vlaneseq  ;;  %vm539_vm14 = vcmask 130048   ;;  %s3570_s9 = smov 16  }
  0x1b   :  { %304 = vperm.xlu1 %3350, %v279_v41   ;;  %301 = vperm.xlu0 %3349, %v278_v42   ;;  %v280_v46 = vld [vmem:[%s4651_s1 + $0x30] sm:$0xff]  ;;  %v3070_v48 = vunpack.c.h.bf16 %v3090_v44  ;;  %v283_v49 = vld [vmem:[%s4651_s1 + $0x48] sm:$0xff]  ;;  %v282_v50 = vld [vmem:[%s4651_s1 + $0x40] sm:$0xff]  ;;  %v3069_v51 = vunpack.c.l.bf16 %v3090_v44  ;;  %v3568_v44 = vmov 1.0   ;;  %vm3571_vm15 = vmmov 0  }
  0x1c   :  { %3226 = vmatprep.subr.mxu1 %v3074_v43  ;;  %v3089_v52 = vld [vmem:[%s4653_s3 + $0x20] sm:$0xff]   ;;  %v285_v53 = vld [vmem:[%s4651_s1 + $0x58] sm:$0xff]  ;;  %v284_v54 = vld [vmem:[%s4651_s1 + $0x50] sm:$0xff]  ;;  %v3867_v41 = vand.u32 127, %v163_v40 }
  0x1d   :  { %3227 = vmatpush3.msra.mxu1 %v3074_v43  ;;  %v3066_v55 = vunpack.c.h.bf16 %v3089_v52  ;;  %v3065_v56 = vunpack.c.l.bf16 %v3089_v52  ;;  %v3088_v57 = vld [vmem:[%s4653_s3 + $0x18] sm:$0xff]   ;;  %v287_v58 = vld [vmem:[%s4651_s1 + $0x68] sm:$0xff]  ;;  %v286_v59 = vld [vmem:[%s4651_s1 + $0x60] sm:$0xff] }
  0x1e   :  { %3228 = vmatprep.subr.mxu1 %v3073_v47  ;;  %v3062_v60 = vunpack.c.h.bf16 %v3088_v57  ;;  %v3087_v61 = vld [vmem:[%s4653_s3 + $0x10] sm:$0xff]   ;;  %v3061_v62 = vunpack.c.l.bf16 %v3088_v57  ;;  %v3086_v32 = vld [vmem:[%s4653_s3 + $0x8] sm:$0xff]   ;;  %v3048_v36 = vld [vmem:[%s4653_s3] sm:$0xff]  }
  0x1f   :  { %310 = vperm.xlu1 %3350, %v281_v45   ;;  %307 = vperm.xlu0 %3349, %v280_v46   ;;  %v3058_v63 = vunpack.c.h.bf16 %v3087_v61  ;;  %v3057_v33 = vunpack.c.l.bf16 %v3087_v61  ;;  %v3054_v35 = vunpack.c.h.bf16 %v3086_v32  ;;  %v3053_v37 = vunpack.c.l.bf16 %v3086_v32 }
  0x20   :  { %3229 = vmatpush3.msra.mxu1 %v3073_v47  ;;  %v3050_v38 = vunpack.c.h.bf16 %v3048_v36  ;;  %v3049_v39 = vunpack.c.l.bf16 %v3048_v36 }
  0x21   :  { %3230 = vmatprep.subr.mxu1 %v3070_v48 }
  0x22   :  { %3231 = vmatpush3.msra.mxu1 %v3070_v48 }
  0x23   :  { %316 = vperm.xlu1 %3350, %v283_v49   ;;  %313 = vperm.xlu0 %3349, %v282_v50  }
  0x24   :  { %3232 = vmatprep.subr.mxu1 %v3069_v51 }
  0x25   :  { %3233 = vmatpush3.msra.mxu1 %v3069_v51 }
  0x26   :  { %3234 = vmatprep.subr.mxu1 %v3066_v55 }
  0x27   :  { %322 = vperm.xlu1 %3350, %v285_v53   ;;  %319 = vperm.xlu0 %3349, %v284_v54  }
  0x28   :  { %3235 = vmatpush3.msra.mxu1 %v3066_v55 }
  0x29   :  { %3236 = vmatprep.subr.mxu1 %v3065_v56 }
  0x2a   :  { %3237 = vmatpush3.msra.mxu1 %v3065_v56 }
  0x2b   :  { %328 = vperm.xlu1 %3350, %v287_v58   ;;  %325 = vperm.xlu0 %3349, %v286_v59   ;;  %v3085_v59 = vld [vmem:[%s4652_s2 + $0x38] sm:$0xff]  }
  0x2c   :  { %3238 = vmatprep.subr.mxu1 %v3062_v60  ;;  %v3045_v61 = vunpack.c.l.bf16 %v3085_v59 }
  0x2d   :  { %3239 = vmatpush3.msra.mxu1 %v3062_v60  ;;  %v3569_v60 = vmov 0.0  }
  0x2e   :  { %3240 = vmatprep.subr.mxu1 %v3061_v62  ;;  %3187 = vmatprep.subr.mxu0 %v3569_v60 }
  0x2f   :  { %3241 = vmatpush3.msra.mxu1 %v3061_v62  ;;  %v3046_v62 = vunpack.c.h.bf16 %v3085_v59  ;;  %3219 = vmatprep.mubr.msk.f32.mxu0 %vm3571_vm15, %v3569_v60 }
  0x30   :  { %3242 = vmatprep.subr.mxu1 %v3058_v63 }
  0x31   :  { %3243 = vmatpush3.msra.mxu1 %v3058_v63  ;;  %3188 = vmatpush3.msra.mxu0 %v3046_v62 }
  0x32   :  { %3244 = vmatprep.subr.mxu1 %v3057_v33  ;;  %3189 = vmatprep.subr.mxu0 %v3569_v60 }
  0x33   :  { %3245 = vmatpush3.msra.mxu1 %v3057_v33  ;;  %v3084_v33 = vld [vmem:[%s4652_s2 + $0x30] sm:$0xff]   ;;  %3190 = vmatpush3.msra.mxu0 %v3045_v61 }
  0x34   :  { %3246 = vmatprep.subr.mxu1 %v3054_v35  ;;  %3191 = vmatprep.subr.mxu0 %v3569_v60 }
  0x35   :  { %3247 = vmatpush3.msra.mxu1 %v3054_v35  ;;  %v3042_v35 = vunpack.c.h.bf16 %v3084_v33 }
  0x36   :  { %3248 = vmatprep.subr.mxu1 %v3053_v37 }
  0x37   :  { %3249 = vmatpush3.msra.mxu1 %v3053_v37  ;;  %3192 = vmatpush3.msra.mxu0 %v3042_v35  ;;  %v3041_v37 = vunpack.c.l.bf16 %v3084_v33  ;;  %v3080_v33 = vld [vmem:[%s4652_s2 + $0x10] sm:$0xff]  }
  0x38   :  { %3250 = vmatprep.subr.mxu1 %v3050_v38  ;;  %3193 = vmatprep.subr.mxu0 %v3569_v60 }
  0x39   :  { %3251 = vmatpush3.msra.mxu1 %v3050_v38  ;;  %3194 = vmatpush3.msra.mxu0 %v3041_v37 }
  0x3a   :  { %3252 = vmatprep.subr.mxu1 %v3049_v39  ;;  %3195 = vmatprep.subr.mxu0 %v3569_v60 }
  0x3b   :  { %3253 = vmatpush3.msra.mxu1 %v3049_v39 }
  0x8e   :  { %v296_v42 = vpop.permute.xlu1 %295  ;;  %v290_v43 = vpop.permute.xlu0 %289 }
  0x8f   :  { %vm330_vm0 = vcmp.eq.s32.totalorder %v3867_v41, %v290_v43  ;;  %vm332_vm1 = vcmp.eq.s32.totalorder %v3867_v41, %v296_v42  ;;  %v3083_v42 = vld [vmem:[%s4652_s2 + $0x28] sm:$0xff]  }
  0x90   :  { %3254 = vmatprep.mubr.msk.f32.mxu1 %vm330_vm0, %v3568_v44  ;;  %v3038_v43 = vunpack.c.h.bf16 %v3083_v42  ;;  %vm624_vm0 = vcmask 261248  }
  0x92   :  { %v299_v45 = vpop.permute.xlu1 %298  ;;  %v293_v46 = vpop.permute.xlu0 %292  ;;  %3196 = vmatpush3.msra.mxu0 %v3038_v43  ;;  %v3025_v43 = vunpack.c.l.bf16 %v3080_v33 }
  0x93   :  { %vm331_vm2 = vcmp.eq.s32.totalorder %v3867_v41, %v293_v46  ;;  %vm333_vm3 = vcmp.eq.s32.totalorder %v3867_v41, %v299_v45  ;;  %v3037_v46 = vunpack.c.l.bf16 %v3083_v42  ;;  %3197 = vmatprep.subr.mxu0 %v3569_v60  ;;  %v3079_v42 = vld [vmem:[%s4652_s2 + $0x8] sm:$0xff]  }
  0x94   :  { %3255 = vmatmul.mubr.msk.f32.vlgmr.msra.gmra.mxu1 %vm331_vm2, %v3568_v44 }
  0x95   :  { %3257 = vmatprep.mubr.msk.f32.mxu1 %vm332_vm1, %v3568_v44  ;;  %3198 = vmatpush3.msra.mxu0 %v3037_v46  ;;  %vm638_vm1 = vcmask 259200  }
  0x96   :  { %v305_v47 = vpop.permute.xlu1 %304  ;;  %v302_v48 = vpop.permute.xlu0 %301  ;;  %3199 = vmatprep.subr.mxu0 %v3569_v60 }
  0x97   :  { %vm334_vm4 = vcmp.eq.s32.totalorder %v3867_v41, %v302_v48  ;;  %vm335_vm5 = vcmp.eq.s32.totalorder %v3867_v41, %v305_v47 }
  0x98   :  { %3258 = vmatmul.mubr.msk.f32.gmra.mxu1 %vm333_vm3, %v3568_v44  ;;  %vm710_vm3 = vcmask 392448  }
  0x99   :  { %3260 = vmatprep.mubr.msk.f32.mxu1 %vm334_vm4, %v3568_v44  ;;  %vm778_vm4 = vcmask 392192  }
  0x9a   :  { %v311_v49 = vpop.permute.xlu1 %310  ;;  %v308_v50 = vpop.permute.xlu0 %307 }
  0x9b   :  { %vm336_vm6 = vcmp.eq.s32.totalorder %v3867_v41, %v308_v50  ;;  %vm337_vm7 = vcmp.eq.s32.totalorder %v3867_v41, %v311_v49  ;;  %v3082_v50 = vld [vmem:[%s4652_s2 + $0x20] sm:$0xff]  }
  0x9c   :  { %3261 = vmatmul.mubr.msk.f32.gmra.mxu1 %vm335_vm5, %v3568_v44  ;;  %vm724_vm5 = vcmask 390400  }
  0x9d   :  { %3263 = vmatprep.mubr.msk.f32.mxu1 %vm336_vm6, %v3568_v44  ;;  %vm991_vm6 = vcmask 261120  }
  0x9e   :  { %v317_v51 = vpop.permute.xlu1 %316  ;;  %v314_v52 = vpop.permute.xlu0 %313 }
  0x9f   :  { %vm338_vm8 = vcmp.eq.s32.totalorder %v3867_v41, %v314_v52  ;;  %vm339_vm9 = vcmp.eq.s32.totalorder %v3867_v41, %v317_v51  ;;  %v3034_v51 = vunpack.c.h.bf16 %v3082_v50 }
  0xa0   :  { %3264 = vmatmul.mubr.msk.f32.gmra.mxu1 %vm337_vm7, %v3568_v44  ;;  %vm917_vm7 = vcmask 1045504  }
  0xa1   :  { %3266 = vmatprep.mubr.msk.f32.mxu1 %vm338_vm8, %v3568_v44  ;;  %3200 = vmatpush3.msra.mxu0 %v3034_v51 }
  0xa2   :  { %v323_v53 = vpop.permute.xlu1 %322  ;;  %v320_v54 = vpop.permute.xlu0 %319  ;;  %3201 = vmatprep.subr.mxu0 %v3569_v60 }
  0xa3   :  { %vm340_vm10 = vcmp.eq.s32.totalorder %v3867_v41, %v320_v54  ;;  %vm341_vm11 = vcmp.eq.s32.totalorder %v3867_v41, %v323_v53  ;;  %v3033_v53 = vunpack.c.l.bf16 %v3082_v50 }
  0xa4   :  { %3267 = vmatmul.mubr.msk.f32.gmra.mxu1 %vm339_vm9, %v3568_v44 }
  0xa5   :  { %3269 = vmatprep.mubr.msk.f32.mxu1 %vm340_vm10, %v3568_v44  ;;  %3202 = vmatpush3.msra.mxu0 %v3033_v53 }
  0xa6   :  { %v326_v55 = vpop.permute.xlu0 %325  ;;  %v329_v56 = vpop.permute.xlu1 %328  ;;  %3203 = vmatprep.subr.mxu0 %v3569_v60 }
  0xa7   :  { %vm342_vm12 = vcmp.eq.s32.totalorder %v3867_v41, %v326_v55  ;;  %vm343_vm13 = vcmp.eq.s32.totalorder %v3867_v41, %v329_v56 }
  0xa8   :  { %3270 = vmatmul.mubr.msk.f32.gmra.mxu1 %vm341_vm11, %v3568_v44  ;;  %vm913_vm11 = vcmask 900096  }
  0xa9   :  { %3272 = vmatprep.mubr.msk.f32.mxu1 %vm342_vm12, %v3568_v44 }
  0xac   :  { %3273 = vmatmul.mubr.msk.f32.gmra.mxu1 %vm343_vm13, %v3568_v44 }
 0x154   :  { %v3256_v57 = vpop.f32.mrf.mxu1 }
 0x155   :  { %541 = vst.msk [vmem:[#allocation2 + $0x8] sm:$0xff] %vm539_vm14, %v3256_v57  ;;  %v3081_v57 = vld [vmem:[%s4652_s2 + $0x18] sm:$0xff]  }
 0x156   :  { %v470_v58 = vpop.f32.mrf.mxu1  ;;  %v3030_v59 = vunpack.c.h.bf16 %v3081_v57 }
 0x157   :  { %540 = vst.msk [vmem:[#allocation2] sm:$0xff] %vm539_vm14, %v470_v58 }
 0x158   :  { %v3259_v63 = vpop.f32.mrf.mxu1  ;;  %3204 = vmatpush3.msra.mxu0 %v3030_v59 }
 0x159   :  { %543 = vst.msk [vmem:[#allocation2 + $0x18] sm:$0xff] %vm539_vm14, %v3259_v63  ;;  %3205 = vmatprep.subr.mxu0 %v3569_v60 }
 0x15a   :  { %v480_v32 = vpop.f32.mrf.mxu1 }
 0x15b   :  { %542 = vst.msk [vmem:[#allocation2 + $0x10] sm:$0xff] %vm539_vm14, %v480_v32  ;;  %v3029_v32 = vunpack.c.l.bf16 %v3081_v57 }
 0x15c   :  { %v3262_v36 = vpop.f32.mrf.mxu1 }
 0x15d   :  { %545 = vst.msk [vmem:[#allocation2 + $0x28] sm:$0xff] %vm539_vm14, %v3262_v36  ;;  %v3026_v36 = vunpack.c.h.bf16 %v3080_v33  ;;  %3206 = vmatpush3.msra.mxu0 %v3029_v32 }
 0x15e   :  { %v490_v38 = vpop.f32.mrf.mxu1  ;;  %v554_v39 = vld [vmem:[#allocation2 + $0x1] sm:$0xff]  ;;  %3207 = vmatprep.subr.mxu0 %v3569_v60 }
 0x15f   :  { %544 = vst.msk [vmem:[#allocation2 + $0x20] sm:$0xff] %vm539_vm14, %v490_v38  ;;  %582 = vrot.lane.b32.xlu0 %v554_v39, %s3570_s9  ;;  %3208 = vmatpush3.msra.mxu0 %v3026_v36 }
 0x160   :  { %v3265_v45 = vpop.f32.mrf.mxu1  ;;  %3209 = vmatprep.subr.mxu0 %v3569_v60 }
 0x161   :  { %547 = vst.msk [vmem:[#allocation2 + $0x38] sm:$0xff] %vm539_vm14, %v3265_v45  ;;  %3210 = vmatpush3.msra.mxu0 %v3025_v43 }
 0x162   :  { %v500_v47 = vpop.f32.mrf.mxu1  ;;  %v556_v48 = vld [vmem:[#allocation2 + $0x11] sm:$0xff]  ;;  %v555_v49 = vld [vmem:[#allocation2 + $0x9] sm:$0xff]  ;;  %3211 = vmatprep.subr.mxu0 %v3569_v60 }
 0x163   :  { %546 = vst.msk [vmem:[#allocation2 + $0x30] sm:$0xff] %vm539_vm14, %v500_v47  ;;  %586 = vrot.lane.b32.xlu0 %v556_v48, %s3570_s9  ;;  %584 = vrot.lane.b32.xlu1 %v555_v49, %s3570_s9  ;;  %v3022_v47 = vunpack.c.h.bf16 %v3079_v42  ;;  %v3021_v48 = vunpack.c.l.bf16 %v3079_v42  ;;  %v3016_v49 = vld [vmem:[%s4652_s2] sm:$0xff]  }
 0x164   :  { %v3268_v52 = vpop.f32.mrf.mxu1  ;;  %v3018_v53 = vunpack.c.h.bf16 %v3016_v49 }
 0x165   :  { %549 = vst.msk [vmem:[#allocation2 + $0x48] sm:$0xff] %vm539_vm14, %v3268_v52  ;;  %3212 = vmatpush3.msra.mxu0 %v3022_v47  ;;  %v165_v52 = vld [vmem:[%s4650_s0] sm:$0xff]  ;;  %s3572_s0 = smov 32  }
 0x166   :  { %v510_v54 = vpop.f32.mrf.mxu1  ;;  %v558_v55 = vld [vmem:[#allocation2 + $0x21] sm:$0xff]  ;;  %v557_v56 = vld [vmem:[#allocation2 + $0x19] sm:$0xff]  ;;  %3213 = vmatprep.subr.mxu0 %v3569_v60 }
 0x167   :  { %548 = vst.msk [vmem:[#allocation2 + $0x40] sm:$0xff] %vm539_vm14, %v510_v54  ;;  %590 = vrot.lane.b32.xlu0 %v558_v55, %s3570_s9  ;;  %588 = vrot.lane.b32.xlu1 %v557_v56, %s3570_s9  ;;  %v3017_v55 = vunpack.c.l.bf16 %v3016_v49 }
 0x168   :  { %v3271_v58 = vpop.f32.mrf.mxu1  ;;  %3214 = vmatpush3.msra.mxu0 %v3021_v48 }
 0x169   :  { %551 = vst.msk [vmem:[#allocation2 + $0x58] sm:$0xff] %vm539_vm14, %v3271_v58  ;;  %3215 = vmatprep.subr.mxu0 %v3569_v60 }
 0x16a   :  { %v520_v61 = vpop.f32.mrf.mxu1  ;;  %v560_v62 = vld [vmem:[#allocation2 + $0x31] sm:$0xff]  ;;  %v559_v63 = vld [vmem:[#allocation2 + $0x29] sm:$0xff]  ;;  %3216 = vmatpush3.msra.mxu0 %v3018_v53 }
 0x16b   :  { %550 = vst.msk [vmem:[#allocation2 + $0x50] sm:$0xff] %vm539_vm14, %v520_v61  ;;  %594 = vrot.lane.b32.xlu0 %v560_v62, %s3570_s9  ;;  %592 = vrot.lane.b32.xlu1 %v559_v63, %s3570_s9 }
 0x16c   :  { %v3274_v35 = vpop.f32.mrf.mxu1  ;;  %3217 = vmatprep.subr.mxu0 %v3569_v60 }
 0x16d   :  { %553 = vst.msk [vmem:[#allocation2 + $0x68] sm:$0xff] %vm539_vm14, %v3274_v35  ;;  %3218 = vmatpush3.msra.mxu0 %v3017_v55 }
 0x16e   :  { %v530_v37 = vpop.f32.mrf.mxu1  ;;  %v562_v38 = vld [vmem:[#allocation2 + $0x41] sm:$0xff]  ;;  %v561_v39 = vld [vmem:[#allocation2 + $0x39] sm:$0xff]  ;;  %3275 = vmatprep.subr.bf16.mxu0 %v3569_v60 }
 0x16f   :  { %552 = vst.msk [vmem:[#allocation2 + $0x60] sm:$0xff] %vm539_vm14, %v530_v37  ;;  %598 = vrot.lane.b32.xlu0 %v562_v38, %s3570_s9  ;;  %596 = vrot.lane.b32.xlu1 %v561_v39, %s3570_s9 }
 0x172   :  { %v564_v45 = vld [vmem:[#allocation2 + $0x51] sm:$0xff]  ;;  %v563_v46 = vld [vmem:[#allocation2 + $0x49] sm:$0xff] }
 0x173   :  { %602 = vrot.lane.b32.xlu0 %v564_v45, %s3570_s9  ;;  %600 = vrot.lane.b32.xlu1 %v563_v46, %s3570_s9 }
 0x174   :  { %v567_v54 = vld [vmem:[#allocation2 + $0x69] sm:$0x3f] }
 0x176   :  { %v566_v50 = vld [vmem:[#allocation2 + $0x61] sm:$0xff]  ;;  %v565_v51 = vld [vmem:[#allocation2 + $0x59] sm:$0xff] }
 0x177   :  { %606 = vrot.lane.b32.xlu0 %v566_v50, %s3570_s9  ;;  %604 = vrot.lane.b32.xlu1 %v565_v51, %s3570_s9 }
 0x17b   :  { %167 = vperm.xlu0 %3349, %v165_v52   ;;  %608 = vrot.lane.b32.xlu1 %v567_v54, %s3570_s9 }
 0x1d1   :  { %v583_v56 = vpop.permute.xlu0 %582 }
 0x1d2   :  { %625 = vst.msk [vmem:[#allocation2] sm:$0xff] %vm624_vm0, %v583_v56 }
 0x1d5   :  { %v587_v57 = vpop.permute.xlu0 %586  ;;  %v585_v58 = vpop.permute.xlu1 %584 }
 0x1d6   :  { %627 = vst.msk [vmem:[#allocation2 + $0x10] sm:$0xff] %vm624_vm0, %v587_v57  ;;  %626 = vst.msk [vmem:[#allocation2 + $0x8] sm:$0xff] %vm624_vm0, %v585_v58  ;;  %v3351_v57 = vld [vmem:[%s4654_s4 + $0x10] sm:$0xff]  }
 0x1d9   :  { %v591_v59 = vpop.permute.xlu0 %590  ;;  %v589_v61 = vpop.permute.xlu1 %588 }
 0x1da   :  { %629 = vst.msk [vmem:[#allocation2 + $0x20] sm:$0xff] %vm624_vm0, %v591_v59  ;;  %628 = vst.msk [vmem:[#allocation2 + $0x18] sm:$0xff] %vm624_vm0, %v589_v61  ;;  %v3352_v59 = vld [vmem:[%s4654_s4 + $0x8] sm:$0xff]   ;;  %v3353_v61 = vld [vmem:[%s4654_s4] sm:$0xff]  }
 0x1dd   :  { %v595_v62 = vpop.permute.xlu0 %594  ;;  %v593_v63 = vpop.permute.xlu1 %592  ;;  %v641_v32 = vld [vmem:[#allocation2 + $0xa] sm:$0xff]  ;;  %v640_v33 = vld [vmem:[#allocation2 + $0x2] sm:$0xff] }
 0x1de   :  { %631 = vst.msk [vmem:[#allocation2 + $0x30] sm:$0xff] %vm624_vm0, %v595_v62  ;;  %630 = vst.msk [vmem:[#allocation2 + $0x28] sm:$0xff] %vm624_vm0, %v593_v63  ;;  %670 = vrot.lane.b32.xlu0 %v641_v32, %s3572_s0  ;;  %668 = vrot.lane.b32.xlu1 %v640_v33, %s3572_s0 }
 0x1e1   :  { %v599_v35 = vpop.permute.xlu0 %598  ;;  %v597_v36 = vpop.permute.xlu1 %596  ;;  %v643_v37 = vld [vmem:[#allocation2 + $0x1a] sm:$0xff]  ;;  %v642_v38 = vld [vmem:[#allocation2 + $0x12] sm:$0xff] }
 0x1e2   :  { %633 = vst.msk [vmem:[#allocation2 + $0x40] sm:$0xff] %vm624_vm0, %v599_v35  ;;  %632 = vst.msk [vmem:[#allocation2 + $0x38] sm:$0xff] %vm624_vm0, %v597_v36  ;;  %674 = vrot.lane.b32.xlu0 %v643_v37, %s3572_s0  ;;  %672 = vrot.lane.b32.xlu1 %v642_v38, %s3572_s0 }
 0x1e5   :  { %v603_v39 = vpop.permute.xlu0 %602  ;;  %v601_v42 = vpop.permute.xlu1 %600  ;;  %v645_v43 = vld [vmem:[#allocation2 + $0x2a] sm:$0xff]  ;;  %v644_v45 = vld [vmem:[#allocation2 + $0x22] sm:$0xff] }
 0x1e6   :  { %635 = vst.msk [vmem:[#allocation2 + $0x50] sm:$0xff] %vm624_vm0, %v603_v39  ;;  %634 = vst.msk [vmem:[#allocation2 + $0x48] sm:$0xff] %vm624_vm0, %v601_v42  ;;  %678 = vrot.lane.b32.xlu0 %v645_v43, %s3572_s0  ;;  %676 = vrot.lane.b32.xlu1 %v644_v45, %s3572_s0 }
 0x1e9   :  { %v607_v46 = vpop.permute.xlu0 %606  ;;  %v605_v47 = vpop.permute.xlu1 %604  ;;  %v647_v48 = vld [vmem:[#allocation2 + $0x3a] sm:$0xff]  ;;  %v646_v49 = vld [vmem:[#allocation2 + $0x32] sm:$0xff] }
 0x1ea   :  { %637 = vst.msk [vmem:[#allocation2 + $0x60] sm:$0xff] %vm624_vm0, %v607_v46  ;;  %636 = vst.msk [vmem:[#allocation2 + $0x58] sm:$0xff] %vm624_vm0, %v605_v47  ;;  %682 = vrot.lane.b32.xlu0 %v647_v48, %s3572_s0  ;;  %680 = vrot.lane.b32.xlu1 %v646_v49, %s3572_s0 }
 0x1ed   :  { %v609_v50 = vpop.permute.xlu1 %608  ;;  %v649_v51 = vld [vmem:[#allocation2 + $0x4a] sm:$0xff]  ;;  %v648_v52 = vld [vmem:[#allocation2 + $0x42] sm:$0xff] }
 0x1ee   :  { %639 = vst.msk [vmem:[#allocation2 + $0x68] sm:$0x3f] %vm638_vm1, %v609_v50  ;;  %686 = vrot.lane.b32.xlu0 %v649_v51, %s3572_s0  ;;  %684 = vrot.lane.b32.xlu1 %v648_v52, %s3572_s0 }
 0x1f1   :  { %v650_v53 = vld [vmem:[#allocation2 + $0x52] sm:$0xff]  ;;  %v651_v54 = vld [vmem:[#allocation2 + $0x5a] sm:$0xff] }
 0x1f2   :  { %688 = vrot.lane.b32.xlu1 %v650_v53, %s3572_s0  ;;  %690 = vrot.lane.b32.xlu0 %v651_v54, %s3572_s0 }
 0x1f5   :  { %v652_v55 = vld [vmem:[#allocation2 + $0x62] sm:$0xff]  ;;  %v653_v56 = vld [vmem:[#allocation2 + $0x6a] sm:$0x3f] }
 0x1f6   :  { %v168_v58 = vpop.permute.xlu0 %167  ;;  %692 = vrot.lane.b32.xlu1 %v652_v55, %s3572_s0  ;;  %694 = vrot.lane.b32.xlu0 %v653_v56, %s3572_s0 }
 0x1f7   :  { %vm169_vm2 = vcmp.eq.s32.totalorder %v3867_v41, %v168_v58 }
 0x1f8   :  { %3220 = vmatmul.mubr.msk.f32.vlgmr.msra.gmra.mxu0 %vm169_vm2, %v3568_v44 }
 0x1f9   :  { %3276 = vmatpush3.bf16.msra.mxu0 %v3351_v57  ;;  %3281 = vmatprep.mubr.msk.bf16.mxu0 %vm3571_vm15, %v3569_v60 }
 0x1fa   :  { %3277 = vmatprep.subr.bf16.mxu0 %v3569_v60 }
 0x1fd   :  { %3278 = vmatpush3.bf16.msra.mxu0 %v3352_v59 }
 0x1fe   :  { %3279 = vmatprep.subr.bf16.mxu0 %v3569_v60 }
 0x201   :  { %3280 = vmatpush3.bf16.msra.mxu0 %v3353_v61 }
 0x202   :  { %3309 = vmatprep.subr.mxu0 %v3569_v60 }
 0x250   :  { %v671_v44 = vpop.permute.xlu0 %670  ;;  %v669_v62 = vpop.permute.xlu1 %668 }
 0x251   :  { %712 = vst.msk [vmem:[#allocation2 + $0x8] sm:$0xff] %vm710_vm3, %v671_v44  ;;  %711 = vst.msk [vmem:[#allocation2] sm:$0xff] %vm710_vm3, %v669_v62 }
 0x254   :  { %v675_v63 = vpop.permute.xlu0 %674  ;;  %v673_v32 = vpop.permute.xlu1 %672 }
 0x255   :  { %714 = vst.msk [vmem:[#allocation2 + $0x18] sm:$0xff] %vm710_vm3, %v675_v63  ;;  %713 = vst.msk [vmem:[#allocation2 + $0x10] sm:$0xff] %vm710_vm3, %v673_v32 }
 0x258   :  { %v679_v33 = vpop.permute.xlu0 %678  ;;  %v677_v35 = vpop.permute.xlu1 %676  ;;  %v726_v36 = vld [vmem:[#allocation2] sm:$0xff]  ;;  %v727_v37 = vld [vmem:[#allocation2 + $0x8] sm:$0xff] }
 0x259   :  { %716 = vst.msk [vmem:[#allocation2 + $0x28] sm:$0xff] %vm710_vm3, %v679_v33  ;;  %715 = vst.msk [vmem:[#allocation2 + $0x20] sm:$0xff] %vm710_vm3, %v677_v35  ;;  %v740_v38 = vpack.c.bf16 %v727_v37, %v726_v36 }
 0x25b   :  { %3282 = vmatmul.mubr.msk.bf16.vlgmr.msra.gmra.mxu0 %vm778_vm4, %v740_v38 }
 0x25c   :  { %v683_v39 = vpop.permute.xlu0 %682  ;;  %v681_v42 = vpop.permute.xlu1 %680  ;;  %3285 = vmatprep.mubr.msk.bf16.mxu0 %vm3571_vm15, %v3569_v60  ;;  %v728_v43 = vld [vmem:[#allocation2 + $0x10] sm:$0xff]  ;;  %v729_v45 = vld [vmem:[#allocation2 + $0x18] sm:$0xff] }
 0x25d   :  { %718 = vst.msk [vmem:[#allocation2 + $0x38] sm:$0xff] %vm710_vm3, %v683_v39  ;;  %717 = vst.msk [vmem:[#allocation2 + $0x30] sm:$0xff] %vm710_vm3, %v681_v42  ;;  %v741_v48 = vpack.c.bf16 %v729_v45, %v728_v43 }
 0x260   :  { %v687_v46 = vpop.permute.xlu0 %686  ;;  %v685_v47 = vpop.permute.xlu1 %684  ;;  %v730_v51 = vld [vmem:[#allocation2 + $0x20] sm:$0xff]  ;;  %v731_v52 = vld [vmem:[#allocation2 + $0x28] sm:$0xff] }
 0x261   :  { %720 = vst.msk [vmem:[#allocation2 + $0x48] sm:$0xff] %vm710_vm3, %v687_v46  ;;  %719 = vst.msk [vmem:[#allocation2 + $0x40] sm:$0xff] %vm710_vm3, %v685_v47  ;;  %v742_v55 = vpack.c.bf16 %v731_v52, %v730_v51 }
 0x263   :  { %3286 = vmatmul.mubr.msk.bf16.gmra.mxu0 %vm778_vm4, %v741_v48 }
 0x264   :  { %v689_v49 = vpop.permute.xlu1 %688  ;;  %v691_v50 = vpop.permute.xlu0 %690  ;;  %3289 = vmatprep.mubr.msk.bf16.mxu0 %vm3571_vm15, %v3569_v60  ;;  %v732_v56 = vld [vmem:[#allocation2 + $0x30] sm:$0xff]  ;;  %v733_v57 = vld [vmem:[#allocation2 + $0x38] sm:$0xff] }
 0x265   :  { %721 = vst.msk [vmem:[#allocation2 + $0x50] sm:$0xff] %vm710_vm3, %v689_v49  ;;  %722 = vst.msk [vmem:[#allocation2 + $0x58] sm:$0xff] %vm710_vm3, %v691_v50  ;;  %v743_v58 = vpack.c.bf16 %v733_v57, %v732_v56 }
 0x268   :  { %v693_v53 = vpop.permute.xlu1 %692  ;;  %v695_v54 = vpop.permute.xlu0 %694  ;;  %v734_v59 = vld [vmem:[#allocation2 + $0x40] sm:$0xff]  ;;  %v735_v61 = vld [vmem:[#allocation2 + $0x48] sm:$0xff] }
 0x269   :  { %723 = vst.msk [vmem:[#allocation2 + $0x60] sm:$0xff] %vm710_vm3, %v693_v53  ;;  %v744_v44 = vpack.c.bf16 %v735_v61, %v734_v59 }
 0x26a   :  { %725 = vst.msk [vmem:[#allocation2 + $0x68] sm:$0x3f] %vm724_vm5, %v695_v54 }
 0x26b   :  { %3290 = vmatmul.mubr.msk.bf16.gmra.mxu0 %vm778_vm4, %v742_v55 }
 0x26c   :  { %3293 = vmatprep.mubr.msk.bf16.mxu0 %vm3571_vm15, %v3569_v60  ;;  %v736_v62 = vld [vmem:[#allocation2 + $0x50] sm:$0xff]  ;;  %v737_v63 = vld [vmem:[#allocation2 + $0x58] sm:$0xff] }
 0x26d   :  { %v745_v32 = vpack.c.bf16 %v737_v63, %v736_v62 }
 0x270   :  { %v738_v33 = vld [vmem:[#allocation2 + $0x60] sm:$0xff] }
 0x271   :  { %v739_v35 = vld [vmem:[#allocation2 + $0x68] sm:$0x3f] }
 0x272   :  { %v746_v36 = vpack.c.bf16 %v739_v35, %v738_v33 }
 0x273   :  { %3294 = vmatmul.mubr.msk.bf16.gmra.mxu0 %vm778_vm4, %v743_v58 }
 0x274   :  { %3297 = vmatprep.mubr.msk.bf16.mxu0 %vm3571_vm15, %v3569_v60 }
 0x27b   :  { %3298 = vmatmul.mubr.msk.bf16.gmra.mxu0 %vm778_vm4, %v744_v44 }
 0x27c   :  { %3301 = vmatprep.mubr.msk.bf16.mxu0 %vm3571_vm15, %v3569_v60 }
 0x283   :  { %3302 = vmatmul.mubr.msk.bf16.gmra.mxu0 %vm778_vm4, %v745_v32 }
 0x284   :  { %3305 = vmatprep.mubr.msk.bf16.mxu0 %vm3571_vm15, %v3569_v60 }
 0x28b   :  { %3306 = vmatmul.mubr.msk.bf16.gmra.mxu0 %vm778_vm4, %v746_v36 }
 0x28c   :  { %3337 = vmatprep.mubr.msk.f32.mxu0 %vm3571_vm15, %v3569_v60 }
 0x2b8   :  { %v270_v37 = vpop.f32.mrf.mxu0 }
 0x2b9   :  { %992 = vst.msk [vmem:[#allocation3] sm:$0xff] %vm991_vm6, %v270_v37  ;;  %v2897_v37 = vld [vmem:[%s4655_s5] ss:$0 sm:$0xff]  ;;  %s3573_s5 = smov [#allocation7]  }
 0x2ba   :  { %v3221_v38 = vpop.f32.mrf.mxu0  ;;  %s159_s28 = sshll.u32 %s3573_s5, 4  ;;  %s160_s28 = int_to_ptr.vmem [resolvable:$true] %s159_s28 }
 0x2bb   :  { %s3526_s29 = scalar_lea.vmem %s160_s28, 2048  ;;  %p3531_p6 = scmp.lt.s32.totalorder %s160_s28, %s160_s28 }
 0x2bc   :  { %p3527_p5 = scmp.ne.s32.totalorder %s160_s28, %s3526_s29  ;;  %p3532_p7 = scmp.lt.s32.totalorder %s3526_s29, %s3526_s29 }
 0x2be   :  { %p3533_p8 = por %p3532_p7, %p3531_p6 }
 0x2c0   :  { %p3534_p9 = pnand %p3533_p8, %p3527_p5 }
 0x31b   :  { %v4048_v39 = vpop.f32.mrf.mxu0 }
 0x31d   :  { %v3283_v42 = vpop.f32.mrf.mxu0 }
 0x31f   :  { %v4050_v43 = vpop.f32.mrf.mxu0 }
 0x321   :  { %v3284_v45 = vpop.f32.mrf.mxu0 }
 0x323   :  { %v4052_v46 = vpop.f32.mrf.mxu0 }
 0x325   :  { %v3287_v47 = vpop.f32.mrf.mxu0 }
 0x327   :  { %v845_v48 = vpop.f32.mrf.mxu0 }
 0x329   :  { %v3288_v49 = vpop.f32.mrf.mxu0 }
 0x32b   :  { %v850_v50 = vpop.f32.mrf.mxu0 }
 0x32d   :  { %v3291_v51 = vpop.f32.mrf.mxu0 }
 0x32f   :  { %v853_v52 = vpop.f32.mrf.mxu0 }
 0x331   :  { %v3292_v53 = vpop.f32.mrf.mxu0 }
 0x333   :  { %v858_v54 = vpop.f32.mrf.mxu0 }
 0x335   :  { %v3295_v55 = vpop.f32.mrf.mxu0 }
 0x337   :  { %v861_v56 = vpop.f32.mrf.mxu0 }
 0x339   :  { %v3296_v57 = vpop.f32.mrf.mxu0 }
 0x33b   :  { %v866_v58 = vpop.f32.mrf.mxu0 }
 0x33d   :  { %v3299_v59 = vpop.f32.mrf.mxu0 }
 0x33f   :  { %v869_v61 = vpop.f32.mrf.mxu0 }
 0x340   :  { %v870_v57 = vadd.f32 %v2897_v37, %v869_v61  ;;  %v859_v61 = vadd.f32 %v2897_v37, %v858_v54 }
 0x341   :  { %v3300_v44 = vpop.f32.mrf.mxu0 }
 0x342   :  { %v4059_v44 = vshrl.u32 %v163_v40, 7  ;;  %v854_v40 = vadd.f32 %v2897_v37, %v853_v52  ;;  %v843_v52 = vadd.f32 %v2897_v37, %v4052_v46 }
 0x343   :  { %v874_v62 = vpop.f32.mrf.mxu0 }
 0x344   :  { %v875_v53 = vadd.f32 %v2897_v37, %v874_v62  ;;  %v905_v62 = vmul.u32 14, %v4059_v44 }
 0x345   :  { %v3303_v63 = vpop.f32.mrf.mxu0 }
 0x346   :  { %v867_v63 = vadd.f32 %v2897_v37, %v866_v58  ;;  %v907_v58 = vadd.s32 12, %v905_v62  ;;  %vm906_vm8 = vcmp.ge.s32.totalorder %v3867_v41, %v905_v62 }
 0x347   :  { %v877_v32 = vpop.f32.mrf.mxu0 }
 0x348   :  { %v878_v49 = vadd.f32 %v2897_v37, %v877_v32  ;;  %v862_v32 = vadd.f32 %v2897_v37, %v861_v56  ;;  %v846_v56 = vadd.f32 %v2897_v37, %v845_v48  ;;  %vm908_vm9 = vcmp.lt.s32.totalorder %v3867_v41, %v907_v58 }
 0x349   :  { %v3304_v33 = vpop.f32.mrf.mxu0  ;;  %vm909_vm10 = vmand %vm906_vm8, %vm908_vm9  ;;  %v835_v48 = vadd.f32 %v2897_v37, %v4048_v39 }
 0x34a   :  { %v900_v59 = vmax.f32 %v878_v49, 0.0  ;;  %v899_v33 = vmax.f32 %v875_v53, 0.0  ;;  %v892_v49 = vmax.f32 %v846_v56, 0.0  ;;  %v2908_v41 = vsel %vm909_vm10, 1.0, %v3569_v60 }
 0x34b   :  { %v882_v35 = vpop.f32.mrf.mxu0  ;;  %v912_v53 = vmul.f32 0.083333336, %v2908_v41 }
 0x34c   :  { %v883_v42 = vadd.f32 %v2897_v37, %v882_v35  ;;  %v898_v35 = vmax.f32 %v870_v57, 0.0 }
 0x34d   :  { %v3307_v36 = vpop.f32.mrf.mxu0 }
 0x34e   :  { %v901_v55 = vmax.f32 %v883_v42, 0.0  ;;  %v897_v36 = vmax.f32 %v867_v63, 0.0  ;;  %v851_v42 = vadd.f32 %v2897_v37, %v850_v50  ;;  %v838_v50 = vadd.f32 %v2897_v37, %v4050_v43 }
 0x34f   :  { %v885_v38 = vpop.f32.mrf.mxu0 }
 0x350   :  { %v886_v45 = vadd.f32 %v2897_v37, %v885_v38  ;;  %v896_v38 = vmax.f32 %v862_v32, 0.0  ;;  %v893_v54 = vmax.f32 %v851_v42, 0.0  ;;  %v890_v46 = vmax.f32 %v838_v50, 0.0 }
 0x351   :  { %v3308_v47 = vpop.f32.mrf.mxu0 }
 0x352   :  { %v902_v51 = vmax.f32 %v886_v45, 0.0  ;;  %v895_v45 = vmax.f32 %v859_v61, 0.0  ;;  %v894_v47 = vmax.f32 %v854_v40, 0.0 }
 0x354   :  { %3310 = vmatpush3.msk.msra.mxu0 %vm917_vm7, %v902_v51  ;;  %v891_v51 = vmax.f32 %v843_v52, 0.0 }
 0x355   :  { %3311 = vmatprep.subr.mxu0 %v3569_v60 }
 0x356   :  { %3312 = vmatpush3.msra.mxu0 %v901_v55  ;;  %v889_v55 = vmax.f32 %v835_v48, 0.0 }
 0x357   :  { %3313 = vmatprep.subr.mxu0 %v3569_v60 }
 0x358   :  { %3314 = vmatpush3.msra.mxu0 %v900_v59 }
 0x359   :  { %3315 = vmatprep.subr.mxu0 %v3569_v60 }
 0x35a   :  { %3316 = vmatpush3.msra.mxu0 %v899_v33 }
 0x35b   :  { %3317 = vmatprep.subr.mxu0 %v3569_v60 }
 0x35c   :  { %3318 = vmatpush3.msra.mxu0 %v898_v35 }
 0x35d   :  { %3319 = vmatprep.subr.mxu0 %v3569_v60 }
 0x35e   :  { %3320 = vmatpush3.msra.mxu0 %v897_v36 }
 0x35f   :  { %3321 = vmatprep.subr.mxu0 %v3569_v60 }
 0x360   :  { %3322 = vmatpush3.msra.mxu0 %v896_v38 }
 0x361   :  { %3323 = vmatprep.subr.mxu0 %v3569_v60 }
 0x362   :  { %3324 = vmatpush3.msra.mxu0 %v895_v45 }
 0x363   :  { %3325 = vmatprep.subr.mxu0 %v3569_v60 }
 0x364   :  { %3326 = vmatpush3.msra.mxu0 %v894_v47 }
 0x365   :  { %3327 = vmatprep.subr.mxu0 %v3569_v60 }
 0x366   :  { %3328 = vmatpush3.msra.mxu0 %v893_v54 }
 0x367   :  { %3329 = vmatprep.subr.mxu0 %v3569_v60 }
 0x368   :  { %3330 = vmatpush3.msra.mxu0 %v892_v49 }
 0x369   :  { %3331 = vmatprep.subr.mxu0 %v3569_v60 }
 0x36a   :  { %3332 = vmatpush3.msra.mxu0 %v891_v51 }
 0x36b   :  { %3333 = vmatprep.subr.mxu0 %v3569_v60 }
 0x36c   :  { %3334 = vmatpush3.msra.mxu0 %v890_v46 }
 0x36d   :  { %3335 = vmatprep.subr.mxu0 %v3569_v60 }
 0x36e   :  { %3336 = vmatpush3.msra.mxu0 %v889_v55 }
 0x36f   :  { %3338 = vmatmul.mubr.msk.f32.vlgmr.msra.gmra.mxu0 %vm913_vm11, %v912_v53 }
 0x370   :  { %3537 = shalt.err (!%p3534_p9)  }
 0x371   :  { %162 = dma.hbm_to_vmem [thread:$0]  %s4660_s10, 2048, %s160_s28, [#allocation8 + $0x2] }
 0x42f   :  { %v987_v39 = vpop.f32.mrf.mxu0 }
 0x430   :  { %994 = vrot.lane.b32.xlu1 %v987_v39, %s3572_s0 }
 0x431   :  { %v3339_v60 = vpop.f32.mrf.mxu0 }
 0x4a2   :  { %v995_v43 = vpop.permute.xlu1 %994 }
 0x4a3   :  { %997 = vst.msk [vmem:[#allocation3] sm:$0xff] %vm710_vm3, %v995_v43 }
 0x4aa   :  { %v998_v37 = vld [vmem:[#allocation3] sm:$0xff] }
 0x4ab   :  { %v4085_v57 = vpack.c.bf16 %v998_v37, %v998_v37 }
 0x4ac   :  { %3558 = dma.done.wait [#allocation8], 3072 }
 0x4ad   :  { %3559 = vsyncadd [#allocation8], 4294964224  ;;  %1183 = vmatprep.mubr.bf16.mxu1 %v4662_v34  ;;  %1306 = vmatprep.mubr.bf16.mxu0 %v4662_v34  ;;  %v1020_v59 = vld [vmem:[#allocation5 + $0x80] sm:$0xff]  ;;  %v1023_v38 = vld [vmem:[#allocation5 + $0x98] sm:$0xff] }
 0x4ae   :  { %v1024_v63 = vld [vmem:[#allocation5 + $0xa0] sm:$0xff]  ;;  %v1027_v58 = vld [vmem:[#allocation5 + $0xb8] sm:$0xff]  ;;  %v1021_v54 = vld [vmem:[#allocation5 + $0x88] sm:$0xff] }
 0x4af   :  { %v1012_v33 = vld [vmem:[#allocation5 + $0x40] sm:$0xff]  ;;  %v2928_v32 = vcombine.high %v1020_v59, %v1024_v63  ;;  %v2927_v35 = vcombine.low %v1020_v59, %v1024_v63  ;;  %v2934_v45 = vcombine.high %v1023_v38, %v1027_v58  ;;  %v2933_v56 = vcombine.low %v1023_v38, %v1027_v58  ;;  %v1015_v47 = vld [vmem:[#allocation5 + $0x58] sm:$0xff]  ;;  %v1025_v49 = vld [vmem:[#allocation5 + $0xa8] sm:$0xff] }
 0x4b0   :  { %v1016_v62 = vld [vmem:[#allocation5 + $0x60] sm:$0xff]  ;;  %v1019_v50 = vld [vmem:[#allocation5 + $0x78] sm:$0xff]  ;;  %v2930_v39 = vcombine.high %v1021_v54, %v1025_v49  ;;  %v1013_v60 = vld [vmem:[#allocation5 + $0x48] sm:$0xff]  ;;  %v2929_v59 = vcombine.low %v1021_v54, %v1025_v49 }
 0x4b1   :  { %v2920_v61 = vcombine.high %v1012_v33, %v1016_v62  ;;  %v1004_v36 = vld [vmem:[#allocation5] sm:$0xff]  ;;  %1161 = vmatprep.subr.bf16.mxu1 %v2928_v32  ;;  %v2919_v42 = vcombine.low %v1012_v33, %v1016_v62  ;;  %1284 = vmatprep.subr.bf16.mxu0 %v2934_v45  ;;  %v2926_v48 = vcombine.high %v1015_v47, %v1019_v50  ;;  %v1007_v51 = vld [vmem:[#allocation5 + $0x18] sm:$0xff]  ;;  %v1017_v43 = vld [vmem:[#allocation5 + $0x68] sm:$0xff] }
 0x4b2   :  { %v1008_v40 = vld [vmem:[#allocation5 + $0x20] sm:$0xff]  ;;  %1162 = vmatpush1.bf16.msra.mxu1 %v2927_v35  ;;  %v1011_v41 = vld [vmem:[#allocation5 + $0x38] sm:$0xff]  ;;  %1285 = vmatpush1.bf16.msra.mxu0 %v2933_v56  ;;  %v2925_v46 = vcombine.low %v1015_v47, %v1019_v50  ;;  %v2922_v63 = vcombine.high %v1013_v60, %v1017_v43  ;;  %v1005_v33 = vld [vmem:[#allocation5 + $0x8] sm:$0xff]  ;;  %v2921_v35 = vcombine.low %v1013_v60, %v1017_v43 }
 0x4b3   :  { %1163 = vmatprep.subr.bf16.mxu1 %v2920_v61  ;;  %v2912_v52 = vcombine.high %v1004_v36, %v1008_v40  ;;  %v2911_v53 = vcombine.low %v1004_v36, %v1008_v40  ;;  %1286 = vmatprep.subr.bf16.mxu0 %v2926_v48  ;;  %v2918_v55 = vcombine.high %v1007_v51, %v1011_v41  ;;  %v1009_v32 = vld [vmem:[#allocation5 + $0x28] sm:$0xff]  ;;  %v1022_v61 = vld [vmem:[#allocation5 + $0x90] sm:$0xff]  ;;  %v1319_v48 = vsub.s32 0, %v4059_v44 }
 0x4b4   :  { %v2917_v37 = vcombine.low %v1007_v51, %v1011_v41  ;;  %v2914_v62 = vcombine.high %v1005_v33, %v1009_v32  ;;  %v1026_v36 = vld [vmem:[#allocation5 + $0xb0] sm:$0xff]  ;;  %v2913_v40 = vcombine.low %v1005_v33, %v1009_v32  ;;  %v1315_v51 = vld [vmem:[%s4656_s6] sm:$0xf]  ;;  %v1323_v41 = vsub.s32 1, %v4059_v44 }
 0x4b5   :  { %v2932_v38 = vcombine.high %v1022_v61, %v1026_v36  ;;  %v1014_v58 = vld [vmem:[#allocation5 + $0x50] sm:$0xff]  ;;  %v2931_v45 = vcombine.low %v1022_v61, %v1026_v36  ;;  %v1331_v32 = vsub.s32 3, %v4059_v44 }
 0x4b6   :  { %1164 = vmatpush1.bf16.msra.mxu1 %v2919_v42  ;;  %1287 = vmatpush1.bf16.msra.mxu0 %v2925_v46  ;;  %v1018_v42 = vld [vmem:[#allocation5 + $0x70] sm:$0xff]  ;;  %v1320_v46 = vrot.slane %v1315_v51, %v1319_v48  ;;  %v4132_v48 = vcombine.high %v3761_v24, %v3771_v26 }
 0x4b7   :  { %1165 = vmatprep.subr.bf16.mxu1 %v2912_v52  ;;  %1288 = vmatprep.subr.bf16.mxu0 %v2918_v55  ;;  %v2924_v56 = vcombine.high %v1014_v58, %v1018_v42  ;;  %v1006_v47 = vld [vmem:[#allocation5 + $0x10] sm:$0xff]  ;;  %v2923_v54 = vcombine.low %v1014_v58, %v1018_v42  ;;  %v1332_v36 = vrot.slane %v1315_v51, %v1331_v32 }
 0x4b8   :  { %v1010_v52 = vld [vmem:[#allocation5 + $0x30] sm:$0xff] }
 0x4b9   :  { %v2916_v50 = vcombine.high %v1006_v47, %v1010_v52  ;;  %v2915_v49 = vcombine.low %v1006_v47, %v1010_v52 }
 0x4ba   :  { %1166 = vmatpush1.bf16.msra.mxu1 %v2911_v53  ;;  %1289 = vmatpush1.bf16.msra.mxu0 %v2917_v37  ;;  %v1324_v53 = vrot.slane %v1315_v51, %v1323_v41 }
 0x4bb   :  { %1202 = vmatprep.subr.bf16.mxu1 %v2930_v39 }
 0x4bd   :  { %2935 = vmatmul.mubr.msk.bf16.vlgmr.msra.gmra.mxu1 %vm778_vm4, %v4085_v57  ;;  %2938 = vmatmul.mubr.msk.bf16.vlgmr.msra.gmra.mxu0 %vm778_vm4, %v4085_v57 }
 0x4be   :  { %1203 = vmatpush1.bf16.msra.mxu1 %v2929_v59  ;;  %1224 = vmatprep.mubr.bf16.mxu1 %v4662_v34 }
 0x4bf   :  { %1204 = vmatprep.subr.bf16.mxu1 %v2922_v63 }
 0x4c2   :  { %1205 = vmatpush1.bf16.msra.mxu1 %v2921_v35 }
 0x4c3   :  { %1206 = vmatprep.subr.bf16.mxu1 %v2914_v62 }
 0x4c6   :  { %1207 = vmatpush1.bf16.msra.mxu1 %v2913_v40 }
 0x4c7   :  { %1243 = vmatprep.subr.bf16.mxu1 %v2932_v38 }
 0x4c9   :  { %2936 = vmatmul.mubr.msk.bf16.vlgmr.msra.gmra.mxu1 %vm778_vm4, %v4085_v57 }
 0x4ca   :  { %1244 = vmatpush1.bf16.msra.mxu1 %v2931_v45  ;;  %1265 = vmatprep.mubr.bf16.mxu1 %v4662_v34 }
 0x4cb   :  { %1245 = vmatprep.subr.bf16.mxu1 %v2924_v56 }
 0x4ce   :  { %1246 = vmatpush1.bf16.msra.mxu1 %v2923_v54 }
 0x4cf   :  { %1247 = vmatprep.subr.bf16.mxu1 %v2916_v50 }
 0x4d2   :  { %1248 = vmatpush1.bf16.msra.mxu1 %v2915_v49  ;;  %v4128_v49 = vcombine.low %v3781_v28, %v3791_v30 }
 0x4d5   :  { %2937 = vmatmul.mubr.msk.bf16.vlgmr.msra.gmra.mxu1 %vm778_vm4, %v4085_v57  ;;  %v1327_v57 = vsub.s32 2, %v4059_v44  ;;  %v4124_v44 = vcombine.high %v3781_v28, %v3791_v30 }
 0x4d6   :  { %1585 = vmatprep.mubr.bf16.mxu1 %v4662_v34 }
 0x4d7   :  { %v1328_v62 = vrot.slane %v1315_v51, %v1327_v57 }
 0x57d   :  { %v1185_v55 = vpop.f32.mrf.mxu1  ;;  %v4108_v37 = vpop.f32.mrf.mxu0 }
 0x57e   :  { %v4104_v39 = vadd.f32 %v1320_v46, %v1185_v55 }
 0x57f   :  { %v1187_v60 = vpop.f32.mrf.mxu1  ;;  %v4111_v63 = vpop.f32.mrf.mxu0 }
 0x580   :  { %v4106_v43 = vadd.f32 %v1324_v53, %v1187_v60 }
 0x581   :  { %v1189_v59 = vpop.f32.mrf.mxu1  ;;  %v1312_v35 = vpop.f32.mrf.mxu0 }
 0x583   :  { %v1190_v33 = vpop.f32.mrf.mxu1  ;;  %v1313_v61 = vpop.f32.mrf.mxu0 }
 0x589   :  { %v1226_v40 = vpop.f32.mrf.mxu1 }
 0x58a   :  { %v4114_v38 = vadd.f32 %v1328_v62, %v1226_v40 }
 0x58b   :  { %v1228_v58 = vpop.f32.mrf.mxu1 }
 0x58c   :  { %v4116_v42 = vadd.f32 %v1332_v36, %v1228_v58 }
 0x58d   :  { %v1230_v45 = vpop.f32.mrf.mxu1 }
 0x58f   :  { %v1231_v56 = vpop.f32.mrf.mxu1 }
 0x595   :  { %v4118_v47 = vpop.f32.mrf.mxu1 }
 0x597   :  { %v4120_v52 = vpop.f32.mrf.mxu1 }
 0x599   :  { %v1271_v54 = vpop.f32.mrf.mxu1 }
 0x59b   :  { %v1272_v50 = vpop.f32.mrf.mxu1 }
 0x59c   :  { %3560 = dma.done.wait [#allocation8 + $0x1], 4096 }
 0x59d   :  { %3561 = vsyncadd [#allocation8 + $0x1], 4294963200  ;;  %v4137_v51 = vcombine.high %v3786_v29, %v3796_v31  ;;  %1626 = vmatprep.mubr.bf16.mxu0 %v4662_v34  ;;  %1553 = vmatprep.subr.bf16.mxu1 %v4124_v44  ;;  %v4143_v28 = vcombine.low %v3786_v29, %v3796_v31  ;;  %v4147_v30 = vcombine.high %v3766_v25, %v3776_v27  ;;  %v1383_v57 = vrot.slane %v4108_v37, 7 }
 0x59e   :  { %1554 = vmatpush1.bf16.msra.mxu1 %v4128_v49  ;;  %v4152_v41 = vcombine.low %v3761_v24, %v3771_v26  ;;  %v4158_v46 = vcombine.high %v3741_v20, %v3751_v22  ;;  %v4163_v29 = vcombine.low %v3766_v25, %v3776_v27  ;;  %v4168_v24 = vcombine.high %v3746_v21, %v3756_v23 }
 0x59f   :  { %1594 = vmatprep.subr.bf16.mxu0 %v4137_v51  ;;  %1555 = vmatprep.subr.bf16.mxu1 %v4132_v48  ;;  %v4173_v26 = vcombine.low %v3741_v20, %v3751_v22  ;;  %v4178_v31 = vcombine.high %v3721_v16, %v3731_v18  ;;  %v4183_v25 = vcombine.low %v3746_v21, %v3756_v23  ;;  %v1384_v58 = vrot.slane %v4111_v63, 7 }
 0x5a0   :  { %1595 = vmatpush1.bf16.msra.mxu0 %v4143_v28  ;;  %v4188_v27 = vcombine.high %v3726_v17, %v3736_v19  ;;  %v4193_v20 = vcombine.low %v3721_v16, %v3731_v18  ;;  %v4198_v22 = vcombine.high %v3701_v12, %v3711_v14  ;;  %v4203_v21 = vcombine.low %v3726_v17, %v3736_v19 }
 0x5a1   :  { %1596 = vmatprep.subr.bf16.mxu0 %v4147_v30  ;;  %v4208_v23 = vcombine.high %v3706_v13, %v3716_v15  ;;  %v4213_v16 = vcombine.low %v3701_v12, %v3711_v14  ;;  %v4218_v18 = vcombine.high %v3681_v8, %v3691_v10  ;;  %v4223_v17 = vcombine.low %v3706_v13, %v3716_v15 }
 0x5a2   :  { %1556 = vmatpush1.bf16.msra.mxu1 %v4152_v41  ;;  %v4228_v19 = vcombine.high %v3686_v9, %v3696_v11  ;;  %v4233_v12 = vcombine.low %v3681_v8, %v3691_v10  ;;  %v4238_v14 = vcombine.high %v3658_v4, %v3668_v6  ;;  %v4243_v13 = vcombine.low %v3686_v9, %v3696_v11 }
 0x5a3   :  { %1557 = vmatprep.subr.bf16.mxu1 %v4158_v46  ;;  %v4248_v15 = vcombine.high %v3663_v5, %v3673_v7  ;;  %v4253_v8 = vcombine.low %v3658_v4, %v3668_v6  ;;  %v4258_v10 = vcombine.high %v3638_v0, %v3648_v2  ;;  %v4263_v9 = vcombine.low %v3663_v5, %v3673_v7 }
 0x5a4   :  { %1597 = vmatpush1.bf16.msra.mxu0 %v4163_v29  ;;  %v4268_v11 = vcombine.high %v3643_v1, %v3653_v3  ;;  %v4273_v4 = vcombine.low %v3638_v0, %v3648_v2  ;;  %v4279_v5 = vcombine.low %v3643_v1, %v3653_v3  ;;  %v1381_v0 = vrot.slane %v4118_v47, 7 }
 0x5a5   :  { %1598 = vmatprep.subr.bf16.mxu0 %v4168_v24  ;;  %v1382_v1 = vrot.slane %v4120_v52, 7  ;;  %v4334_v36 = vadd.f32 %v1383_v57, %v4114_v38  ;;  %v4339_v56 = vadd.f32 %v1384_v58, %v4116_v42 }
 0x5a6   :  { %1558 = vmatpush1.bf16.msra.mxu1 %v4173_v26  ;;  %v4325_v2 = vadd.f32 %v1381_v0, %v4104_v39 }
 0x5a7   :  { %1559 = vmatprep.subr.bf16.mxu1 %v4178_v31  ;;  %v4328_v3 = vadd.f32 %v1382_v1, %v4106_v43  ;;  %4670 = vst [vmem:[#allocation22_spill] sm:$0xff] %v4339_v56 }
 0x5a8   :  { %1599 = vmatpush1.bf16.msra.mxu0 %v4183_v25 }
 0x5a9   :  { %1600 = vmatprep.subr.bf16.mxu0 %v4188_v27 }
 0x5aa   :  { %1560 = vmatpush1.bf16.msra.mxu1 %v4193_v20 }
 0x5ab   :  { %1561 = vmatprep.subr.bf16.mxu1 %v4198_v22 }
 0x5ac   :  { %1601 = vmatpush1.bf16.msra.mxu0 %v4203_v21 }
 0x5ad   :  { %1602 = vmatprep.subr.bf16.mxu0 %v4208_v23 }
 0x5ae   :  { %1562 = vmatpush1.bf16.msra.mxu1 %v4213_v16 }
 0x5af   :  { %1563 = vmatprep.subr.bf16.mxu1 %v4218_v18 }
 0x5b0   :  { %1603 = vmatpush1.bf16.msra.mxu0 %v4223_v17 }
 0x5b1   :  { %1604 = vmatprep.subr.bf16.mxu0 %v4228_v19 }
 0x5b2   :  { %1564 = vmatpush1.bf16.msra.mxu1 %v4233_v12 }
 0x5b3   :  { %1565 = vmatprep.subr.bf16.mxu1 %v4238_v14 }
 0x5b4   :  { %1605 = vmatpush1.bf16.msra.mxu0 %v4243_v13 }
 0x5b5   :  { %1606 = vmatprep.subr.bf16.mxu0 %v4248_v15 }
 0x5b6   :  { %1566 = vmatpush1.bf16.msra.mxu1 %v4253_v8 }
 0x5b7   :  { %1567 = vmatprep.subr.bf16.mxu1 %v4258_v10 }
 0x5b8   :  { %1607 = vmatpush1.bf16.msra.mxu0 %v4263_v9 }
 0x5b9   :  { %1608 = vmatprep.subr.bf16.mxu0 %v4268_v11 }
 0x5ba   :  { %1568 = vmatpush1.bf16.msra.mxu1 %v4273_v4 }
 0x5bb   :  { %1678 = vmatprep.subr.bf16.mxu1 %v4124_v44 }
 0x5bc   :  { %1609 = vmatpush1.bf16.msra.mxu0 %v4279_v5 }
 0x5bd   :  { %1719 = vmatprep.subr.bf16.mxu0 %v4137_v51  ;;  %1586 = vmatmul.mubr.bf16.vlgmr.msra.gmra.mxu1 %v4662_v34 }
 0x5be   :  { %1679 = vmatpush1.bf16.msra.mxu1 %v4128_v49  ;;  %1710 = vmatprep.mubr.bf16.mxu1 %v4662_v34 }
 0x5bf   :  { %1627 = vmatmul.mubr.bf16.vlgmr.msra.gmra.mxu0 %v4662_v34  ;;  %1680 = vmatprep.subr.bf16.mxu1 %v4132_v48 }
 0x5c0   :  { %1720 = vmatpush1.bf16.msra.mxu0 %v4143_v28  ;;  %1751 = vmatprep.mubr.bf16.mxu0 %v4662_v34 }
 0x5c1   :  { %1721 = vmatprep.subr.bf16.mxu0 %v4147_v30 }
 0x5c2   :  { %1681 = vmatpush1.bf16.msra.mxu1 %v4152_v41 }
 0x5c3   :  { %1682 = vmatprep.subr.bf16.mxu1 %v4158_v46 }
 0x5c4   :  { %1722 = vmatpush1.bf16.msra.mxu0 %v4163_v29 }
 0x5c5   :  { %1723 = vmatprep.subr.bf16.mxu0 %v4168_v24 }
 0x5c6   :  { %1683 = vmatpush1.bf16.msra.mxu1 %v4173_v26 }
 0x5c7   :  { %1684 = vmatprep.subr.bf16.mxu1 %v4178_v31 }
 0x5c8   :  { %1724 = vmatpush1.bf16.msra.mxu0 %v4183_v25 }
 0x5c9   :  { %1725 = vmatprep.subr.bf16.mxu0 %v4188_v27 }
 0x5ca   :  { %1685 = vmatpush1.bf16.msra.mxu1 %v4193_v20 }
 0x5cb   :  { %1686 = vmatprep.subr.bf16.mxu1 %v4198_v22 }
 0x5cc   :  { %1726 = vmatpush1.bf16.msra.mxu0 %v4203_v21 }
 0x5cd   :  { %1727 = vmatprep.subr.bf16.mxu0 %v4208_v23 }
 0x5ce   :  { %1687 = vmatpush1.bf16.msra.mxu1 %v4213_v16 }
 0x5cf   :  { %1688 = vmatprep.subr.bf16.mxu1 %v4218_v18 }
 0x5d0   :  { %1728 = vmatpush1.bf16.msra.mxu0 %v4223_v17 }
 0x5d1   :  { %1729 = vmatprep.subr.bf16.mxu0 %v4228_v19 }
 0x5d2   :  { %1689 = vmatpush1.bf16.msra.mxu1 %v4233_v12 }
 0x5d3   :  { %1690 = vmatprep.subr.bf16.mxu1 %v4238_v14 }
 0x5d4   :  { %1730 = vmatpush1.bf16.msra.mxu0 %v4243_v13 }
 0x5d5   :  { %1731 = vmatprep.subr.bf16.mxu0 %v4248_v15 }
 0x5d6   :  { %1691 = vmatpush1.bf16.msra.mxu1 %v4253_v8 }
 0x5d7   :  { %1692 = vmatprep.subr.bf16.mxu1 %v4258_v10 }
 0x5d8   :  { %1732 = vmatpush1.bf16.msra.mxu0 %v4263_v9 }
 0x5d9   :  { %1733 = vmatprep.subr.bf16.mxu0 %v4268_v11 }
 0x5da   :  { %1693 = vmatpush1.bf16.msra.mxu1 %v4273_v4 }
 0x5db   :  { %1825 = vmatprep.subr.bf16.mxu1 %v4124_v44 }
 0x5dc   :  { %1734 = vmatpush1.bf16.msra.mxu0 %v4279_v5 }
 0x5dd   :  { %1866 = vmatprep.subr.bf16.mxu0 %v4137_v51 }
 0x67d   :  { %v1587_v6 = vpop.f32.mrf.mxu1 }
 0x67e   :  { %v1635_v7 = vadd.f32 %v1587_v6, %v4325_v2 }
 0x67f   :  { %v1628_v53 = vpop.f32.mrf.mxu0  ;;  %v1589_v55 = vpop.f32.mrf.mxu1 }
 0x680   :  { %v2971_v60 = vmul.f32 -1.442695, %v1635_v7  ;;  %v1636_v59 = vadd.f32 %v1589_v55, %v4328_v3  ;;  %v1637_v45 = vadd.f32 %v1628_v53, %v4334_v36 }
 0x681   :  { %v1630_v33 = vpop.f32.mrf.mxu0  ;;  %v1591_v32 = vpop.f32.mrf.mxu1 }
 0x682   :  { %3354 = vpow2.f32 %v2971_v60  ;;  %v2972_v35 = vmul.f32 -1.442695, %v1636_v59  ;;  %v2973_v54 = vmul.f32 -1.442695, %v1637_v45  ;;  %v1638_v50 = vadd.f32 %v1630_v33, %v4339_v56 }
 0x683   :  { %v1632_v62 = vpop.f32.mrf.mxu0  ;;  %v1592_v61 = vpop.f32.mrf.mxu1  ;;  %v1665_v45 = vrot.slane %v4118_v47, 5  ;;  %v1811_v56 = vrot.slane %v4111_v63, 3 }
 0x684   :  { %3356 = vpow2.f32 %v2972_v35 }
 0x685   :  { %v1633_v40 = vpop.f32.mrf.mxu0  ;;  %3358 = vpow2.f32 %v2973_v54  ;;  %v1666_v54 = vrot.slane %v4120_v52, 5 }
 0x686   :  { %3360 = vtanh.f32 %v1638_v50  ;;  %v4382_v50 = vadd.f32 %v1665_v45, %v4104_v39 }
 0x688   :  { %4671 = vst [vmem:[#allocation23_spill] sm:$0xff] %v4382_v50 }
 0x68f   :  { %v3355_v0 = vpop.eup %3354 }
 0x690   :  { %v1648_v1 = vadd.f32 1.0, %v3355_v0 }
 0x691   :  { %v3357_v6 = vpop.eup %3356 }
 0x692   :  { %3362 = vrcp.f32 %v1648_v1  ;;  %v1649_v7 = vadd.f32 1.0, %v3357_v6  ;;  %v3359_v55 = vpop.eup %3358 }
 0x693   :  { %v3361_v60 = vpop.eup %3360  ;;  %v1650_v32 = vadd.f32 1.0, %v3359_v55 }
 0x694   :  { %3364 = vrcp.f32 %v1649_v7  ;;  %v4385_v7 = vadd.f32 %v1666_v54, %v4106_v43 }
 0x695   :  { %3366 = vrcp.f32 %v1650_v32 }
 0x696   :  { %4672 = vst [vmem:[#allocation24_spill] sm:$0xff] %v4385_v7 }
 0x69f   :  { %v3363_v59 = vpop.eup %3362 }
 0x6a0   :  { %v1659_v35 = vmul.f32 %v3363_v59, %v3361_v60 }
 0x6a1   :  { %v3365_v57 = vpop.eup %3364 }
 0x6a2   :  { %v1658_v53 = vmul.f32 0.0, %v3365_v57  ;;  %v3367_v33 = vpop.eup %3366 }
 0x6a4   :  { %v4342_v62 = vadd.f32 %v1659_v35, %v1658_v53 }
 0x6a6   :  { %3368 = vtanh.f32 %v4342_v62 }
 0x6b3   :  { %v3369_v61 = vpop.eup %3368 }
 0x6b4   :  { %v1662_v40 = vmul.f32 %v3369_v61, %v3367_v33  ;;  %v1667_v61 = vrot.slane %v4108_v37, 5 }
 0x6b6   :  { %1663 = vst [vmem:[#allocation4] sm:$0x1] %v1662_v40  ;;  %1664 = vst [vmem:[#allocation4 + $0xf] sm:$0x1] %v1662_v40  ;;  %v1677_v58 = vpack.c.bf16 %v1662_v40, %v1662_v40  ;;  %v4391_v54 = vadd.f32 %v1667_v61, %v4114_v38 }
 0x6b8   :  { %1711 = vmatmul.mubr.bf16.vlgmr.msra.gmra.mxu1 %v1677_v58  ;;  %1752 = vmatmul.mubr.bf16.vlgmr.msra.gmra.mxu0 %v1677_v58  ;;  %4673 = vst [vmem:[#allocation25_spill] sm:$0xff] %v4391_v54 }
 0x6b9   :  { %1826 = vmatpush1.bf16.msra.mxu1 %v4128_v49  ;;  %1867 = vmatpush1.bf16.msra.mxu0 %v4143_v28 }
 0x6ba   :  { %1827 = vmatprep.subr.bf16.mxu1 %v4132_v48  ;;  %1868 = vmatprep.subr.bf16.mxu0 %v4147_v30 }
 0x6bb   :  { %1857 = vmatprep.mubr.bf16.mxu1 %v4662_v34  ;;  %1898 = vmatprep.mubr.bf16.mxu0 %v4662_v34  ;;  %v1668_v34 = vrot.slane %v4111_v63, 5 }
 0x6bd   :  { %1828 = vmatpush1.bf16.msra.mxu1 %v4152_v41  ;;  %1869 = vmatpush1.bf16.msra.mxu0 %v4163_v29 }
 0x6be   :  { %1829 = vmatprep.subr.bf16.mxu1 %v4158_v46  ;;  %1870 = vmatprep.subr.bf16.mxu0 %v4168_v24 }
 0x6c1   :  { %1830 = vmatpush1.bf16.msra.mxu1 %v4173_v26  ;;  %1871 = vmatpush1.bf16.msra.mxu0 %v4183_v25 }
 0x6c2   :  { %1831 = vmatprep.subr.bf16.mxu1 %v4178_v31  ;;  %1872 = vmatprep.subr.bf16.mxu0 %v4188_v27 }
 0x6c5   :  { %1832 = vmatpush1.bf16.msra.mxu1 %v4193_v20  ;;  %1873 = vmatpush1.bf16.msra.mxu0 %v4203_v21 }
 0x6c6   :  { %1833 = vmatprep.subr.bf16.mxu1 %v4198_v22  ;;  %1874 = vmatprep.subr.bf16.mxu0 %v4208_v23 }
 0x6c9   :  { %1834 = vmatpush1.bf16.msra.mxu1 %v4213_v16  ;;  %1875 = vmatpush1.bf16.msra.mxu0 %v4223_v17 }
 0x6ca   :  { %1835 = vmatprep.subr.bf16.mxu1 %v4218_v18  ;;  %1876 = vmatprep.subr.bf16.mxu0 %v4228_v19 }
 0x6cd   :  { %1836 = vmatpush1.bf16.msra.mxu1 %v4233_v12  ;;  %1877 = vmatpush1.bf16.msra.mxu0 %v4243_v13 }
 0x6ce   :  { %1837 = vmatprep.subr.bf16.mxu1 %v4238_v14  ;;  %1878 = vmatprep.subr.bf16.mxu0 %v4248_v15 }
 0x6d1   :  { %1838 = vmatpush1.bf16.msra.mxu1 %v4253_v8  ;;  %1879 = vmatpush1.bf16.msra.mxu0 %v4263_v9 }
 0x6d2   :  { %1839 = vmatprep.subr.bf16.mxu1 %v4258_v10  ;;  %1880 = vmatprep.subr.bf16.mxu0 %v4268_v11 }
 0x6d5   :  { %1840 = vmatpush1.bf16.msra.mxu1 %v4273_v4  ;;  %1881 = vmatpush1.bf16.msra.mxu0 %v4279_v5 }
 0x6d6   :  { %1971 = vmatprep.subr.bf16.mxu1 %v4124_v44  ;;  %2012 = vmatprep.subr.bf16.mxu0 %v4137_v51 }
 0x778   :  { %v1712_v0 = vpop.f32.mrf.mxu1  ;;  %v1753_v1 = vpop.f32.mrf.mxu0 }
 0x779   :  { %v1764_v6 = vrot.slane %v1712_v0, 7  ;;  %v1766_v0 = vrot.slane %v1753_v1, 7 }
 0x77a   :  { %v1714_v55 = vpop.f32.mrf.mxu1  ;;  %v1755_v60 = vpop.f32.mrf.mxu0 }
 0x77b   :  { %v1772_v59 = vadd.f32 %v1764_v6, %v4382_v50  ;;  %v1765_v57 = vrot.slane %v1714_v55, 7  ;;  %v1774_v6 = vadd.f32 %v1766_v0, %v4391_v54  ;;  %v4396_v55 = vadd.f32 %v1668_v34, %v4116_v42 }
 0x77c   :  { %v1716_v32 = vpop.f32.mrf.mxu1  ;;  %v1757_v53 = vpop.f32.mrf.mxu0 }
 0x77d   :  { %v2974_v35 = vmul.f32 -1.442695, %v1772_v59  ;;  %v1773_v33 = vadd.f32 %v1765_v57, %v4385_v7  ;;  %4674 = vst [vmem:[#allocation26_spill] sm:$0xff] %v4396_v55  ;;  %v1767_v59 = vrot.slane %v1755_v60, 7  ;;  %v2976_v57 = vmul.f32 -1.442695, %v1774_v6 }
 0x77e   :  { %v1717_v40 = vpop.f32.mrf.mxu1  ;;  %v1758_v58 = vpop.f32.mrf.mxu0 }
 0x77f   :  { %3370 = vpow2.f32 %v2974_v35  ;;  %v2975_v45 = vmul.f32 -1.442695, %v1773_v33  ;;  %v1775_v53 = vadd.f32 %v1767_v59, %v4396_v55  ;;  %v1810_v55 = vrot.slane %v4108_v37, 3 }
 0x781   :  { %3372 = vpow2.f32 %v2975_v45  ;;  %v1796_v45 = vrot.slane %v4342_v62, 7  ;;  %v4675_v62 = vmov 0  }
 0x782   :  { %3374 = vpow2.f32 %v2976_v57 }
 0x78c   :  { %v3371_v32 = vpop.eup %3370 }
 0x78d   :  { %v1785_v40 = vadd.f32 1.0, %v3371_v32 }
 0x78e   :  { %v3373_v35 = vpop.eup %3372 }
 0x78f   :  { %3376 = vrcp.f32 %v1785_v40  ;;  %v1786_v33 = vadd.f32 1.0, %v3373_v35  ;;  %v3375_v1 = vpop.eup %3374 }
 0x790   :  { %3378 = vtanh.f32 %v1775_v53  ;;  %v1787_v34 = vadd.f32 1.0, %v3375_v1 }
 0x791   :  { %3380 = vrcp.f32 %v1786_v33  ;;  %v1809_v33 = vrot.slane %v4120_v52, 3 }
 0x792   :  { %3382 = vrcp.f32 %v1787_v34 }
 0x79c   :  { %v3377_v61 = vpop.eup %3376 }
 0x79d   :  { %v3379_v58 = vpop.eup %3378 }
 0x79e   :  { %v3381_v0 = vpop.eup %3380  ;;  %v1799_v60 = vmul.f32 %v3379_v58, %v3377_v61 }
 0x79f   :  { %v1798_v54 = vmul.f32 %v3381_v0, %v1796_v45  ;;  %v3383_v59 = vpop.eup %3382  ;;  %v4443_v0 = vadd.f32 %v1809_v33, %v4106_v43  ;;  %v4449_v33 = vadd.f32 %v1810_v55, %v4114_v38 }
 0x7a1   :  { %v4400_v6 = vadd.f32 %v1799_v60, %v1798_v54  ;;  %v1808_v54 = vrot.slane %v4118_v47, 3  ;;  %4676 = vst [vmem:[#allocation27_spill] sm:$0xff] %v4449_v33 }
 0x7a3   :  { %3384 = vtanh.f32 %v4400_v6  ;;  %v4440_v1 = vadd.f32 %v1808_v54, %v4104_v39 }
 0x7b0   :  { %v3385_v57 = vpop.eup %3384 }
 0x7b1   :  { %v1802_v32 = vmul.f32 %v3385_v57, %v3383_v59 }
 0x7b3   :  { %v1804_v40 = vrot.slane %v1802_v32, 1  ;;  %v1820_v53 = vpack.c.bf16 %v1802_v32, %v1802_v32 }
 0x7b5   :  { %1806 = vst [vmem:[#allocation4 + $0x1] sm:$0x1] %v1804_v40  ;;  %1807 = vst [vmem:[#allocation4 + $0xe] sm:$0x1] %v1804_v40  ;;  %v1822_v35 = vshrl.u32 %v1820_v53, 16 }
 0x7b7   :  { %1858 = vmatmul.mubr.bf16.vlgmr.msra.gmra.mxu1 %v1822_v35  ;;  %1899 = vmatmul.mubr.bf16.vlgmr.msra.gmra.mxu0 %v1822_v35 }
 0x7b8   :  { %1972 = vmatpush1.bf16.msra.mxu1 %v4128_v49  ;;  %2013 = vmatpush1.bf16.msra.mxu0 %v4143_v28 }
 0x7b9   :  { %1973 = vmatprep.subr.bf16.mxu1 %v4132_v48  ;;  %2014 = vmatprep.subr.bf16.mxu0 %v4147_v30 }
 0x7ba   :  { %2003 = vmatprep.mubr.bf16.mxu1 %v4675_v62  ;;  %2044 = vmatprep.mubr.bf16.mxu0 %v4675_v62 }
 0x7bc   :  { %1974 = vmatpush1.bf16.msra.mxu1 %v4152_v41  ;;  %2015 = vmatpush1.bf16.msra.mxu0 %v4163_v29 }
 0x7bd   :  { %1975 = vmatprep.subr.bf16.mxu1 %v4158_v46  ;;  %2016 = vmatprep.subr.bf16.mxu0 %v4168_v24 }
 0x7c0   :  { %1976 = vmatpush1.bf16.msra.mxu1 %v4173_v26  ;;  %2017 = vmatpush1.bf16.msra.mxu0 %v4183_v25 }
 0x7c1   :  { %1977 = vmatprep.subr.bf16.mxu1 %v4178_v31  ;;  %2018 = vmatprep.subr.bf16.mxu0 %v4188_v27 }
 0x7c4   :  { %1978 = vmatpush1.bf16.msra.mxu1 %v4193_v20  ;;  %2019 = vmatpush1.bf16.msra.mxu0 %v4203_v21 }
 0x7c5   :  { %1979 = vmatprep.subr.bf16.mxu1 %v4198_v22  ;;  %2020 = vmatprep.subr.bf16.mxu0 %v4208_v23 }
 0x7c8   :  { %1980 = vmatpush1.bf16.msra.mxu1 %v4213_v16  ;;  %2021 = vmatpush1.bf16.msra.mxu0 %v4223_v17 }
 0x7c9   :  { %1981 = vmatprep.subr.bf16.mxu1 %v4218_v18  ;;  %2022 = vmatprep.subr.bf16.mxu0 %v4228_v19 }
 0x7cc   :  { %1982 = vmatpush1.bf16.msra.mxu1 %v4233_v12  ;;  %2023 = vmatpush1.bf16.msra.mxu0 %v4243_v13 }
 0x7cd   :  { %1983 = vmatprep.subr.bf16.mxu1 %v4238_v14  ;;  %2024 = vmatprep.subr.bf16.mxu0 %v4248_v15 }
 0x7d0   :  { %1984 = vmatpush1.bf16.msra.mxu1 %v4253_v8  ;;  %2025 = vmatpush1.bf16.msra.mxu0 %v4263_v9 }
 0x7d1   :  { %1985 = vmatprep.subr.bf16.mxu1 %v4258_v10  ;;  %2026 = vmatprep.subr.bf16.mxu0 %v4268_v11 }
 0x7d4   :  { %1986 = vmatpush1.bf16.msra.mxu1 %v4273_v4  ;;  %2027 = vmatpush1.bf16.msra.mxu0 %v4279_v5 }
 0x7d5   :  { %2107 = vmatprep.subr.bf16.mxu1 %v4124_v44  ;;  %2148 = vmatprep.subr.bf16.mxu0 %v4137_v51 }
 0x877   :  { %v1859_v61 = vpop.f32.mrf.mxu1  ;;  %v1900_v58 = vpop.f32.mrf.mxu0 }
 0x878   :  { %v1911_v45 = vrot.slane %v1859_v61, 6  ;;  %v1913_v61 = vrot.slane %v1900_v58, 6 }
 0x879   :  { %v1861_v34 = vpop.f32.mrf.mxu1  ;;  %v1902_v60 = vpop.f32.mrf.mxu0 }
 0x87a   :  { %v1919_v59 = vadd.f32 %v1911_v45, %v4440_v1  ;;  %v1912_v57 = vrot.slane %v1861_v34, 6  ;;  %v1921_v45 = vadd.f32 %v1913_v61, %v4449_v33  ;;  %v4454_v34 = vadd.f32 %v1811_v56, %v4116_v42 }
 0x87b   :  { %v1863_v32 = vpop.f32.mrf.mxu1  ;;  %v1904_v40 = vpop.f32.mrf.mxu0 }
 0x87c   :  { %v2977_v53 = vmul.f32 -1.442695, %v1919_v59  ;;  %v1920_v35 = vadd.f32 %v1912_v57, %v4443_v0  ;;  %v1914_v59 = vrot.slane %v1902_v60, 6  ;;  %v2979_v57 = vmul.f32 -1.442695, %v1921_v45 }
 0x87d   :  { %v1864_v54 = vpop.f32.mrf.mxu1  ;;  %v1905_v7 = vpop.f32.mrf.mxu0 }
 0x87e   :  { %3386 = vpow2.f32 %v2977_v53  ;;  %v2978_v50 = vmul.f32 -1.442695, %v1920_v35  ;;  %v1922_v40 = vadd.f32 %v1914_v59, %v4454_v34  ;;  %v1943_v54 = vrot.slane %v4400_v6, 7 }
 0x87f   :  { %v1955_v6 = vrot.slane %v4118_v47, 1 }
 0x880   :  { %3388 = vpow2.f32 %v2978_v50 }
 0x881   :  { %3390 = vpow2.f32 %v2979_v57 }
 0x88b   :  { %v3387_v32 = vpop.eup %3386 }
 0x88c   :  { %v1932_v7 = vadd.f32 1.0, %v3387_v32 }
 0x88d   :  { %v3389_v53 = vpop.eup %3388 }
 0x88e   :  { %3392 = vrcp.f32 %v1932_v7  ;;  %v1933_v50 = vadd.f32 1.0, %v3389_v53  ;;  %v3391_v55 = vpop.eup %3390 }
 0x88f   :  { %3394 = vtanh.f32 %v1922_v40  ;;  %v1934_v56 = vadd.f32 1.0, %v3391_v55 }
 0x890   :  { %3396 = vrcp.f32 %v1933_v50  ;;  %v4498_v50 = vadd.f32 %v1955_v6, %v4104_v39 }
 0x891   :  { %3398 = vrcp.f32 %v1934_v56 }
 0x89b   :  { %v3393_v58 = vpop.eup %3392 }
 0x89c   :  { %v3395_v35 = vpop.eup %3394 }
 0x89d   :  { %v3397_v61 = vpop.eup %3396  ;;  %v1946_v60 = vmul.f32 %v3395_v35, %v3393_v58 }
 0x89e   :  { %v1945_v33 = vmul.f32 %v3397_v61, %v1943_v54  ;;  %v3399_v59 = vpop.eup %3398 }
 0x8a0   :  { %v4458_v45 = vadd.f32 %v1946_v60, %v1945_v33  ;;  %v1956_v33 = vrot.slane %v4120_v52, 1  ;;  %v1957_v52 = vrot.slane %v4108_v37, 1 }
 0x8a2   :  { %3400 = vtanh.f32 %v4458_v45  ;;  %v4501_v54 = vadd.f32 %v1956_v33, %v4106_v43  ;;  %v4507_v43 = vadd.f32 %v1957_v52, %v4114_v38  ;;  %v1958_v33 = vrot.slane %v4111_v63, 1 }
 0x8af   :  { %v3401_v57 = vpop.eup %3400 }
 0x8b0   :  { %v1949_v32 = vmul.f32 %v3401_v57, %v3399_v59 }
 0x8b2   :  { %v1951_v7 = vrot.slane %v1949_v32, 2  ;;  %v1967_v40 = vpack.c.bf16 %v1949_v32, %v1949_v32 }
 0x8b4   :  { %1953 = vst [vmem:[#allocation4 + $0x2] sm:$0x1] %v1951_v7  ;;  %1954 = vst [vmem:[#allocation4 + $0xd] sm:$0x1] %v1951_v7  ;;  %v1969_v53 = vrot.slane %v1967_v40, 1 }
 0x8b6   :  { %2004 = vmatmul.mubr.bf16.vlgmr.msra.gmra.mxu1 %v1969_v53  ;;  %2045 = vmatmul.mubr.bf16.vlgmr.msra.gmra.mxu0 %v1969_v53 }
 0x8b7   :  { %2108 = vmatpush1.bf16.msra.mxu1 %v4128_v49  ;;  %2149 = vmatpush1.bf16.msra.mxu0 %v4143_v28 }
 0x8b8   :  { %2109 = vmatprep.subr.bf16.mxu1 %v4132_v48  ;;  %2150 = vmatprep.subr.bf16.mxu0 %v4147_v30 }
 0x8b9   :  { %2139 = vmatprep.mubr.bf16.mxu1 %v4675_v62  ;;  %2180 = vmatprep.mubr.bf16.mxu0 %v4675_v62 }
 0x8bb   :  { %2110 = vmatpush1.bf16.msra.mxu1 %v4152_v41  ;;  %2151 = vmatpush1.bf16.msra.mxu0 %v4163_v29 }
 0x8bc   :  { %2111 = vmatprep.subr.bf16.mxu1 %v4158_v46  ;;  %2152 = vmatprep.subr.bf16.mxu0 %v4168_v24 }
 0x8bf   :  { %2112 = vmatpush1.bf16.msra.mxu1 %v4173_v26  ;;  %2153 = vmatpush1.bf16.msra.mxu0 %v4183_v25 }
 0x8c0   :  { %2113 = vmatprep.subr.bf16.mxu1 %v4178_v31  ;;  %2154 = vmatprep.subr.bf16.mxu0 %v4188_v27 }
 0x8c3   :  { %2114 = vmatpush1.bf16.msra.mxu1 %v4193_v20  ;;  %2155 = vmatpush1.bf16.msra.mxu0 %v4203_v21 }
 0x8c4   :  { %2115 = vmatprep.subr.bf16.mxu1 %v4198_v22  ;;  %2156 = vmatprep.subr.bf16.mxu0 %v4208_v23 }
 0x8c7   :  { %2116 = vmatpush1.bf16.msra.mxu1 %v4213_v16  ;;  %2157 = vmatpush1.bf16.msra.mxu0 %v4223_v17 }
 0x8c8   :  { %2117 = vmatprep.subr.bf16.mxu1 %v4218_v18  ;;  %2158 = vmatprep.subr.bf16.mxu0 %v4228_v19 }
 0x8cb   :  { %2118 = vmatpush1.bf16.msra.mxu1 %v4233_v12  ;;  %2159 = vmatpush1.bf16.msra.mxu0 %v4243_v13 }
 0x8cc   :  { %2119 = vmatprep.subr.bf16.mxu1 %v4238_v14  ;;  %2160 = vmatprep.subr.bf16.mxu0 %v4248_v15 }
 0x8cf   :  { %2120 = vmatpush1.bf16.msra.mxu1 %v4253_v8  ;;  %2161 = vmatpush1.bf16.msra.mxu0 %v4263_v9 }
 0x8d0   :  { %2121 = vmatprep.subr.bf16.mxu1 %v4258_v10  ;;  %2162 = vmatprep.subr.bf16.mxu0 %v4268_v11 }
 0x8d3   :  { %2122 = vmatpush1.bf16.msra.mxu1 %v4273_v4  ;;  %2163 = vmatpush1.bf16.msra.mxu0 %v4279_v5 }
 0x8d4   :  { %2241 = vmatprep.subr.bf16.mxu1 %v4124_v44  ;;  %2282 = vmatprep.subr.bf16.mxu0 %v4137_v51 }
 0x976   :  { %v2005_v55 = vpop.f32.mrf.mxu1  ;;  %v2046_v58 = vpop.f32.mrf.mxu0 }
 0x977   :  { %v2057_v35 = vrot.slane %v2005_v55, 5  ;;  %v2059_v6 = vrot.slane %v2046_v58, 5 }
 0x978   :  { %v2007_v61 = vpop.f32.mrf.mxu1  ;;  %v2048_v56 = vpop.f32.mrf.mxu0 }
 0x979   :  { %v2065_v60 = vadd.f32 %v2057_v35, %v4498_v50  ;;  %v2058_v59 = vrot.slane %v2007_v61, 5  ;;  %v2067_v55 = vadd.f32 %v2059_v6, %v4507_v43  ;;  %v4512_v35 = vadd.f32 %v1958_v33, %v4116_v42 }
 0x97a   :  { %v2009_v57 = vpop.f32.mrf.mxu1  ;;  %v2050_v32 = vpop.f32.mrf.mxu0  ;;  %v2060_v61 = vrot.slane %v2048_v56, 5 }
 0x97b   :  { %v2980_v7 = vmul.f32 -1.442695, %v2065_v60  ;;  %v2066_v47 = vadd.f32 %v2058_v59, %v4501_v54  ;;  %v2982_v60 = vmul.f32 -1.442695, %v2067_v55 }
 0x97c   :  { %v2010_v39 = vpop.f32.mrf.mxu1  ;;  %v2051_v40 = vpop.f32.mrf.mxu0  ;;  %v2068_v37 = vadd.f32 %v2060_v61, %v4512_v35 }
 0x97d   :  { %3402 = vpow2.f32 %v2980_v7  ;;  %v2981_v53 = vmul.f32 -1.442695, %v2066_v47  ;;  %v2089_v47 = vrot.slane %v4458_v45, 7 }
 0x97f   :  { %3404 = vpow2.f32 %v2981_v53 }
 0x980   :  { %3406 = vpow2.f32 %v2982_v60 }
 0x98a   :  { %v3403_v59 = vpop.eup %3402 }
 0x98b   :  { %v2078_v57 = vadd.f32 1.0, %v3403_v59 }
 0x98c   :  { %v3405_v32 = vpop.eup %3404 }
 0x98d   :  { %3408 = vrcp.f32 %v2078_v57  ;;  %v2079_v7 = vadd.f32 1.0, %v3405_v32  ;;  %v3407_v38 = vpop.eup %3406 }
 0x98e   :  { %3410 = vtanh.f32 %v2068_v37  ;;  %v2080_v42 = vadd.f32 1.0, %v3407_v38 }
 0x98f   :  { %3412 = vrcp.f32 %v2079_v7 }
 0x990   :  { %3414 = vrcp.f32 %v2080_v42 }
 0x99a   :  { %v3409_v58 = vpop.eup %3408 }
 0x99b   :  { %v3411_v63 = vpop.eup %3410 }
 0x99c   :  { %v3413_v52 = vpop.eup %3412  ;;  %v2092_v56 = vmul.f32 %v3411_v63, %v3409_v58 }
 0x99d   :  { %v2091_v39 = vmul.f32 %v3413_v52, %v2089_v47  ;;  %v3415_v53 = vpop.eup %3414 }
 0x99f   :  { %v4516_v40 = vadd.f32 %v2092_v56, %v2091_v39 }
 0x9a1   :  { %3416 = vtanh.f32 %v4516_v40 }
 0x9ae   :  { %v3417_v6 = vpop.eup %3416 }
 0x9af   :  { %v2095_v33 = vmul.f32 %v3417_v6, %v3415_v53 }
 0x9b1   :  { %v2097_v55 = vrot.slane %v2095_v33, 3  ;;  %v2101_v61 = vpack.c.bf16 %v2095_v33, %v2095_v33 }
 0x9b3   :  { %2099 = vst [vmem:[#allocation4 + $0x3] sm:$0x1] %v2097_v55  ;;  %2100 = vst [vmem:[#allocation4 + $0xc] sm:$0x1] %v2097_v55  ;;  %v2103_v60 = vshrl.u32 %v2101_v61, 16 }
 0x9b5   :  { %v2105_v59 = vrot.slane %v2103_v60, 1 }
 0x9b7   :  { %2140 = vmatmul.mubr.bf16.vlgmr.msra.gmra.mxu1 %v2105_v59  ;;  %2181 = vmatmul.mubr.bf16.vlgmr.msra.gmra.mxu0 %v2105_v59  ;;  %v4677_v59 = vld [vmem:[#allocation22_spill] sm:$0xff] }
 0x9b8   :  { %2242 = vmatpush1.bf16.msra.mxu1 %v4128_v49  ;;  %2283 = vmatpush1.bf16.msra.mxu0 %v4143_v28 }
 0x9b9   :  { %2243 = vmatprep.subr.bf16.mxu1 %v4132_v48  ;;  %2284 = vmatprep.subr.bf16.mxu0 %v4147_v30 }
 0x9ba   :  { %2273 = vmatprep.mubr.bf16.mxu1 %v4675_v62  ;;  %2314 = vmatprep.mubr.bf16.mxu0 %v4675_v62 }
 0x9bc   :  { %2244 = vmatpush1.bf16.msra.mxu1 %v4152_v41  ;;  %2285 = vmatpush1.bf16.msra.mxu0 %v4163_v29 }
 0x9bd   :  { %2245 = vmatprep.subr.bf16.mxu1 %v4158_v46  ;;  %2286 = vmatprep.subr.bf16.mxu0 %v4168_v24 }
 0x9c0   :  { %2246 = vmatpush1.bf16.msra.mxu1 %v4173_v26  ;;  %2287 = vmatpush1.bf16.msra.mxu0 %v4183_v25 }
 0x9c1   :  { %2247 = vmatprep.subr.bf16.mxu1 %v4178_v31  ;;  %2288 = vmatprep.subr.bf16.mxu0 %v4188_v27 }
 0x9c4   :  { %2248 = vmatpush1.bf16.msra.mxu1 %v4193_v20  ;;  %2289 = vmatpush1.bf16.msra.mxu0 %v4203_v21 }
 0x9c5   :  { %2249 = vmatprep.subr.bf16.mxu1 %v4198_v22  ;;  %2290 = vmatprep.subr.bf16.mxu0 %v4208_v23 }
 0x9c8   :  { %2250 = vmatpush1.bf16.msra.mxu1 %v4213_v16  ;;  %2291 = vmatpush1.bf16.msra.mxu0 %v4223_v17 }
 0x9c9   :  { %2251 = vmatprep.subr.bf16.mxu1 %v4218_v18  ;;  %2292 = vmatprep.subr.bf16.mxu0 %v4228_v19 }
 0x9cc   :  { %2252 = vmatpush1.bf16.msra.mxu1 %v4233_v12  ;;  %2293 = vmatpush1.bf16.msra.mxu0 %v4243_v13 }
 0x9cd   :  { %2253 = vmatprep.subr.bf16.mxu1 %v4238_v14  ;;  %2294 = vmatprep.subr.bf16.mxu0 %v4248_v15 }
 0x9d0   :  { %2254 = vmatpush1.bf16.msra.mxu1 %v4253_v8  ;;  %2295 = vmatpush1.bf16.msra.mxu0 %v4263_v9 }
 0x9d1   :  { %2255 = vmatprep.subr.bf16.mxu1 %v4258_v10  ;;  %2296 = vmatprep.subr.bf16.mxu0 %v4268_v11 }
 0x9d4   :  { %2256 = vmatpush1.bf16.msra.mxu1 %v4273_v4  ;;  %2297 = vmatpush1.bf16.msra.mxu0 %v4279_v5 }
 0x9d5   :  { %2377 = vmatprep.subr.bf16.mxu1 %v4124_v44  ;;  %2418 = vmatprep.subr.bf16.mxu0 %v4137_v51 }
 0xa77   :  { %v2141_v45 = vpop.f32.mrf.mxu1  ;;  %v2182_v37 = vpop.f32.mrf.mxu0 }
 0xa78   :  { %v2193_v57 = vrot.slane %v2141_v45, 4  ;;  %v2195_v6 = vrot.slane %v2182_v37, 4 }
 0xa79   :  { %v2143_v32 = vpop.f32.mrf.mxu1  ;;  %v2184_v7 = vpop.f32.mrf.mxu0 }
 0xa7a   :  { %v2201_v38 = vadd.f32 %v2193_v57, %v4325_v2  ;;  %v2194_v58 = vrot.slane %v2143_v32, 4  ;;  %v2203_v33 = vadd.f32 %v2195_v6, %v4334_v36  ;;  %v2196_v55 = vrot.slane %v2184_v7, 4 }
 0xa7b   :  { %v2145_v63 = vpop.f32.mrf.mxu1  ;;  %v2186_v47 = vpop.f32.mrf.mxu0 }
 0xa7c   :  { %v2983_v52 = vmul.f32 -1.442695, %v2201_v38  ;;  %v2202_v42 = vadd.f32 %v2194_v58, %v4328_v3  ;;  %v2985_v61 = vmul.f32 -1.442695, %v2203_v33  ;;  %v2204_v45 = vadd.f32 %v2196_v55, %v4677_v59 }
 0xa7d   :  { %v2146_v39 = vpop.f32.mrf.mxu1  ;;  %v2187_v56 = vpop.f32.mrf.mxu0  ;;  %v2225_v63 = vrot.slane %v4516_v40, 7 }
 0xa7e   :  { %3418 = vpow2.f32 %v2983_v52  ;;  %v2984_v53 = vmul.f32 -1.442695, %v2202_v42 }
 0xa80   :  { %3420 = vpow2.f32 %v2984_v53 }
 0xa81   :  { %3422 = vpow2.f32 %v2985_v61 }
 0xa8b   :  { %v3419_v60 = vpop.eup %3418 }
 0xa8c   :  { %v2214_v2 = vadd.f32 1.0, %v3419_v60 }
 0xa8d   :  { %v3421_v57 = vpop.eup %3420 }
 0xa8e   :  { %3424 = vrcp.f32 %v2214_v2  ;;  %v2215_v32 = vadd.f32 1.0, %v3421_v57  ;;  %v3423_v3 = vpop.eup %3422 }
 0xa8f   :  { %3426 = vtanh.f32 %v2204_v45  ;;  %v2216_v47 = vadd.f32 1.0, %v3423_v3  ;;  %v4678_v45 = vld [vmem:[#allocation23_spill] sm:$0xff] }
 0xa90   :  { %3428 = vrcp.f32 %v2215_v32 }
 0xa91   :  { %3430 = vrcp.f32 %v2216_v47 }
 0xa9b   :  { %v3425_v38 = vpop.eup %3424 }
 0xa9c   :  { %v3427_v58 = vpop.eup %3426 }
 0xa9d   :  { %v3429_v37 = vpop.eup %3428  ;;  %v2228_v7 = vmul.f32 %v3427_v58, %v3425_v38  ;;  %v4679_v58 = vld [vmem:[#allocation24_spill] sm:$0xff] }
 0xa9e   :  { %v2227_v36 = vmul.f32 %v3429_v37, %v2225_v63  ;;  %v3431_v42 = vpop.eup %3430 }
 0xaa0   :  { %v4558_v52 = vadd.f32 %v2228_v7, %v2227_v36 }
 0xaa2   :  { %3432 = vtanh.f32 %v4558_v52 }
 0xaaf   :  { %v3433_v39 = vpop.eup %3432 }
 0xab0   :  { %v2231_v56 = vmul.f32 %v3433_v39, %v3431_v42 }
 0xab2   :  { %v2233_v53 = vrot.slane %v2231_v56, 4  ;;  %v2237_v6 = vpack.c.bf16 %v2231_v56, %v2231_v56 }
 0xab4   :  { %2235 = vst [vmem:[#allocation4 + $0x4] sm:$0x1] %v2233_v53  ;;  %2236 = vst [vmem:[#allocation4 + $0xb] sm:$0x1] %v2233_v53  ;;  %v2239_v33 = vrot.slane %v2237_v6, 2  ;;  %v4681_v53 = vld [vmem:[#allocation26_spill] sm:$0xff] }
 0xab6   :  { %2274 = vmatmul.mubr.bf16.vlgmr.msra.gmra.mxu1 %v2239_v33  ;;  %2315 = vmatmul.mubr.bf16.vlgmr.msra.gmra.mxu0 %v2239_v33 }
 0xab7   :  { %2378 = vmatpush1.bf16.msra.mxu1 %v4128_v49  ;;  %2419 = vmatpush1.bf16.msra.mxu0 %v4143_v28 }
 0xab8   :  { %2379 = vmatprep.subr.bf16.mxu1 %v4132_v48  ;;  %2420 = vmatprep.subr.bf16.mxu0 %v4147_v30 }
 0xab9   :  { %2409 = vmatprep.mubr.bf16.mxu1 %v4675_v62  ;;  %2450 = vmatprep.mubr.bf16.mxu0 %v4675_v62 }
 0xabb   :  { %2380 = vmatpush1.bf16.msra.mxu1 %v4152_v41  ;;  %2421 = vmatpush1.bf16.msra.mxu0 %v4163_v29 }
 0xabc   :  { %2381 = vmatprep.subr.bf16.mxu1 %v4158_v46  ;;  %2422 = vmatprep.subr.bf16.mxu0 %v4168_v24 }
 0xabf   :  { %2382 = vmatpush1.bf16.msra.mxu1 %v4173_v26  ;;  %2423 = vmatpush1.bf16.msra.mxu0 %v4183_v25 }
 0xac0   :  { %2383 = vmatprep.subr.bf16.mxu1 %v4178_v31  ;;  %2424 = vmatprep.subr.bf16.mxu0 %v4188_v27 }
 0xac3   :  { %2384 = vmatpush1.bf16.msra.mxu1 %v4193_v20  ;;  %2425 = vmatpush1.bf16.msra.mxu0 %v4203_v21 }
 0xac4   :  { %2385 = vmatprep.subr.bf16.mxu1 %v4198_v22  ;;  %2426 = vmatprep.subr.bf16.mxu0 %v4208_v23 }
 0xac7   :  { %2386 = vmatpush1.bf16.msra.mxu1 %v4213_v16  ;;  %2427 = vmatpush1.bf16.msra.mxu0 %v4223_v17 }
 0xac8   :  { %2387 = vmatprep.subr.bf16.mxu1 %v4218_v18  ;;  %2428 = vmatprep.subr.bf16.mxu0 %v4228_v19 }
 0xacb   :  { %2388 = vmatpush1.bf16.msra.mxu1 %v4233_v12  ;;  %2429 = vmatpush1.bf16.msra.mxu0 %v4243_v13 }
 0xacc   :  { %2389 = vmatprep.subr.bf16.mxu1 %v4238_v14  ;;  %2430 = vmatprep.subr.bf16.mxu0 %v4248_v15 }
 0xacf   :  { %2390 = vmatpush1.bf16.msra.mxu1 %v4253_v8  ;;  %2431 = vmatpush1.bf16.msra.mxu0 %v4263_v9 }
 0xad0   :  { %2391 = vmatprep.subr.bf16.mxu1 %v4258_v10  ;;  %2432 = vmatprep.subr.bf16.mxu0 %v4268_v11 }
 0xad3   :  { %2392 = vmatpush1.bf16.msra.mxu1 %v4273_v4  ;;  %2433 = vmatpush1.bf16.msra.mxu0 %v4279_v5 }
 0xad4   :  { %2511 = vmatprep.subr.bf16.mxu1 %v4124_v44  ;;  %2552 = vmatprep.subr.bf16.mxu0 %v4137_v51  ;;  %v4680_v51 = vld [vmem:[#allocation25_spill] sm:$0xff] }
 0xb76   :  { %v2275_v40 = vpop.f32.mrf.mxu1  ;;  %v2316_v55 = vpop.f32.mrf.mxu0 }
 0xb77   :  { %v2327_v61 = vrot.slane %v2275_v40, 3  ;;  %v2329_v44 = vrot.slane %v2316_v55, 3 }
 0xb78   :  { %v2277_v60 = vpop.f32.mrf.mxu1  ;;  %v2318_v59 = vpop.f32.mrf.mxu0 }
 0xb79   :  { %v2335_v2 = vadd.f32 %v2327_v61, %v4678_v45  ;;  %v2328_v57 = vrot.slane %v2277_v60, 3  ;;  %v2337_v7 = vadd.f32 %v2329_v44, %v4680_v51  ;;  %v2330_v42 = vrot.slane %v2318_v59, 3 }
 0xb7a   :  { %v2279_v32 = vpop.f32.mrf.mxu1  ;;  %v2320_v3 = vpop.f32.mrf.mxu0 }
 0xb7b   :  { %v2986_v38 = vmul.f32 -1.442695, %v2335_v2  ;;  %v2336_v63 = vadd.f32 %v2328_v57, %v4679_v58  ;;  %v2988_v39 = vmul.f32 -1.442695, %v2337_v7  ;;  %v2338_v6 = vadd.f32 %v2330_v42, %v4681_v53 }
 0xb7c   :  { %v2280_v37 = vpop.f32.mrf.mxu1  ;;  %v2321_v47 = vpop.f32.mrf.mxu0  ;;  %v2359_v57 = vrot.slane %v4558_v52, 7 }
 0xb7d   :  { %3434 = vpow2.f32 %v2986_v38  ;;  %v2987_v36 = vmul.f32 -1.442695, %v2336_v63 }
 0xb7f   :  { %3436 = vpow2.f32 %v2987_v36 }
 0xb80   :  { %3438 = vpow2.f32 %v2988_v39 }
 0xb8a   :  { %v3435_v56 = vpop.eup %3434 }
 0xb8b   :  { %v2348_v33 = vadd.f32 1.0, %v3435_v56 }
 0xb8c   :  { %v3437_v40 = vpop.eup %3436 }
 0xb8d   :  { %3440 = vrcp.f32 %v2348_v33  ;;  %v2349_v61 = vadd.f32 1.0, %v3437_v40  ;;  %v3439_v60 = vpop.eup %3438 }
 0xb8e   :  { %3442 = vtanh.f32 %v2338_v6  ;;  %v2350_v32 = vadd.f32 1.0, %v3439_v60 }
 0xb8f   :  { %3444 = vrcp.f32 %v2349_v61 }
 0xb90   :  { %3446 = vrcp.f32 %v2350_v32 }
 0xb9a   :  { %v3441_v45 = vpop.eup %3440 }
 0xb9b   :  { %v3443_v2 = vpop.eup %3442 }
 0xb9c   :  { %v3445_v55 = vpop.eup %3444  ;;  %v2362_v59 = vmul.f32 %v3443_v2, %v3441_v45 }
 0xb9d   :  { %v2361_v3 = vmul.f32 %v3445_v55, %v2359_v57  ;;  %v3447_v58 = vpop.eup %3446 }
 0xb9f   :  { %v4600_v38 = vadd.f32 %v2362_v59, %v2361_v3 }
 0xba1   :  { %3448 = vtanh.f32 %v4600_v38 }
 0xbae   :  { %v3449_v63 = vpop.eup %3448 }
 0xbaf   :  { %v2365_v37 = vmul.f32 %v3449_v63, %v3447_v58 }
 0xbb1   :  { %v2367_v47 = vrot.slane %v2365_v37, 5  ;;  %v2371_v36 = vpack.c.bf16 %v2365_v37, %v2365_v37 }
 0xbb3   :  { %2369 = vst [vmem:[#allocation4 + $0x5] sm:$0x1] %v2367_v47  ;;  %2370 = vst [vmem:[#allocation4 + $0xa] sm:$0x1] %v2367_v47  ;;  %v2373_v44 = vshrl.u32 %v2371_v36, 16 }
 0xbb5   :  { %v2375_v51 = vrot.slane %v2373_v44, 2 }
 0xbb7   :  { %2410 = vmatmul.mubr.bf16.vlgmr.msra.gmra.mxu1 %v2375_v51  ;;  %2451 = vmatmul.mubr.bf16.vlgmr.msra.gmra.mxu0 %v2375_v51 }
 0xbb8   :  { %2512 = vmatpush1.bf16.msra.mxu1 %v4128_v49  ;;  %2553 = vmatpush1.bf16.msra.mxu0 %v4143_v28 }
 0xbb9   :  { %2513 = vmatprep.subr.bf16.mxu1 %v4132_v48  ;;  %2554 = vmatprep.subr.bf16.mxu0 %v4147_v30 }
 0xbba   :  { %2543 = vmatprep.mubr.bf16.mxu1 %v4675_v62  ;;  %2584 = vmatprep.mubr.bf16.mxu0 %v4675_v62 }
 0xbbc   :  { %2514 = vmatpush1.bf16.msra.mxu1 %v4152_v41  ;;  %2555 = vmatpush1.bf16.msra.mxu0 %v4163_v29 }
 0xbbd   :  { %2515 = vmatprep.subr.bf16.mxu1 %v4158_v46  ;;  %2556 = vmatprep.subr.bf16.mxu0 %v4168_v24 }
 0xbc0   :  { %2516 = vmatpush1.bf16.msra.mxu1 %v4173_v26  ;;  %2557 = vmatpush1.bf16.msra.mxu0 %v4183_v25 }
 0xbc1   :  { %2517 = vmatprep.subr.bf16.mxu1 %v4178_v31  ;;  %2558 = vmatprep.subr.bf16.mxu0 %v4188_v27 }
 0xbc4   :  { %2518 = vmatpush1.bf16.msra.mxu1 %v4193_v20  ;;  %2559 = vmatpush1.bf16.msra.mxu0 %v4203_v21 }
 0xbc5   :  { %2519 = vmatprep.subr.bf16.mxu1 %v4198_v22  ;;  %2560 = vmatprep.subr.bf16.mxu0 %v4208_v23  ;;  %v4682_v23 = vld [vmem:[#allocation27_spill] sm:$0xff] }
 0xbc8   :  { %2520 = vmatpush1.bf16.msra.mxu1 %v4213_v16  ;;  %2561 = vmatpush1.bf16.msra.mxu0 %v4223_v17 }
 0xbc9   :  { %2521 = vmatprep.subr.bf16.mxu1 %v4218_v18  ;;  %2562 = vmatprep.subr.bf16.mxu0 %v4228_v19 }
 0xbcc   :  { %2522 = vmatpush1.bf16.msra.mxu1 %v4233_v12  ;;  %2563 = vmatpush1.bf16.msra.mxu0 %v4243_v13 }
 0xbcd   :  { %2523 = vmatprep.subr.bf16.mxu1 %v4238_v14  ;;  %2564 = vmatprep.subr.bf16.mxu0 %v4248_v15 }
 0xbd0   :  { %2524 = vmatpush1.bf16.msra.mxu1 %v4253_v8  ;;  %2565 = vmatpush1.bf16.msra.mxu0 %v4263_v9 }
 0xbd1   :  { %2525 = vmatprep.subr.bf16.mxu1 %v4258_v10  ;;  %2566 = vmatprep.subr.bf16.mxu0 %v4268_v11  ;;  %v2495_v11 = vrot.slane %v4600_v38, 7 }
 0xbd4   :  { %2526 = vmatpush1.bf16.msra.mxu1 %v4273_v4  ;;  %2567 = vmatpush1.bf16.msra.mxu0 %v4279_v5 }
 0xc77   :  { %v2411_v49 = vpop.f32.mrf.mxu1  ;;  %v2452_v48 = vpop.f32.mrf.mxu0 }
 0xc78   :  { %v2463_v28 = vrot.slane %v2411_v49, 2  ;;  %v2465_v21 = vrot.slane %v2452_v48, 2 }
 0xc79   :  { %v2413_v30 = vpop.f32.mrf.mxu1  ;;  %v2454_v41 = vpop.f32.mrf.mxu0 }
 0xc7a   :  { %v2471_v46 = vadd.f32 %v2463_v28, %v4440_v1  ;;  %v2464_v29 = vrot.slane %v2413_v30, 2  ;;  %v2473_v16 = vadd.f32 %v2465_v21, %v4682_v23  ;;  %v2466_v18 = vrot.slane %v2454_v41, 2 }
 0xc7b   :  { %v2415_v24 = vpop.f32.mrf.mxu1  ;;  %v2456_v26 = vpop.f32.mrf.mxu0 }
 0xc7c   :  { %v2989_v31 = vmul.f32 -1.442695, %v2471_v46  ;;  %v2472_v25 = vadd.f32 %v2464_v29, %v4443_v0  ;;  %v2991_v17 = vmul.f32 -1.442695, %v2473_v16  ;;  %v2474_v12 = vadd.f32 %v2466_v18, %v4454_v34 }
 0xc7d   :  { %v2416_v27 = vpop.f32.mrf.mxu1  ;;  %v2457_v20 = vpop.f32.mrf.mxu0 }
 0xc7e   :  { %3450 = vpow2.f32 %v2989_v31  ;;  %v2990_v22 = vmul.f32 -1.442695, %v2472_v25 }
 0xc80   :  { %3452 = vpow2.f32 %v2990_v22 }
 0xc81   :  { %3454 = vpow2.f32 %v2991_v17 }
 0xc8b   :  { %v3451_v19 = vpop.eup %3450 }
 0xc8c   :  { %v2484_v14 = vadd.f32 1.0, %v3451_v19 }
 0xc8d   :  { %v3453_v13 = vpop.eup %3452 }
 0xc8e   :  { %3456 = vrcp.f32 %v2484_v14  ;;  %v2485_v15 = vadd.f32 1.0, %v3453_v13  ;;  %v3455_v8 = vpop.eup %3454 }
 0xc8f   :  { %3458 = vtanh.f32 %v2474_v12  ;;  %v2486_v5 = vadd.f32 1.0, %v3455_v8 }
 0xc90   :  { %3460 = vrcp.f32 %v2485_v15 }
 0xc91   :  { %3462 = vrcp.f32 %v2486_v5 }
 0xc9b   :  { %v3457_v10 = vpop.eup %3456 }
 0xc9c   :  { %v3459_v9 = vpop.eup %3458 }
 0xc9d   :  { %v3461_v4 = vpop.eup %3460  ;;  %v2498_v1 = vmul.f32 %v3459_v9, %v3457_v10 }
 0xc9e   :  { %v2497_v62 = vmul.f32 %v3461_v4, %v2495_v11  ;;  %v3463_v34 = vpop.eup %3462 }
 0xca0   :  { %v2499_v0 = vadd.f32 %v2498_v1, %v2497_v62 }
 0xca2   :  { %3464 = vtanh.f32 %v2499_v0  ;;  %v2629_v30 = vrot.slane %v2499_v0, 7 }
 0xcaf   :  { %v3465_v52 = vpop.eup %3464 }
 0xcb0   :  { %v2501_v7 = vmul.f32 %v3465_v52, %v3463_v34 }
 0xcb2   :  { %v2503_v42 = vrot.slane %v2501_v7, 6  ;;  %v2507_v39 = vpack.c.bf16 %v2501_v7, %v2501_v7 }
 0xcb4   :  { %2505 = vst [vmem:[#allocation4 + $0x6] sm:$0x1] %v2503_v42  ;;  %2506 = vst [vmem:[#allocation4 + $0x9] sm:$0x1] %v2503_v42  ;;  %v2509_v56 = vrot.slane %v2507_v39, 3 }
 0xcb6   :  { %2544 = vmatmul.mubr.bf16.vlgmr.msra.gmra.mxu1 %v2509_v56  ;;  %2585 = vmatmul.mubr.bf16.vlgmr.msra.gmra.mxu0 %v2509_v56 }
 0xd76   :  { %v2545_v53 = vpop.f32.mrf.mxu1  ;;  %v2586_v6 = vpop.f32.mrf.mxu0 }
 0xd77   :  { %v2597_v33 = vrot.slane %v2545_v53, 1  ;;  %v2599_v58 = vrot.slane %v2586_v6, 1 }
 0xd78   :  { %v2547_v40 = vpop.f32.mrf.mxu1  ;;  %v2588_v61 = vpop.f32.mrf.mxu0 }
 0xd79   :  { %v2605_v60 = vadd.f32 %v2597_v33, %v4498_v50  ;;  %v2598_v45 = vrot.slane %v2547_v40, 1  ;;  %v2607_v63 = vadd.f32 %v2599_v58, %v4507_v43  ;;  %v2600_v37 = vrot.slane %v2588_v61, 1 }
 0xd7a   :  { %v2549_v2 = vpop.f32.mrf.mxu1  ;;  %v2590_v57 = vpop.f32.mrf.mxu0 }
 0xd7b   :  { %v2992_v55 = vmul.f32 -1.442695, %v2605_v60  ;;  %v2606_v32 = vadd.f32 %v2598_v45, %v4501_v54  ;;  %v2994_v47 = vmul.f32 -1.442695, %v2607_v63  ;;  %v2608_v44 = vadd.f32 %v2600_v37, %v4512_v35 }
 0xd7c   :  { %v2550_v3 = vpop.f32.mrf.mxu1  ;;  %v2591_v59 = vpop.f32.mrf.mxu0 }
 0xd7d   :  { %3466 = vpow2.f32 %v2992_v55  ;;  %v2993_v38 = vmul.f32 -1.442695, %v2606_v32 }
 0xd7f   :  { %3468 = vpow2.f32 %v2993_v38 }
 0xd80   :  { %3470 = vpow2.f32 %v2994_v47 }
 0xd8a   :  { %v3467_v36 = vpop.eup %3466 }
 0xd8b   :  { %v2618_v50 = vadd.f32 1.0, %v3467_v36 }
 0xd8c   :  { %v3469_v51 = vpop.eup %3468 }
 0xd8d   :  { %3472 = vrcp.f32 %v2618_v50  ;;  %v2619_v49 = vadd.f32 1.0, %v3469_v51  ;;  %v3471_v54 = vpop.eup %3470 }
 0xd8e   :  { %3474 = vtanh.f32 %v2608_v44  ;;  %v2620_v46 = vadd.f32 1.0, %v3471_v54 }
 0xd8f   :  { %3476 = vrcp.f32 %v2619_v49 }
 0xd90   :  { %3478 = vrcp.f32 %v2620_v46 }
 0xd9a   :  { %v3473_v48 = vpop.eup %3472 }
 0xd9b   :  { %v3475_v28 = vpop.eup %3474 }
 0xd9c   :  { %v3477_v41 = vpop.eup %3476  ;;  %v2632_v43 = vmul.f32 %v3475_v28, %v3473_v48 }
 0xd9d   :  { %v2631_v29 = vmul.f32 %v3477_v41, %v2629_v30  ;;  %v3479_v26 = vpop.eup %3478 }
 0xd9f   :  { %v2633_v24 = vadd.f32 %v2632_v43, %v2631_v29 }
 0xda1   :  { %3480 = vtanh.f32 %v2633_v24 }
 0xdae   :  { %v3481_v35 = vpop.eup %3480 }
 0xdaf   :  { %v2635_v31 = vmul.f32 %v3481_v35, %v3479_v26 }
 0xdb1   :  { %v2637_v25 = vrot.slane %v2635_v31, 7 }
 0xdb3   :  { %2639 = vst [vmem:[#allocation4 + $0x7] sm:$0x1] %v2637_v25  ;;  %2640 = vst [vmem:[#allocation4 + $0x8] sm:$0x1] %v2637_v25 }
 0xdb4   :  { %3562 = dma.done.wait [#allocation8 + $0x2], 2048 }
 0xdb5   :  { %3563 = vsyncadd [#allocation8 + $0x2], 4294965248  ;;  %v3482_v27 = vld [vmem:[#allocation7 + $0x78] sm:$0xff]   ;;  %v3484_v22 = vld [vmem:[#allocation7 + $0x70] sm:$0xff]   ;;  %s3574_s14 = smov [#allocation9]  }
 0xdb6   :  { %v3483_v20 = vld [vmem:[#allocation7 + $0x38] sm:$0xff]   ;;  %3165 = vmatprep.subr.bf16.mxu1 %v3482_v27  ;;  %v3485_v21 = vld [vmem:[#allocation7 + $0x30] sm:$0xff]   ;;  %v3486_v23 = vld [vmem:[#allocation7 + $0x68] sm:$0xff]   ;;  %s2831_s15 = sshll.u32 %s3574_s14, 4  ;;  %s2832_s15 = int_to_ptr.vmem [resolvable:$true] %s2831_s15 }
 0xdb7   :  { %3166 = vmatpush3.bf16.msra.mxu1 %v3483_v20  ;;  %v3487_v16 = vld [vmem:[#allocation7 + $0x28] sm:$0xff]   ;;  %v3488_v18 = vld [vmem:[#allocation7 + $0x60] sm:$0xff]   ;;  %v3490_v19 = vld [vmem:[#allocation7 + $0x58] sm:$0xff]   ;;  %s3538_s16 = scalar_lea.vmem %s2832_s15, 128  ;;  %p3543_p11 = scmp.lt.s32.totalorder %s2832_s15, %s2832_s15 }
 0xdb8   :  { %3167 = vmatprep.subr.bf16.mxu1 %v3484_v22  ;;  %v3489_v17 = vld [vmem:[#allocation7 + $0x20] sm:$0xff]   ;;  %v3491_v12 = vld [vmem:[#allocation7 + $0x18] sm:$0xff]   ;;  %v3492_v14 = vld [vmem:[#allocation7 + $0x50] sm:$0xff]   ;;  %p3539_p10 = scmp.ne.s32.totalorder %s2832_s15, %s3538_s16  ;;  %p3544_p12 = scmp.lt.s32.totalorder %s3538_s16, %s3538_s16 }
 0xdb9   :  { %v3493_v8 = vld [vmem:[#allocation7 + $0x10] sm:$0xff]   ;;  %v3494_v10 = vld [vmem:[#allocation7 + $0x48] sm:$0xff]   ;;  %v3496_v11 = vld [vmem:[#allocation7 + $0x40] sm:$0xff]  }
 0xdba   :  { %v2646_v13 = vld [vmem:[#allocation4 + $0x8] sm:$0xff]  ;;  %v3495_v9 = vld [vmem:[#allocation7 + $0x8] sm:$0xff]   ;;  %v3497_v4 = vld [vmem:[#allocation7] sm:$0xff]   ;;  %p3545_p13 = por %p3544_p12, %p3543_p11 }
 0xdbb   :  { %3168 = vmatpush3.bf16.msra.mxu1 %v3485_v21  ;;  %v2648_v15 = vpack.c.bf16 %v2646_v13, %v2646_v13  ;;  %v2645_v5 = vld [vmem:[#allocation4] sm:$0xff]  ;;  %v2995_v0 = vld [vmem:[%s4657_s7] ss:$0 sm:$0xff] }
 0xdbc   :  { %3169 = vmatprep.subr.bf16.mxu1 %v3486_v23  ;;  %v2647_v62 = vpack.c.bf16 %v2645_v5, %v2645_v5  ;;  %p3546_p0 = pnand %p3545_p13, %p3539_p10 }
 0xdbd   :  { %2816 = vmatprep.mubr.bf16.mxu1 %v2648_v15 }
 0xdbf   :  { %3170 = vmatpush3.bf16.msra.mxu1 %v3487_v16 }
 0xdc0   :  { %3171 = vmatprep.subr.bf16.mxu1 %v3488_v18 }
 0xdc3   :  { %3172 = vmatpush3.bf16.msra.mxu1 %v3489_v17 }
 0xdc4   :  { %3173 = vmatprep.subr.bf16.mxu1 %v3490_v19 }
 0xdc7   :  { %3174 = vmatpush3.bf16.msra.mxu1 %v3491_v12 }
 0xdc8   :  { %3175 = vmatprep.subr.bf16.mxu1 %v3492_v14 }
 0xdcb   :  { %3176 = vmatpush3.bf16.msra.mxu1 %v3493_v8 }
 0xdcc   :  { %3177 = vmatprep.subr.bf16.mxu1 %v3494_v10 }
 0xdcf   :  { %3178 = vmatpush3.bf16.msra.mxu1 %v3495_v9 }
 0xdd0   :  { %3179 = vmatprep.subr.bf16.mxu1 %v3496_v11 }
 0xdd3   :  { %3180 = vmatpush3.bf16.msra.mxu1 %v3497_v4 }
 0xdd6   :  { %2817 = vmatmul.mubr.bf16.vlgmr.msra.gmra.mxu1 %v2647_v62 }
 0xe96   :  { %v3181_v1 = vpop.f32.mrf.mxu1 }
 0xe98   :  { %v3182_v34 = vpop.f32.mrf.mxu1 }
 0xe99   :  { %v3183_v52 = vadd.f32 %v3182_v34, %v3181_v1 }
 0xe9a   :  { %v3184_v7 = vpop.f32.mrf.mxu1 }
 0xe9b   :  { %v2819_v42 = vadd.f32 %v3183_v52, %v2995_v0 }
 0xe9c   :  { %v3185_v39 = vpop.f32.mrf.mxu1 }
 0xe9d   :  { %2824 = vst [vmem:[#allocation9] sm:$0xff] %v2819_v42 }
 0xe9e   :  { %3549 = shalt.err (!%p3546_p0)
}
 0xe9f   :  { %2834 = dma.vmem_to_hbm [thread:$0]  %s2832_s15, 128, %s4661_s11, [#allocation10]  }
 0xea0   :  { %3564 = dma.done.wait [#allocation10], 128  }
 0xea1   :  { %3565 = vsyncadd [#allocation10], 4294967168 }
 0xea2   :  { %2838 = vsyncpa [#allocation10], 1 }
 0xea3   :  { %2839 = vsyncmov [#allocation8] }
 0xea6   :  { %s2840_s7 = vpop.sfrf %2839 }
 0xea7   :  { %p3012_p1 = scmp.ne.s32.totalorder %s2840_s7, 0 }
 0xea9   :  { %2844 = shalt.err (%p3012_p1)  }
 0xeaa   :  { %2846 = vsyncmov [#allocation8 + $0x1] }
 0xead   :  { %s2847_s19 = vpop.sfrf %2846 }
 0xeae   :  { %p3013_p2 = scmp.ne.s32.totalorder %s2847_s19, 0 }
 0xeb0   :  { %2851 = shalt.err (%p3013_p2)  }
 0xeb1   :  { %2853 = vsyncmov [#allocation8 + $0x2] }
 0xeb4   :  { %s2854_s20 = vpop.sfrf %2853 }
 0xeb5   :  { %p3014_p3 = scmp.ne.s32.totalorder %s2854_s20, 0 }
 0xeb7   :  { %2858 = shalt.err (%p3014_p3)  }

</bundles_post_ra>
